<compile_context>
chip_gen: v7x
topology: tpu7x:2x2x1
jax: 0.10.0
libtpu: 0.0.40
codegen_flags: <defaults>
</compile_context>

<pallas_src>
import math

import jax
import jax.numpy as jnp
import numpy as np
from jax.experimental import pallas as pl
from jax.experimental.pallas import tpu as pltpu

# Small but (8,128)-aligned shapes (real MedCPT: H=768, L=12, NH=12, FF=3072, S<=64).
B, S, H = 2, 8, 128        # batch, sequence, hidden
NH, HD = 4, 32             # heads, head dim (NH * HD == H)
FF = 256                   # FFN intermediate size
L = 2                      # encoder layers
V = 128                    # vocab size
NMOD = 4                   # number of modalities (nn.Embedding(4, 768))
LN_EPS = 1e-12             # BERT LayerNorm eps

NBT = 1                    # batch tiles ("parallel" grid axis); TODO(synk): 2 on v7x
BT = B // NBT              # batch elements per tile
M = BT * S                 # stacked matmul M dimension


def _layernorm(x, g, b):
    mu = jnp.mean(x, axis=-1, keepdims=True)
    var = jnp.mean(jnp.square(x - mu), axis=-1, keepdims=True)
    return (x - mu) * jax.lax.rsqrt(var + LN_EPS) * g + b


_LAYER_PARAM_NAMES = ['wqkv', 'bqkv', 'wo', 'bo', 'ln1_g', 'ln1_b',
                      'w1', 'b1', 'w2', 'b2', 'ln2_g', 'ln2_b']


# ----------------------------------------------------------------------------
# Fused kernel: embedding gather + LN -> L encoder layers -> CLS + modality add
# ----------------------------------------------------------------------------
def medcpt_kernel(ids_ref, mod_ref,                      # scalar prefetch (SMEM)
                  wemb_ref, pt_ref, eg_ref, eb_ref,      # emb table + pos/type + LN
                  wqkv_ref, bqkv_ref, wo_ref, bo_ref, g1_ref, n1_ref,
                  w1_ref, b1_ref, w2_ref, b2_ref, g2_ref, n2_ref,
                  mtab_ref,                              # (NMOD, H) modality table
                  cls_ref,                               # out view: (BT, H)
                  x_sc):                                 # scratch: (M, H) f32
    t = pl.program_id(0)        # batch tile ("parallel")
    l = pl.program_id(1)        # encoder layer ("arbitrary"; state carried in x_sc)
    bf16, f32 = jnp.bfloat16, jnp.float32

    # --- layer 0: word-embedding gather (VMEM dynamic row reads) + pos/type + LN ---
    @pl.when(l == 0)
    def _():
        base = t * M
        for r in range(M):
            # TODO(synk): clamp silently maps OOV ids to row V-1 (no error raised).
            tok = jnp.clip(ids_ref[base + r], 0, V - 1)
            x_sc[pl.ds(r, 1), :] = wemb_ref[pl.ds(tok, 1), :]
        x_sc[...] = _layernorm(x_sc[...] + pt_ref[...], eg_ref[...], eb_ref[...])

    # --- encoder layer l (bf16 MXU operands, f32 accumulation / vector math) ---
    x = x_sc[...]                                         # (M, H) f32
    xb = x.astype(bf16)

    # fused QKV: one (M, H) x (H, 3H) matmul, 128-lane-aligned slices
    qkv = jnp.dot(xb, wqkv_ref[...], preferred_element_type=f32) + bqkv_ref[...]
    scale = 1.0 / math.sqrt(HD)
    q = qkv[:, :H] * scale
    k = qkv[:, H:2 * H]
    v = qkv[:, 2 * H:3 * H]

    # per-(batch, head) attention; heads packed back along lanes, batches along
    # sublanes, so the output projection is a single K=128 matmul.
    ctx_rows = []
    for bl in range(BT):                                  # static unroll, BT small
        rs = slice(bl * S, (bl + 1) * S)
        ctx_heads = []
        for h in range(NH):                               # static unroll, NH small
            cs = slice(h * HD, (h + 1) * HD)
            qh = q[rs, cs].astype(bf16)
            kh = k[rs, cs].astype(bf16)
            vh = v[rs, cs].astype(bf16)
            sc = jnp.einsum('qd,kd->qk', qh, kh, preferred_element_type=f32)
            sc = sc - jnp.max(sc, axis=-1, keepdims=True)
            p = jnp.exp(sc)
            p = p * pl.reciprocal(jnp.sum(p, axis=-1, keepdims=True), approx=True)
            ctx_heads.append(jnp.dot(p.astype(bf16), vh,
                                     preferred_element_type=f32))   # (S, HD)
        ctx_rows.append(jnp.concatenate(ctx_heads, axis=-1))         # (S, H)
    ctx = jnp.concatenate(ctx_rows, axis=0)                           # (M, H)

    attn = jnp.dot(ctx.astype(bf16), wo_ref[...],
                   preferred_element_type=f32) + bo_ref[...]
    x = _layernorm(x + attn, g1_ref[...], n1_ref[...])

    hh = jnp.dot(x.astype(bf16), w1_ref[...], preferred_element_type=f32) + b1_ref[...]
    hh = jax.nn.gelu(hh, approximate=True)
    ff = jnp.dot(hh.astype(bf16), w2_ref[...], preferred_element_type=f32) + b2_ref[...]
    x = _layernorm(x + ff, g2_ref[...], n2_ref[...])
    x_sc[...] = x

    # --- last layer: CLS pooling + modality-embedding add (direct row read) ---
    @pl.when(l == pl.num_programs(1) - 1)
    def _():
        for bl in range(BT):
            mod_id = jnp.clip(mod_ref[t * BT + bl], 0, NMOD - 1)
            mod_row = mtab_ref[pl.ds(mod_id, 1), :]                   # (1, H)
            cls_ref[pl.ds(bl, 1), :] = x[bl * S:bl * S + 1, :] + mod_row


def medcpt_forward(ids, modality, params, lp):
    ids_flat = ids.reshape(B * S).astype(jnp.int32)
    modality = modality.reshape(B).astype(jnp.int32)
    layer_args = [lp[name] for name in _LAYER_PARAM_NAMES]

    def w_spec(arr):
        nd = arr.ndim - 1
        return pl.BlockSpec((None,) + arr.shape[1:],
                            lambda t, l, ids_r, mod_r, nd=nd: (l,) + (0,) * nd)

    def const_spec(shape):
        nd = len(shape)
        return pl.BlockSpec(shape, lambda t, l, ids_r, mod_r, nd=nd: (0,) * nd)

    grid_spec = pltpu.PrefetchScalarGridSpec(
        num_scalar_prefetch=2,
        grid=(NBT, L),
        in_specs=[const_spec((V, H)),          # word_emb resident in VMEM (small V)
                  const_spec((M, H)),          # pos+type folded, tiled over batch
                  const_spec((1, H)), const_spec((1, H)),
                  *[w_spec(a) for a in layer_args],
                  const_spec((NMOD, H))],
        out_specs=pl.BlockSpec((BT, H), lambda t, l, ids_r, mod_r: (t, 0)),
        scratch_shapes=[pltpu.VMEM((M, H), jnp.float32)],
    )
    out = pl.pallas_call(
        medcpt_kernel,
        out_shape=jax.ShapeDtypeStruct((B, H), jnp.float32),
        grid_spec=grid_spec,
        compiler_params=pltpu.CompilerParams(
            dimension_semantics=("parallel", "arbitrary")),
    )(ids_flat, modality, params['word_emb'], params['pt_emb'],
      params['emb_ln_g'], params['emb_ln_b'],
      *layer_args, params['mod_table'])
    return out


# ----------------------------------------------------------------------------
# Parameter init (deterministic, synthetic — no checkpoint load)
# ----------------------------------------------------------------------------
def init_params(key):
    f32, bf16 = jnp.float32, jnp.bfloat16

    def nrm(k, shape, dtype=f32):
        return (0.02 * jax.random.normal(k, shape, dtype=f32)).astype(dtype)

    ks = iter(jax.random.split(key, 20))
    word_emb = nrm(next(ks), (V, H))
    pos_emb = nrm(next(ks), (S, H))
    type_emb = nrm(next(ks), (1, H))
    params = {
        'word_emb': word_emb,
        'pos_emb': pos_emb,
        'type_emb': type_emb,
        # pos + type folded once on the host and tiled over the batch tile.
        'pt_emb': jnp.tile(pos_emb + type_emb, (BT, 1)),
        'emb_ln_g': jnp.ones((1, H), f32),
        'emb_ln_b': jnp.zeros((1, H), f32),
        'mod_table': nrm(next(ks), (NMOD, H)),
    }
    lp = {
        'wqkv': nrm(next(ks), (L, H, 3 * H), bf16),
        'bqkv': nrm(next(ks), (L, 1, 3 * H)),
        'wo': nrm(next(ks), (L, H, H), bf16), 'bo': nrm(next(ks), (L, 1, H)),
        'ln1_g': jnp.ones((L, 1, H), f32), 'ln1_b': jnp.zeros((L, 1, H), f32),
        'w1': nrm(next(ks), (L, H, FF), bf16), 'b1': nrm(next(ks), (L, 1, FF)),
        'w2': nrm(next(ks), (L, FF, H), bf16), 'b2': nrm(next(ks), (L, 1, H)),
        'ln2_g': jnp.ones((L, 1, H), f32), 'ln2_b': jnp.zeros((L, 1, H), f32),
    }
    return params, lp


# ----------------------------------------------------------------------------
# Pure-JAX reference (mirrors the kernel's bf16-matmul / f32-vector policy)
# ----------------------------------------------------------------------------
def reference_forward(ids, modality, params, lp):
    bf16, f32 = jnp.bfloat16, jnp.float32
    x = params['word_emb'][ids] + params['pos_emb'] + params['type_emb']
    x = _layernorm(x, params['emb_ln_g'], params['emb_ln_b'])
    scale = 1.0 / math.sqrt(HD)
    for l in range(L):
        xb = x.astype(bf16)
        qkv = jnp.einsum('bsh,hd->bsd', xb, lp['wqkv'][l],
                         preferred_element_type=f32) + lp['bqkv'][l]
        q = qkv[..., :H] * scale
        k = qkv[..., H:2 * H]
        v = qkv[..., 2 * H:3 * H]
        ctx_heads = []
        for h in range(NH):
            sl = slice(h * HD, (h + 1) * HD)
            qh = q[..., sl].astype(bf16)
            kh = k[..., sl].astype(bf16)
            vh = v[..., sl].astype(bf16)
            sc = jnp.einsum('bqd,bkd->bqk', qh, kh, preferred_element_type=f32)
            sc = sc - jnp.max(sc, axis=-1, keepdims=True)
            p = jnp.exp(sc)
            p = p / jnp.sum(p, axis=-1, keepdims=True)
            ctx_heads.append(jnp.einsum('bqk,bkd->bqd', p.astype(bf16), vh,
                                        preferred_element_type=f32))
        ctx = jnp.concatenate(ctx_heads, axis=-1)
        attn = jnp.einsum('bsd,dh->bsh', ctx.astype(bf16), lp['wo'][l],
                          preferred_element_type=f32) + lp['bo'][l]
        x = _layernorm(x + attn, lp['ln1_g'][l], lp['ln1_b'][l])
        hh = jnp.einsum('bsh,hf->bsf', x.astype(bf16), lp['w1'][l],
                        preferred_element_type=f32) + lp['b1'][l]
        hh = jax.nn.gelu(hh, approximate=True)
        ff = jnp.einsum('bsf,fh->bsh', hh.astype(bf16), lp['w2'][l],
                        preferred_element_type=f32) + lp['b2'][l]
        x = _layernorm(x + ff, lp['ln2_g'][l], lp['ln2_b'][l])
    cls = x[:, 0, :]
    return cls + params['mod_table'][modality]


if __name__ == "__main__":
    key = jax.random.PRNGKey(0)
    kp, kids, kmod = jax.random.split(key, 3)
    params, lp = init_params(kp)

    # Pre-tokenized inputs (see TODO(synk) above re: tokenizer).
    ids = jax.random.randint(kids, (B, S), 0, V, dtype=jnp.int32)
    modality = jax.random.randint(kmod, (B,), 0, NMOD, dtype=jnp.int32)

    out = medcpt_forward(ids, modality, params, lp)
    out = jax.block_until_ready(out)
    assert out.shape == (B, H) and out.dtype == jnp.float32

    ref = reference_forward(ids, modality, params, lp)
    np.testing.assert_allclose(np.asarray(out), np.asarray(ref),
                               rtol=2e-2, atol=2e-2)
    print("KERNEL_OK")
</pallas_src>

<mosaic_0001>
module attributes {stable_mosaic.version = 11 : i64} {
  func.func @medcpt_kernel(%arg0: i32, %arg1: i32, %arg2: memref<16xi32, #tpu.memory_space<smem>>, %arg3: memref<2xi32, #tpu.memory_space<smem>>, %arg4: memref<128x128xf32, #tpu.memory_space<vmem>>, %arg5: memref<16x128xf32, #tpu.memory_space<vmem>>, %arg6: memref<1x128xf32, #tpu.memory_space<vmem>>, %arg7: memref<1x128xf32, #tpu.memory_space<vmem>>, %arg8: memref<1x128x384xbf16, #tpu.memory_space<vmem>>, %arg9: memref<1x1x384xf32, #tpu.memory_space<vmem>>, %arg10: memref<1x128x128xbf16, #tpu.memory_space<vmem>>, %arg11: memref<1x1x128xf32, #tpu.memory_space<vmem>>, %arg12: memref<1x1x128xf32, #tpu.memory_space<vmem>>, %arg13: memref<1x1x128xf32, #tpu.memory_space<vmem>>, %arg14: memref<1x128x256xbf16, #tpu.memory_space<vmem>>, %arg15: memref<1x1x256xf32, #tpu.memory_space<vmem>>, %arg16: memref<1x256x128xbf16, #tpu.memory_space<vmem>>, %arg17: memref<1x1x128xf32, #tpu.memory_space<vmem>>, %arg18: memref<1x1x128xf32, #tpu.memory_space<vmem>>, %arg19: memref<1x1x128xf32, #tpu.memory_space<vmem>>, %arg20: memref<4x128xf32, #tpu.memory_space<vmem>>, %arg21: memref<2x128xf32, #tpu.memory_space<vmem>>, %arg22: memref<16x128xf32, #tpu.memory_space<vmem>>) attributes {dimension_semantics = [#tpu.dimension_semantics<parallel>, #tpu.dimension_semantics<arbitrary>], iteration_bounds = array<i64: 1, 2>, scalar_prefetch = 2 : i64, scratch_operands = 1 : i64, tpu.core_type = #tpu.core_type<tc>, window_params = [{pipeline_mode = #tpu.pipeline_mode<synchronous>, transform_indices = @transform_0, window_bounds = array<i64: 128, 128>}, {pipeline_mode = #tpu.pipeline_mode<synchronous>, transform_indices = @transform_1, window_bounds = array<i64: 16, 128>}, {pipeline_mode = #tpu.pipeline_mode<synchronous>, transform_indices = @transform_2, window_bounds = array<i64: 1, 128>}, {pipeline_mode = #tpu.pipeline_mode<synchronous>, transform_indices = @transform_3, window_bounds = array<i64: 1, 128>}, {transform_indices = @transform_4, window_bounds = array<i64: 1, 128, 384>}, {transform_indices = @transform_5, window_bounds = array<i64: 1, 1, 384>}, {transform_indices = @transform_6, window_bounds = array<i64: 1, 128, 128>}, {transform_indices = @transform_7, window_bounds = array<i64: 1, 1, 128>}, {transform_indices = @transform_8, window_bounds = array<i64: 1, 1, 128>}, {transform_indices = @transform_9, window_bounds = array<i64: 1, 1, 128>}, {transform_indices = @transform_10, window_bounds = array<i64: 1, 128, 256>}, {transform_indices = @transform_11, window_bounds = array<i64: 1, 1, 256>}, {transform_indices = @transform_12, window_bounds = array<i64: 1, 256, 128>}, {transform_indices = @transform_13, window_bounds = array<i64: 1, 1, 128>}, {transform_indices = @transform_14, window_bounds = array<i64: 1, 1, 128>}, {transform_indices = @transform_15, window_bounds = array<i64: 1, 1, 128>}, {pipeline_mode = #tpu.pipeline_mode<synchronous>, transform_indices = @transform_16, window_bounds = array<i64: 4, 128>}, {transform_indices = @transform_17, window_bounds = array<i64: 2, 128>}]} {
    %c0_i32 = arith.constant 0 : i32
    %0 = arith.cmpi eq, %arg1, %c0_i32 : i32
    %1 = arith.extui %0 : i1 to i32
    %c0_i32_0 = arith.constant 0 : i32
    %2 = arith.cmpi ne, %1, %c0_i32_0 : i32
    scf.if %2 {
      %c16_i32 = arith.constant 16 : i32
      %267 = arith.muli %arg0, %c16_i32 : i32
      %c0_i32_91 = arith.constant 0 : i32
      %268 = arith.addi %267, %c0_i32_91 : i32
      %269 = arith.index_cast %268 : i32 to index
      %270 = memref.load %arg2[%269] : memref<16xi32, #tpu.memory_space<smem>>
      %c0_i32_92 = arith.constant 0 : i32
      %c127_i32 = arith.constant 127 : i32
      %271 = arith.maxsi %c0_i32_92, %270 : i32
      %272 = arith.minsi %c127_i32, %271 : i32
      %273 = arith.index_cast %272 : i32 to index
      %c0_93 = arith.constant 0 : index
      %274 = vector.load %arg4[%273, %c0_93] : memref<128x128xf32, #tpu.memory_space<vmem>>, vector<1x128xf32>
      %c0_94 = arith.constant 0 : index
      %c0_95 = arith.constant 0 : index
      %275 = vector.load %arg22[%c0_94, %c0_95] : memref<16x128xf32, #tpu.memory_space<vmem>>, vector<1x128xf32>
      tpu.vector_store %arg22[%c0_94, %c0_95], %274 {strides = array<i32>} : memref<16x128xf32, #tpu.memory_space<vmem>>, vector<1x128xf32>,
      %c1_i32_96 = arith.constant 1 : i32
      %276 = arith.addi %267, %c1_i32_96 : i32
      %277 = arith.index_cast %276 : i32 to index
      %278 = memref.load %arg2[%277] : memref<16xi32, #tpu.memory_space<smem>>
      %c0_i32_97 = arith.constant 0 : i32
      %c127_i32_98 = arith.constant 127 : i32
      %279 = arith.maxsi %c0_i32_97, %278 : i32
      %280 = arith.minsi %c127_i32_98, %279 : i32
      %281 = arith.index_cast %280 : i32 to index
      %c0_99 = arith.constant 0 : index
      %282 = vector.load %arg4[%281, %c0_99] : memref<128x128xf32, #tpu.memory_space<vmem>>, vector<1x128xf32>
      %c1 = arith.constant 1 : index
      %c0_100 = arith.constant 0 : index
      %283 = vector.load %arg22[%c1, %c0_100] : memref<16x128xf32, #tpu.memory_space<vmem>>, vector<1x128xf32>
      tpu.vector_store %arg22[%c1, %c0_100], %282 {strides = array<i32>} : memref<16x128xf32, #tpu.memory_space<vmem>>, vector<1x128xf32>,
      %c2_i32 = arith.constant 2 : i32
      %284 = arith.addi %267, %c2_i32 : i32
      %285 = arith.index_cast %284 : i32 to index
      %286 = memref.load %arg2[%285] : memref<16xi32, #tpu.memory_space<smem>>
      %c0_i32_101 = arith.constant 0 : i32
      %c127_i32_102 = arith.constant 127 : i32
      %287 = arith.maxsi %c0_i32_101, %286 : i32
      %288 = arith.minsi %c127_i32_102, %287 : i32
      %289 = arith.index_cast %288 : i32 to index
      %c0_103 = arith.constant 0 : index
      %290 = vector.load %arg4[%289, %c0_103] : memref<128x128xf32, #tpu.memory_space<vmem>>, vector<1x128xf32>
      %c2 = arith.constant 2 : index
      %c0_104 = arith.constant 0 : index
      %291 = vector.load %arg22[%c2, %c0_104] : memref<16x128xf32, #tpu.memory_space<vmem>>, vector<1x128xf32>
      tpu.vector_store %arg22[%c2, %c0_104], %290 {strides = array<i32>} : memref<16x128xf32, #tpu.memory_space<vmem>>, vector<1x128xf32>,
      %c3_i32 = arith.constant 3 : i32
      %292 = arith.addi %267, %c3_i32 : i32
      %293 = arith.index_cast %292 : i32 to index
      %294 = memref.load %arg2[%293] : memref<16xi32, #tpu.memory_space<smem>>
      %c0_i32_105 = arith.constant 0 : i32
      %c127_i32_106 = arith.constant 127 : i32
      %295 = arith.maxsi %c0_i32_105, %294 : i32
      %296 = arith.minsi %c127_i32_106, %295 : i32
      %297 = arith.index_cast %296 : i32 to index
      %c0_107 = arith.constant 0 : index
      %298 = vector.load %arg4[%297, %c0_107] : memref<128x128xf32, #tpu.memory_space<vmem>>, vector<1x128xf32>
      %c3 = arith.constant 3 : index
      %c0_108 = arith.constant 0 : index
      %299 = vector.load %arg22[%c3, %c0_108] : memref<16x128xf32, #tpu.memory_space<vmem>>, vector<1x128xf32>
      tpu.vector_store %arg22[%c3, %c0_108], %298 {strides = array<i32>} : memref<16x128xf32, #tpu.memory_space<vmem>>, vector<1x128xf32>,
      %c4_i32 = arith.constant 4 : i32
      %300 = arith.addi %267, %c4_i32 : i32
      %301 = arith.index_cast %300 : i32 to index
      %302 = memref.load %arg2[%301] : memref<16xi32, #tpu.memory_space<smem>>
      %c0_i32_109 = arith.constant 0 : i32
      %c127_i32_110 = arith.constant 127 : i32
      %303 = arith.maxsi %c0_i32_109, %302 : i32
      %304 = arith.minsi %c127_i32_110, %303 : i32
      %305 = arith.index_cast %304 : i32 to index
      %c0_111 = arith.constant 0 : index
      %306 = vector.load %arg4[%305, %c0_111] : memref<128x128xf32, #tpu.memory_space<vmem>>, vector<1x128xf32>
      %c4 = arith.constant 4 : index
      %c0_112 = arith.constant 0 : index
      %307 = vector.load %arg22[%c4, %c0_112] : memref<16x128xf32, #tpu.memory_space<vmem>>, vector<1x128xf32>
      tpu.vector_store %arg22[%c4, %c0_112], %306 {strides = array<i32>} : memref<16x128xf32, #tpu.memory_space<vmem>>, vector<1x128xf32>,
      %c5_i32 = arith.constant 5 : i32
      %308 = arith.addi %267, %c5_i32 : i32
      %309 = arith.index_cast %308 : i32 to index
      %310 = memref.load %arg2[%309] : memref<16xi32, #tpu.memory_space<smem>>
      %c0_i32_113 = arith.constant 0 : i32
      %c127_i32_114 = arith.constant 127 : i32
      %311 = arith.maxsi %c0_i32_113, %310 : i32
      %312 = arith.minsi %c127_i32_114, %311 : i32
      %313 = arith.index_cast %312 : i32 to index
      %c0_115 = arith.constant 0 : index
      %314 = vector.load %arg4[%313, %c0_115] : memref<128x128xf32, #tpu.memory_space<vmem>>, vector<1x128xf32>
      %c5 = arith.constant 5 : index
      %c0_116 = arith.constant 0 : index
      %315 = vector.load %arg22[%c5, %c0_116] : memref<16x128xf32, #tpu.memory_space<vmem>>, vector<1x128xf32>
      tpu.vector_store %arg22[%c5, %c0_116], %314 {strides = array<i32>} : memref<16x128xf32, #tpu.memory_space<vmem>>, vector<1x128xf32>,
      %c6_i32 = arith.constant 6 : i32
      %316 = arith.addi %267, %c6_i32 : i32
      %317 = arith.index_cast %316 : i32 to index
      %318 = memref.load %arg2[%317] : memref<16xi32, #tpu.memory_space<smem>>
      %c0_i32_117 = arith.constant 0 : i32
      %c127_i32_118 = arith.constant 127 : i32
      %319 = arith.maxsi %c0_i32_117, %318 : i32
      %320 = arith.minsi %c127_i32_118, %319 : i32
      %321 = arith.index_cast %320 : i32 to index
      %c0_119 = arith.constant 0 : index
      %322 = vector.load %arg4[%321, %c0_119] : memref<128x128xf32, #tpu.memory_space<vmem>>, vector<1x128xf32>
      %c6 = arith.constant 6 : index
      %c0_120 = arith.constant 0 : index
      %323 = vector.load %arg22[%c6, %c0_120] : memref<16x128xf32, #tpu.memory_space<vmem>>, vector<1x128xf32>
      tpu.vector_store %arg22[%c6, %c0_120], %322 {strides = array<i32>} : memref<16x128xf32, #tpu.memory_space<vmem>>, vector<1x128xf32>,
      %c7_i32 = arith.constant 7 : i32
      %324 = arith.addi %267, %c7_i32 : i32
      %325 = arith.index_cast %324 : i32 to index
      %326 = memref.load %arg2[%325] : memref<16xi32, #tpu.memory_space<smem>>
      %c0_i32_121 = arith.constant 0 : i32
      %c127_i32_122 = arith.constant 127 : i32
      %327 = arith.maxsi %c0_i32_121, %326 : i32
      %328 = arith.minsi %c127_i32_122, %327 : i32
      %329 = arith.index_cast %328 : i32 to index
      %c0_123 = arith.constant 0 : index
      %330 = vector.load %arg4[%329, %c0_123] : memref<128x128xf32, #tpu.memory_space<vmem>>, vector<1x128xf32>
      %c7 = arith.constant 7 : index
      %c0_124 = arith.constant 0 : index
      %331 = vector.load %arg22[%c7, %c0_124] : memref<16x128xf32, #tpu.memory_space<vmem>>, vector<1x128xf32>
      tpu.vector_store %arg22[%c7, %c0_124], %330 {strides = array<i32>} : memref<16x128xf32, #tpu.memory_space<vmem>>, vector<1x128xf32>,
      %c8_i32 = arith.constant 8 : i32
      %332 = arith.addi %267, %c8_i32 : i32
      %333 = arith.index_cast %332 : i32 to index
      %334 = memref.load %arg2[%333] : memref<16xi32, #tpu.memory_space<smem>>
      %c0_i32_125 = arith.constant 0 : i32
      %c127_i32_126 = arith.constant 127 : i32
      %335 = arith.maxsi %c0_i32_125, %334 : i32
      %336 = arith.minsi %c127_i32_126, %335 : i32
      %337 = arith.index_cast %336 : i32 to index
      %c0_127 = arith.constant 0 : index
      %338 = vector.load %arg4[%337, %c0_127] : memref<128x128xf32, #tpu.memory_space<vmem>>, vector<1x128xf32>
      %c8 = arith.constant 8 : index
      %c0_128 = arith.constant 0 : index
      %339 = vector.load %arg22[%c8, %c0_128] : memref<16x128xf32, #tpu.memory_space<vmem>>, vector<1x128xf32>
      tpu.vector_store %arg22[%c8, %c0_128], %338 {strides = array<i32>} : memref<16x128xf32, #tpu.memory_space<vmem>>, vector<1x128xf32>,
      %c9_i32 = arith.constant 9 : i32
      %340 = arith.addi %267, %c9_i32 : i32
      %341 = arith.index_cast %340 : i32 to index
      %342 = memref.load %arg2[%341] : memref<16xi32, #tpu.memory_space<smem>>
      %c0_i32_129 = arith.constant 0 : i32
      %c127_i32_130 = arith.constant 127 : i32
      %343 = arith.maxsi %c0_i32_129, %342 : i32
      %344 = arith.minsi %c127_i32_130, %343 : i32
      %345 = arith.index_cast %344 : i32 to index
      %c0_131 = arith.constant 0 : index
      %346 = vector.load %arg4[%345, %c0_131] : memref<128x128xf32, #tpu.memory_space<vmem>>, vector<1x128xf32>
      %c9 = arith.constant 9 : index
      %c0_132 = arith.constant 0 : index
      %347 = vector.load %arg22[%c9, %c0_132] : memref<16x128xf32, #tpu.memory_space<vmem>>, vector<1x128xf32>
      tpu.vector_store %arg22[%c9, %c0_132], %346 {strides = array<i32>} : memref<16x128xf32, #tpu.memory_space<vmem>>, vector<1x128xf32>,
      %c10_i32 = arith.constant 10 : i32
      %348 = arith.addi %267, %c10_i32 : i32
      %349 = arith.index_cast %348 : i32 to index
      %350 = memref.load %arg2[%349] : memref<16xi32, #tpu.memory_space<smem>>
      %c0_i32_133 = arith.constant 0 : i32
      %c127_i32_134 = arith.constant 127 : i32
      %351 = arith.maxsi %c0_i32_133, %350 : i32
      %352 = arith.minsi %c127_i32_134, %351 : i32
      %353 = arith.index_cast %352 : i32 to index
      %c0_135 = arith.constant 0 : index
      %354 = vector.load %arg4[%353, %c0_135] : memref<128x128xf32, #tpu.memory_space<vmem>>, vector<1x128xf32>
      %c10 = arith.constant 10 : index
      %c0_136 = arith.constant 0 : index
      %355 = vector.load %arg22[%c10, %c0_136] : memref<16x128xf32, #tpu.memory_space<vmem>>, vector<1x128xf32>
      tpu.vector_store %arg22[%c10, %c0_136], %354 {strides = array<i32>} : memref<16x128xf32, #tpu.memory_space<vmem>>, vector<1x128xf32>,
      %c11_i32 = arith.constant 11 : i32
      %356 = arith.addi %267, %c11_i32 : i32
      %357 = arith.index_cast %356 : i32 to index
      %358 = memref.load %arg2[%357] : memref<16xi32, #tpu.memory_space<smem>>
      %c0_i32_137 = arith.constant 0 : i32
      %c127_i32_138 = arith.constant 127 : i32
      %359 = arith.maxsi %c0_i32_137, %358 : i32
      %360 = arith.minsi %c127_i32_138, %359 : i32
      %361 = arith.index_cast %360 : i32 to index
      %c0_139 = arith.constant 0 : index
      %362 = vector.load %arg4[%361, %c0_139] : memref<128x128xf32, #tpu.memory_space<vmem>>, vector<1x128xf32>
      %c11 = arith.constant 11 : index
      %c0_140 = arith.constant 0 : index
      %363 = vector.load %arg22[%c11, %c0_140] : memref<16x128xf32, #tpu.memory_space<vmem>>, vector<1x128xf32>
      tpu.vector_store %arg22[%c11, %c0_140], %362 {strides = array<i32>} : memref<16x128xf32, #tpu.memory_space<vmem>>, vector<1x128xf32>,
      %c12_i32 = arith.constant 12 : i32
      %364 = arith.addi %267, %c12_i32 : i32
      %365 = arith.index_cast %364 : i32 to index
      %366 = memref.load %arg2[%365] : memref<16xi32, #tpu.memory_space<smem>>
      %c0_i32_141 = arith.constant 0 : i32
      %c127_i32_142 = arith.constant 127 : i32
      %367 = arith.maxsi %c0_i32_141, %366 : i32
      %368 = arith.minsi %c127_i32_142, %367 : i32
      %369 = arith.index_cast %368 : i32 to index
      %c0_143 = arith.constant 0 : index
      %370 = vector.load %arg4[%369, %c0_143] : memref<128x128xf32, #tpu.memory_space<vmem>>, vector<1x128xf32>
      %c12 = arith.constant 12 : index
      %c0_144 = arith.constant 0 : index
      %371 = vector.load %arg22[%c12, %c0_144] : memref<16x128xf32, #tpu.memory_space<vmem>>, vector<1x128xf32>
      tpu.vector_store %arg22[%c12, %c0_144], %370 {strides = array<i32>} : memref<16x128xf32, #tpu.memory_space<vmem>>, vector<1x128xf32>,
      %c13_i32 = arith.constant 13 : i32
      %372 = arith.addi %267, %c13_i32 : i32
      %373 = arith.index_cast %372 : i32 to index
      %374 = memref.load %arg2[%373] : memref<16xi32, #tpu.memory_space<smem>>
      %c0_i32_145 = arith.constant 0 : i32
      %c127_i32_146 = arith.constant 127 : i32
      %375 = arith.maxsi %c0_i32_145, %374 : i32
      %376 = arith.minsi %c127_i32_146, %375 : i32
      %377 = arith.index_cast %376 : i32 to index
      %c0_147 = arith.constant 0 : index
      %378 = vector.load %arg4[%377, %c0_147] : memref<128x128xf32, #tpu.memory_space<vmem>>, vector<1x128xf32>
      %c13 = arith.constant 13 : index
      %c0_148 = arith.constant 0 : index
      %379 = vector.load %arg22[%c13, %c0_148] : memref<16x128xf32, #tpu.memory_space<vmem>>, vector<1x128xf32>
      tpu.vector_store %arg22[%c13, %c0_148], %378 {strides = array<i32>} : memref<16x128xf32, #tpu.memory_space<vmem>>, vector<1x128xf32>,
      %c14_i32 = arith.constant 14 : i32
      %380 = arith.addi %267, %c14_i32 : i32
      %381 = arith.index_cast %380 : i32 to index
      %382 = memref.load %arg2[%381] : memref<16xi32, #tpu.memory_space<smem>>
      %c0_i32_149 = arith.constant 0 : i32
      %c127_i32_150 = arith.constant 127 : i32
      %383 = arith.maxsi %c0_i32_149, %382 : i32
      %384 = arith.minsi %c127_i32_150, %383 : i32
      %385 = arith.index_cast %384 : i32 to index
      %c0_151 = arith.constant 0 : index
      %386 = vector.load %arg4[%385, %c0_151] : memref<128x128xf32, #tpu.memory_space<vmem>>, vector<1x128xf32>
      %c14 = arith.constant 14 : index
      %c0_152 = arith.constant 0 : index
      %387 = vector.load %arg22[%c14, %c0_152] : memref<16x128xf32, #tpu.memory_space<vmem>>, vector<1x128xf32>
      tpu.vector_store %arg22[%c14, %c0_152], %386 {strides = array<i32>} : memref<16x128xf32, #tpu.memory_space<vmem>>, vector<1x128xf32>,
      %c15_i32 = arith.constant 15 : i32
      %388 = arith.addi %267, %c15_i32 : i32
      %389 = arith.index_cast %388 : i32 to index
      %390 = memref.load %arg2[%389] : memref<16xi32, #tpu.memory_space<smem>>
      %c0_i32_153 = arith.constant 0 : i32
      %c127_i32_154 = arith.constant 127 : i32
      %391 = arith.maxsi %c0_i32_153, %390 : i32
      %392 = arith.minsi %c127_i32_154, %391 : i32
      %393 = arith.index_cast %392 : i32 to index
      %c0_155 = arith.constant 0 : index
      %394 = vector.load %arg4[%393, %c0_155] : memref<128x128xf32, #tpu.memory_space<vmem>>, vector<1x128xf32>
      %c15 = arith.constant 15 : index
      %c0_156 = arith.constant 0 : index
      %395 = vector.load %arg22[%c15, %c0_156] : memref<16x128xf32, #tpu.memory_space<vmem>>, vector<1x128xf32>
      tpu.vector_store %arg22[%c15, %c0_156], %394 {strides = array<i32>} : memref<16x128xf32, #tpu.memory_space<vmem>>, vector<1x128xf32>,
      %c0_157 = arith.constant 0 : index
      %c0_158 = arith.constant 0 : index
      %396 = vector.load %arg22[%c0_157, %c0_158] : memref<16x128xf32, #tpu.memory_space<vmem>>, vector<16x128xf32>
      %c0_159 = arith.constant 0 : index
      %c0_160 = arith.constant 0 : index
      %397 = vector.load %arg5[%c0_159, %c0_160] : memref<16x128xf32, #tpu.memory_space<vmem>>, vector<16x128xf32>
      %398 = arith.addf %396, %397 : vector<16x128xf32>
      %c0_161 = arith.constant 0 : index
      %c0_162 = arith.constant 0 : index
      %399 = vector.load %arg6[%c0_161, %c0_162] : memref<1x128xf32, #tpu.memory_space<vmem>>, vector<1x128xf32>
      %c0_163 = arith.constant 0 : index
      %c0_164 = arith.constant 0 : index
      %400 = vector.load %arg7[%c0_163, %c0_164] : memref<1x128xf32, #tpu.memory_space<vmem>>, vector<1x128xf32>
      %cst_165 = arith.constant dense<0.000000e+00> : vector<16xf32>
      %401 = vector.multi_reduction <add>, %398, %cst_165 [1] : vector<16x128xf32> to vector<16xf32>
      %402 = vector.shape_cast %401 : vector<16xf32> to vector<16x1xf32>
      %cst_166 = arith.constant 1.280000e+02 : f32
      %403 = vector.broadcast %cst_166 : f32 to vector<16x1xf32>
      %404 = arith.divf %402, %403 : vector<16x1xf32>
      %405 = vector.broadcast %404 : vector<16x1xf32> to vector<16x128xf32>
      %406 = arith.subf %398, %405 : vector<16x128xf32>
      %407 = arith.mulf %406, %406 : vector<16x128xf32>
      %cst_167 = arith.constant dense<0.000000e+00> : vector<16xf32>
      %408 = vector.multi_reduction <add>, %407, %cst_167 [1] : vector<16x128xf32> to vector<16xf32>
      %409 = vector.shape_cast %408 : vector<16xf32> to vector<16x1xf32>
      %cst_168 = arith.constant 1.280000e+02 : f32
      %410 = vector.broadcast %cst_168 : f32 to vector<16x1xf32>
      %411 = arith.divf %409, %410 : vector<16x1xf32>
      %412 = vector.broadcast %404 : vector<16x1xf32> to vector<16x128xf32>
      %413 = arith.subf %398, %412 : vector<16x128xf32>
      %cst_169 = arith.constant 9.99999996E-13 : f32
      %414 = vector.broadcast %cst_169 : f32 to vector<16x1xf32>
      %415 = arith.addf %411, %414 : vector<16x1xf32>
      %416 = math.rsqrt %415 : vector<16x1xf32>
      %417 = vector.broadcast %416 : vector<16x1xf32> to vector<16x128xf32>
      %418 = arith.mulf %413, %417 : vector<16x128xf32>
      %419 = vector.broadcast %399 : vector<1x128xf32> to vector<16x128xf32>
      %420 = arith.mulf %418, %419 : vector<16x128xf32>
      %421 = vector.broadcast %400 : vector<1x128xf32> to vector<16x128xf32>
      %422 = arith.addf %420, %421 : vector<16x128xf32>
      %c0_170 = arith.constant 0 : index
      %c0_171 = arith.constant 0 : index
      %423 = vector.load %arg22[%c0_170, %c0_171] : memref<16x128xf32, #tpu.memory_space<vmem>>, vector<16x128xf32>
      tpu.vector_store %arg22[%c0_170, %c0_171], %422 {strides = array<i32>} : memref<16x128xf32, #tpu.memory_space<vmem>>, vector<16x128xf32>,
    } else {
    }
    %c0 = arith.constant 0 : index
    %c0_1 = arith.constant 0 : index
    %3 = vector.load %arg22[%c0, %c0_1] : memref<16x128xf32, #tpu.memory_space<vmem>>, vector<16x128xf32>
    %4 = arith.truncf %3 : vector<16x128xf32> to vector<16x128xbf16>
    %c0_2 = arith.constant 0 : index
    %c0_3 = arith.constant 0 : index
    %c0_4 = arith.constant 0 : index
    %5 = vector.load %arg8[%c0_2, %c0_3, %c0_4] : memref<1x128x384xbf16, #tpu.memory_space<vmem>>, vector<1x128x384xbf16>
    %6 = vector.shape_cast %5 : vector<1x128x384xbf16> to vector<128x384xbf16>
    %cst = arith.constant dense<0.000000e+00> : vector<16x384xf32>
    %7 = tpu.matmul %4, %6, %cst {dimension_numbers = #tpu.dot_dimension_numbers<[1], [0], [0], [1], [0, 0, 1, 1], [], []>} : vector<16x128xbf16>, vector<128x384xbf16>, vector<16x384xf32> -> vector<16x384xf32>
    %c0_5 = arith.constant 0 : index
    %c0_6 = arith.constant 0 : index
    %c0_7 = arith.constant 0 : index
    %8 = vector.load %arg9[%c0_5, %c0_6, %c0_7] : memref<1x1x384xf32, #tpu.memory_space<vmem>>, vector<1x1x384xf32>
    %9 = vector.shape_cast %8 : vector<1x1x384xf32> to vector<1x384xf32>
    %10 = vector.broadcast %9 : vector<1x384xf32> to vector<16x384xf32>
    %11 = arith.addf %7, %10 : vector<16x384xf32>
    %12 = vector.extract_strided_slice %11 {offsets = [0, 0], sizes = [16, 128], strides = [1, 1]} : vector<16x384xf32> to vector<16x128xf32>
    %cst_8 = arith.constant 0.176776692 : f32
    %13 = vector.broadcast %cst_8 : f32 to vector<16x128xf32>
    %14 = arith.mulf %12, %13 : vector<16x128xf32>
    %15 = vector.extract_strided_slice %11 {offsets = [0, 128], sizes = [16, 128], strides = [1, 1]} : vector<16x384xf32> to vector<16x128xf32>
    %16 = vector.extract_strided_slice %11 {offsets = [0, 256], sizes = [16, 128], strides = [1, 1]} : vector<16x384xf32> to vector<16x128xf32>
    %17 = vector.extract_strided_slice %14 {offsets = [0, 0], sizes = [8, 32], strides = [1, 1]} : vector<16x128xf32> to vector<8x32xf32>
    %18 = arith.truncf %17 : vector<8x32xf32> to vector<8x32xbf16>
    %19 = vector.extract_strided_slice %15 {offsets = [0, 0], sizes = [8, 32], strides = [1, 1]} : vector<16x128xf32> to vector<8x32xf32>
    %20 = arith.truncf %19 : vector<8x32xf32> to vector<8x32xbf16>
    %21 = vector.extract_strided_slice %16 {offsets = [0, 0], sizes = [8, 32], strides = [1, 1]} : vector<16x128xf32> to vector<8x32xf32>
    %22 = arith.truncf %21 : vector<8x32xf32> to vector<8x32xbf16>
    "tpu.trace_start"() <{level = 10 : i32, message = "qd,kd->qk"}> : () -> ()
    %cst_9 = arith.constant dense<0.000000e+00> : vector<8x8xf32>
    %23 = tpu.matmul %18, %20, %cst_9 {dimension_numbers = #tpu.dot_dimension_numbers<[1], [1], [0], [0], [0, 0, 1, 0], [], []>} : vector<8x32xbf16>, vector<8x32xbf16>, vector<8x8xf32> -> vector<8x8xf32>
    "tpu.trace_stop"() : () -> ()
    %cst_10 = arith.constant dense<0xFF800000> : vector<8xf32>
    %24 = vector.multi_reduction <maximumf>, %23, %cst_10 [1] : vector<8x8xf32> to vector<8xf32>
    %25 = vector.shape_cast %24 : vector<8xf32> to vector<8x1xf32>
    %26 = vector.broadcast %25 : vector<8x1xf32> to vector<8x8xf32>
    %27 = arith.subf %23, %26 : vector<8x8xf32>
    %28 = math.exp %27 : vector<8x8xf32>
    %cst_11 = arith.constant dense<0.000000e+00> : vector<8xf32>
    %29 = vector.multi_reduction <add>, %28, %cst_11 [1] : vector<8x8xf32> to vector<8xf32>
    %30 = vector.shape_cast %29 : vector<8xf32> to vector<8x1xf32>
    %31 = tpu.reciprocal %30 {approx = true} : vector<8x1xf32> -> vector<8x1xf32>
    %32 = vector.broadcast %31 : vector<8x1xf32> to vector<8x8xf32>
    %33 = arith.mulf %28, %32 : vector<8x8xf32>
    %34 = arith.truncf %33 : vector<8x8xf32> to vector<8x8xbf16>
    %cst_12 = arith.constant dense<0.000000e+00> : vector<8x32xf32>
    %35 = tpu.matmul %34, %22, %cst_12 {dimension_numbers = #tpu.dot_dimension_numbers<[1], [0], [0], [1], [0, 0, 1, 1], [], []>} : vector<8x8xbf16>, vector<8x32xbf16>, vector<8x32xf32> -> vector<8x32xf32>
    %36 = vector.extract_strided_slice %14 {offsets = [0, 32], sizes = [8, 32], strides = [1, 1]} : vector<16x128xf32> to vector<8x32xf32>
    %37 = arith.truncf %36 : vector<8x32xf32> to vector<8x32xbf16>
    %38 = vector.extract_strided_slice %15 {offsets = [0, 32], sizes = [8, 32], strides = [1, 1]} : vector<16x128xf32> to vector<8x32xf32>
    %39 = arith.truncf %38 : vector<8x32xf32> to vector<8x32xbf16>
    %40 = vector.extract_strided_slice %16 {offsets = [0, 32], sizes = [8, 32], strides = [1, 1]} : vector<16x128xf32> to vector<8x32xf32>
    %41 = arith.truncf %40 : vector<8x32xf32> to vector<8x32xbf16>
    "tpu.trace_start"() <{level = 10 : i32, message = "qd,kd->qk"}> : () -> ()
    %cst_13 = arith.constant dense<0.000000e+00> : vector<8x8xf32>
    %42 = tpu.matmul %37, %39, %cst_13 {dimension_numbers = #tpu.dot_dimension_numbers<[1], [1], [0], [0], [0, 0, 1, 0], [], []>} : vector<8x32xbf16>, vector<8x32xbf16>, vector<8x8xf32> -> vector<8x8xf32>
    "tpu.trace_stop"() : () -> ()
    %cst_14 = arith.constant dense<0xFF800000> : vector<8xf32>
    %43 = vector.multi_reduction <maximumf>, %42, %cst_14 [1] : vector<8x8xf32> to vector<8xf32>
    %44 = vector.shape_cast %43 : vector<8xf32> to vector<8x1xf32>
    %45 = vector.broadcast %44 : vector<8x1xf32> to vector<8x8xf32>
    %46 = arith.subf %42, %45 : vector<8x8xf32>
    %47 = math.exp %46 : vector<8x8xf32>
    %cst_15 = arith.constant dense<0.000000e+00> : vector<8xf32>
    %48 = vector.multi_reduction <add>, %47, %cst_15 [1] : vector<8x8xf32> to vector<8xf32>
    %49 = vector.shape_cast %48 : vector<8xf32> to vector<8x1xf32>
    %50 = tpu.reciprocal %49 {approx = true} : vector<8x1xf32> -> vector<8x1xf32>
    %51 = vector.broadcast %50 : vector<8x1xf32> to vector<8x8xf32>
    %52 = arith.mulf %47, %51 : vector<8x8xf32>
    %53 = arith.truncf %52 : vector<8x8xf32> to vector<8x8xbf16>
    %cst_16 = arith.constant dense<0.000000e+00> : vector<8x32xf32>
    %54 = tpu.matmul %53, %41, %cst_16 {dimension_numbers = #tpu.dot_dimension_numbers<[1], [0], [0], [1], [0, 0, 1, 1], [], []>} : vector<8x8xbf16>, vector<8x32xbf16>, vector<8x32xf32> -> vector<8x32xf32>
    %55 = vector.extract_strided_slice %14 {offsets = [0, 64], sizes = [8, 32], strides = [1, 1]} : vector<16x128xf32> to vector<8x32xf32>
    %56 = arith.truncf %55 : vector<8x32xf32> to vector<8x32xbf16>
    %57 = vector.extract_strided_slice %15 {offsets = [0, 64], sizes = [8, 32], strides = [1, 1]} : vector<16x128xf32> to vector<8x32xf32>
    %58 = arith.truncf %57 : vector<8x32xf32> to vector<8x32xbf16>
    %59 = vector.extract_strided_slice %16 {offsets = [0, 64], sizes = [8, 32], strides = [1, 1]} : vector<16x128xf32> to vector<8x32xf32>
    %60 = arith.truncf %59 : vector<8x32xf32> to vector<8x32xbf16>
    "tpu.trace_start"() <{level = 10 : i32, message = "qd,kd->qk"}> : () -> ()
    %cst_17 = arith.constant dense<0.000000e+00> : vector<8x8xf32>
    %61 = tpu.matmul %56, %58, %cst_17 {dimension_numbers = #tpu.dot_dimension_numbers<[1], [1], [0], [0], [0, 0, 1, 0], [], []>} : vector<8x32xbf16>, vector<8x32xbf16>, vector<8x8xf32> -> vector<8x8xf32>
    "tpu.trace_stop"() : () -> ()
    %cst_18 = arith.constant dense<0xFF800000> : vector<8xf32>
    %62 = vector.multi_reduction <maximumf>, %61, %cst_18 [1] : vector<8x8xf32> to vector<8xf32>
    %63 = vector.shape_cast %62 : vector<8xf32> to vector<8x1xf32>
    %64 = vector.broadcast %63 : vector<8x1xf32> to vector<8x8xf32>
    %65 = arith.subf %61, %64 : vector<8x8xf32>
    %66 = math.exp %65 : vector<8x8xf32>
    %cst_19 = arith.constant dense<0.000000e+00> : vector<8xf32>
    %67 = vector.multi_reduction <add>, %66, %cst_19 [1] : vector<8x8xf32> to vector<8xf32>
    %68 = vector.shape_cast %67 : vector<8xf32> to vector<8x1xf32>
    %69 = tpu.reciprocal %68 {approx = true} : vector<8x1xf32> -> vector<8x1xf32>
    %70 = vector.broadcast %69 : vector<8x1xf32> to vector<8x8xf32>
    %71 = arith.mulf %66, %70 : vector<8x8xf32>
    %72 = arith.truncf %71 : vector<8x8xf32> to vector<8x8xbf16>
    %cst_20 = arith.constant dense<0.000000e+00> : vector<8x32xf32>
    %73 = tpu.matmul %72, %60, %cst_20 {dimension_numbers = #tpu.dot_dimension_numbers<[1], [0], [0], [1], [0, 0, 1, 1], [], []>} : vector<8x8xbf16>, vector<8x32xbf16>, vector<8x32xf32> -> vector<8x32xf32>
    %74 = vector.extract_strided_slice %14 {offsets = [0, 96], sizes = [8, 32], strides = [1, 1]} : vector<16x128xf32> to vector<8x32xf32>
    %75 = arith.truncf %74 : vector<8x32xf32> to vector<8x32xbf16>
    %76 = vector.extract_strided_slice %15 {offsets = [0, 96], sizes = [8, 32], strides = [1, 1]} : vector<16x128xf32> to vector<8x32xf32>
    %77 = arith.truncf %76 : vector<8x32xf32> to vector<8x32xbf16>
    %78 = vector.extract_strided_slice %16 {offsets = [0, 96], sizes = [8, 32], strides = [1, 1]} : vector<16x128xf32> to vector<8x32xf32>
    %79 = arith.truncf %78 : vector<8x32xf32> to vector<8x32xbf16>
    "tpu.trace_start"() <{level = 10 : i32, message = "qd,kd->qk"}> : () -> ()
    %cst_21 = arith.constant dense<0.000000e+00> : vector<8x8xf32>
    %80 = tpu.matmul %75, %77, %cst_21 {dimension_numbers = #tpu.dot_dimension_numbers<[1], [1], [0], [0], [0, 0, 1, 0], [], []>} : vector<8x32xbf16>, vector<8x32xbf16>, vector<8x8xf32> -> vector<8x8xf32>
    "tpu.trace_stop"() : () -> ()
    %cst_22 = arith.constant dense<0xFF800000> : vector<8xf32>
    %81 = vector.multi_reduction <maximumf>, %80, %cst_22 [1] : vector<8x8xf32> to vector<8xf32>
    %82 = vector.shape_cast %81 : vector<8xf32> to vector<8x1xf32>
    %83 = vector.broadcast %82 : vector<8x1xf32> to vector<8x8xf32>
    %84 = arith.subf %80, %83 : vector<8x8xf32>
    %85 = math.exp %84 : vector<8x8xf32>
    %cst_23 = arith.constant dense<0.000000e+00> : vector<8xf32>
    %86 = vector.multi_reduction <add>, %85, %cst_23 [1] : vector<8x8xf32> to vector<8xf32>
    %87 = vector.shape_cast %86 : vector<8xf32> to vector<8x1xf32>
    %88 = tpu.reciprocal %87 {approx = true} : vector<8x1xf32> -> vector<8x1xf32>
    %89 = vector.broadcast %88 : vector<8x1xf32> to vector<8x8xf32>
    %90 = arith.mulf %85, %89 : vector<8x8xf32>
    %91 = arith.truncf %90 : vector<8x8xf32> to vector<8x8xbf16>
    %cst_24 = arith.constant dense<0.000000e+00> : vector<8x32xf32>
    %92 = tpu.matmul %91, %79, %cst_24 {dimension_numbers = #tpu.dot_dimension_numbers<[1], [0], [0], [1], [0, 0, 1, 1], [], []>} : vector<8x8xbf16>, vector<8x32xbf16>, vector<8x32xf32> -> vector<8x32xf32>
    %93 = tpu.concatenate %35, %54, %73, %92 in 1 : vector<8x32xf32>, vector<8x32xf32>, vector<8x32xf32>, vector<8x32xf32> -> vector<8x128xf32>
    %94 = vector.extract_strided_slice %14 {offsets = [8, 0], sizes = [8, 32], strides = [1, 1]} : vector<16x128xf32> to vector<8x32xf32>
    %95 = arith.truncf %94 : vector<8x32xf32> to vector<8x32xbf16>
    %96 = vector.extract_strided_slice %15 {offsets = [8, 0], sizes = [8, 32], strides = [1, 1]} : vector<16x128xf32> to vector<8x32xf32>
    %97 = arith.truncf %96 : vector<8x32xf32> to vector<8x32xbf16>
    %98 = vector.extract_strided_slice %16 {offsets = [8, 0], sizes = [8, 32], strides = [1, 1]} : vector<16x128xf32> to vector<8x32xf32>
    %99 = arith.truncf %98 : vector<8x32xf32> to vector<8x32xbf16>
    "tpu.trace_start"() <{level = 10 : i32, message = "qd,kd->qk"}> : () -> ()
    %cst_25 = arith.constant dense<0.000000e+00> : vector<8x8xf32>
    %100 = tpu.matmul %95, %97, %cst_25 {dimension_numbers = #tpu.dot_dimension_numbers<[1], [1], [0], [0], [0, 0, 1, 0], [], []>} : vector<8x32xbf16>, vector<8x32xbf16>, vector<8x8xf32> -> vector<8x8xf32>
    "tpu.trace_stop"() : () -> ()
    %cst_26 = arith.constant dense<0xFF800000> : vector<8xf32>
    %101 = vector.multi_reduction <maximumf>, %100, %cst_26 [1] : vector<8x8xf32> to vector<8xf32>
    %102 = vector.shape_cast %101 : vector<8xf32> to vector<8x1xf32>
    %103 = vector.broadcast %102 : vector<8x1xf32> to vector<8x8xf32>
    %104 = arith.subf %100, %103 : vector<8x8xf32>
    %105 = math.exp %104 : vector<8x8xf32>
    %cst_27 = arith.constant dense<0.000000e+00> : vector<8xf32>
    %106 = vector.multi_reduction <add>, %105, %cst_27 [1] : vector<8x8xf32> to vector<8xf32>
    %107 = vector.shape_cast %106 : vector<8xf32> to vector<8x1xf32>
    %108 = tpu.reciprocal %107 {approx = true} : vector<8x1xf32> -> vector<8x1xf32>
    %109 = vector.broadcast %108 : vector<8x1xf32> to vector<8x8xf32>
    %110 = arith.mulf %105, %109 : vector<8x8xf32>
    %111 = arith.truncf %110 : vector<8x8xf32> to vector<8x8xbf16>
    %cst_28 = arith.constant dense<0.000000e+00> : vector<8x32xf32>
    %112 = tpu.matmul %111, %99, %cst_28 {dimension_numbers = #tpu.dot_dimension_numbers<[1], [0], [0], [1], [0, 0, 1, 1], [], []>} : vector<8x8xbf16>, vector<8x32xbf16>, vector<8x32xf32> -> vector<8x32xf32>
    %113 = vector.extract_strided_slice %14 {offsets = [8, 32], sizes = [8, 32], strides = [1, 1]} : vector<16x128xf32> to vector<8x32xf32>
    %114 = arith.truncf %113 : vector<8x32xf32> to vector<8x32xbf16>
    %115 = vector.extract_strided_slice %15 {offsets = [8, 32], sizes = [8, 32], strides = [1, 1]} : vector<16x128xf32> to vector<8x32xf32>
    %116 = arith.truncf %115 : vector<8x32xf32> to vector<8x32xbf16>
    %117 = vector.extract_strided_slice %16 {offsets = [8, 32], sizes = [8, 32], strides = [1, 1]} : vector<16x128xf32> to vector<8x32xf32>
    %118 = arith.truncf %117 : vector<8x32xf32> to vector<8x32xbf16>
    "tpu.trace_start"() <{level = 10 : i32, message = "qd,kd->qk"}> : () -> ()
    %cst_29 = arith.constant dense<0.000000e+00> : vector<8x8xf32>
    %119 = tpu.matmul %114, %116, %cst_29 {dimension_numbers = #tpu.dot_dimension_numbers<[1], [1], [0], [0], [0, 0, 1, 0], [], []>} : vector<8x32xbf16>, vector<8x32xbf16>, vector<8x8xf32> -> vector<8x8xf32>
    "tpu.trace_stop"() : () -> ()
    %cst_30 = arith.constant dense<0xFF800000> : vector<8xf32>
    %120 = vector.multi_reduction <maximumf>, %119, %cst_30 [1] : vector<8x8xf32> to vector<8xf32>
    %121 = vector.shape_cast %120 : vector<8xf32> to vector<8x1xf32>
    %122 = vector.broadcast %121 : vector<8x1xf32> to vector<8x8xf32>
    %123 = arith.subf %119, %122 : vector<8x8xf32>
    %124 = math.exp %123 : vector<8x8xf32>
    %cst_31 = arith.constant dense<0.000000e+00> : vector<8xf32>
    %125 = vector.multi_reduction <add>, %124, %cst_31 [1] : vector<8x8xf32> to vector<8xf32>
    %126 = vector.shape_cast %125 : vector<8xf32> to vector<8x1xf32>
    %127 = tpu.reciprocal %126 {approx = true} : vector<8x1xf32> -> vector<8x1xf32>
    %128 = vector.broadcast %127 : vector<8x1xf32> to vector<8x8xf32>
    %129 = arith.mulf %124, %128 : vector<8x8xf32>
    %130 = arith.truncf %129 : vector<8x8xf32> to vector<8x8xbf16>
    %cst_32 = arith.constant dense<0.000000e+00> : vector<8x32xf32>
    %131 = tpu.matmul %130, %118, %cst_32 {dimension_numbers = #tpu.dot_dimension_numbers<[1], [0], [0], [1], [0, 0, 1, 1], [], []>} : vector<8x8xbf16>, vector<8x32xbf16>, vector<8x32xf32> -> vector<8x32xf32>
    %132 = vector.extract_strided_slice %14 {offsets = [8, 64], sizes = [8, 32], strides = [1, 1]} : vector<16x128xf32> to vector<8x32xf32>
    %133 = arith.truncf %132 : vector<8x32xf32> to vector<8x32xbf16>
    %134 = vector.extract_strided_slice %15 {offsets = [8, 64], sizes = [8, 32], strides = [1, 1]} : vector<16x128xf32> to vector<8x32xf32>
    %135 = arith.truncf %134 : vector<8x32xf32> to vector<8x32xbf16>
    %136 = vector.extract_strided_slice %16 {offsets = [8, 64], sizes = [8, 32], strides = [1, 1]} : vector<16x128xf32> to vector<8x32xf32>
    %137 = arith.truncf %136 : vector<8x32xf32> to vector<8x32xbf16>
    "tpu.trace_start"() <{level = 10 : i32, message = "qd,kd->qk"}> : () -> ()
    %cst_33 = arith.constant dense<0.000000e+00> : vector<8x8xf32>
    %138 = tpu.matmul %133, %135, %cst_33 {dimension_numbers = #tpu.dot_dimension_numbers<[1], [1], [0], [0], [0, 0, 1, 0], [], []>} : vector<8x32xbf16>, vector<8x32xbf16>, vector<8x8xf32> -> vector<8x8xf32>
    "tpu.trace_stop"() : () -> ()
    %cst_34 = arith.constant dense<0xFF800000> : vector<8xf32>
    %139 = vector.multi_reduction <maximumf>, %138, %cst_34 [1] : vector<8x8xf32> to vector<8xf32>
    %140 = vector.shape_cast %139 : vector<8xf32> to vector<8x1xf32>
    %141 = vector.broadcast %140 : vector<8x1xf32> to vector<8x8xf32>
    %142 = arith.subf %138, %141 : vector<8x8xf32>
    %143 = math.exp %142 : vector<8x8xf32>
    %cst_35 = arith.constant dense<0.000000e+00> : vector<8xf32>
    %144 = vector.multi_reduction <add>, %143, %cst_35 [1] : vector<8x8xf32> to vector<8xf32>
    %145 = vector.shape_cast %144 : vector<8xf32> to vector<8x1xf32>
    %146 = tpu.reciprocal %145 {approx = true} : vector<8x1xf32> -> vector<8x1xf32>
    %147 = vector.broadcast %146 : vector<8x1xf32> to vector<8x8xf32>
    %148 = arith.mulf %143, %147 : vector<8x8xf32>
    %149 = arith.truncf %148 : vector<8x8xf32> to vector<8x8xbf16>
    %cst_36 = arith.constant dense<0.000000e+00> : vector<8x32xf32>
    %150 = tpu.matmul %149, %137, %cst_36 {dimension_numbers = #tpu.dot_dimension_numbers<[1], [0], [0], [1], [0, 0, 1, 1], [], []>} : vector<8x8xbf16>, vector<8x32xbf16>, vector<8x32xf32> -> vector<8x32xf32>
    %151 = vector.extract_strided_slice %14 {offsets = [8, 96], sizes = [8, 32], strides = [1, 1]} : vector<16x128xf32> to vector<8x32xf32>
    %152 = arith.truncf %151 : vector<8x32xf32> to vector<8x32xbf16>
    %153 = vector.extract_strided_slice %15 {offsets = [8, 96], sizes = [8, 32], strides = [1, 1]} : vector<16x128xf32> to vector<8x32xf32>
    %154 = arith.truncf %153 : vector<8x32xf32> to vector<8x32xbf16>
    %155 = vector.extract_strided_slice %16 {offsets = [8, 96], sizes = [8, 32], strides = [1, 1]} : vector<16x128xf32> to vector<8x32xf32>
    %156 = arith.truncf %155 : vector<8x32xf32> to vector<8x32xbf16>
    "tpu.trace_start"() <{level = 10 : i32, message = "qd,kd->qk"}> : () -> ()
    %cst_37 = arith.constant dense<0.000000e+00> : vector<8x8xf32>
    %157 = tpu.matmul %152, %154, %cst_37 {dimension_numbers = #tpu.dot_dimension_numbers<[1], [1], [0], [0], [0, 0, 1, 0], [], []>} : vector<8x32xbf16>, vector<8x32xbf16>, vector<8x8xf32> -> vector<8x8xf32>
    "tpu.trace_stop"() : () -> ()
    %cst_38 = arith.constant dense<0xFF800000> : vector<8xf32>
    %158 = vector.multi_reduction <maximumf>, %157, %cst_38 [1] : vector<8x8xf32> to vector<8xf32>
    %159 = vector.shape_cast %158 : vector<8xf32> to vector<8x1xf32>
    %160 = vector.broadcast %159 : vector<8x1xf32> to vector<8x8xf32>
    %161 = arith.subf %157, %160 : vector<8x8xf32>
    %162 = math.exp %161 : vector<8x8xf32>
    %cst_39 = arith.constant dense<0.000000e+00> : vector<8xf32>
    %163 = vector.multi_reduction <add>, %162, %cst_39 [1] : vector<8x8xf32> to vector<8xf32>
    %164 = vector.shape_cast %163 : vector<8xf32> to vector<8x1xf32>
    %165 = tpu.reciprocal %164 {approx = true} : vector<8x1xf32> -> vector<8x1xf32>
    %166 = vector.broadcast %165 : vector<8x1xf32> to vector<8x8xf32>
    %167 = arith.mulf %162, %166 : vector<8x8xf32>
    %168 = arith.truncf %167 : vector<8x8xf32> to vector<8x8xbf16>
    %cst_40 = arith.constant dense<0.000000e+00> : vector<8x32xf32>
    %169 = tpu.matmul %168, %156, %cst_40 {dimension_numbers = #tpu.dot_dimension_numbers<[1], [0], [0], [1], [0, 0, 1, 1], [], []>} : vector<8x8xbf16>, vector<8x32xbf16>, vector<8x32xf32> -> vector<8x32xf32>
    %170 = tpu.concatenate %112, %131, %150, %169 in 1 : vector<8x32xf32>, vector<8x32xf32>, vector<8x32xf32>, vector<8x32xf32> -> vector<8x128xf32>
    %171 = tpu.concatenate %93, %170 in 0 : vector<8x128xf32>, vector<8x128xf32> -> vector<16x128xf32>
    %172 = arith.truncf %171 : vector<16x128xf32> to vector<16x128xbf16>
    %c0_41 = arith.constant 0 : index
    %c0_42 = arith.constant 0 : index
    %c0_43 = arith.constant 0 : index
    %173 = vector.load %arg10[%c0_41, %c0_42, %c0_43] : memref<1x128x128xbf16, #tpu.memory_space<vmem>>, vector<1x128x128xbf16>
    %174 = vector.shape_cast %173 : vector<1x128x128xbf16> to vector<128x128xbf16>
    %cst_44 = arith.constant dense<0.000000e+00> : vector<16x128xf32>
    %175 = tpu.matmul %172, %174, %cst_44 {dimension_numbers = #tpu.dot_dimension_numbers<[1], [0], [0], [1], [0, 0, 1, 1], [], []>} : vector<16x128xbf16>, vector<128x128xbf16>, vector<16x128xf32> -> vector<16x128xf32>
    %c0_45 = arith.constant 0 : index
    %c0_46 = arith.constant 0 : index
    %c0_47 = arith.constant 0 : index
    %176 = vector.load %arg11[%c0_45, %c0_46, %c0_47] : memref<1x1x128xf32, #tpu.memory_space<vmem>>, vector<1x1x128xf32>
    %177 = vector.shape_cast %176 : vector<1x1x128xf32> to vector<1x128xf32>
    %178 = vector.broadcast %177 : vector<1x128xf32> to vector<16x128xf32>
    %179 = arith.addf %175, %178 : vector<16x128xf32>
    %180 = arith.addf %3, %179 : vector<16x128xf32>
    %c0_48 = arith.constant 0 : index
    %c0_49 = arith.constant 0 : index
    %c0_50 = arith.constant 0 : index
    %181 = vector.load %arg12[%c0_48, %c0_49, %c0_50] : memref<1x1x128xf32, #tpu.memory_space<vmem>>, vector<1x1x128xf32>
    %182 = vector.shape_cast %181 : vector<1x1x128xf32> to vector<1x128xf32>
    %c0_51 = arith.constant 0 : index
    %c0_52 = arith.constant 0 : index
    %c0_53 = arith.constant 0 : index
    %183 = vector.load %arg13[%c0_51, %c0_52, %c0_53] : memref<1x1x128xf32, #tpu.memory_space<vmem>>, vector<1x1x128xf32>
    %184 = vector.shape_cast %183 : vector<1x1x128xf32> to vector<1x128xf32>
    %cst_54 = arith.constant dense<0.000000e+00> : vector<16xf32>
    %185 = vector.multi_reduction <add>, %180, %cst_54 [1] : vector<16x128xf32> to vector<16xf32>
    %186 = vector.shape_cast %185 : vector<16xf32> to vector<16x1xf32>
    %cst_55 = arith.constant 1.280000e+02 : f32
    %187 = vector.broadcast %cst_55 : f32 to vector<16x1xf32>
    %188 = arith.divf %186, %187 : vector<16x1xf32>
    %189 = vector.broadcast %188 : vector<16x1xf32> to vector<16x128xf32>
    %190 = arith.subf %180, %189 : vector<16x128xf32>
    %191 = arith.mulf %190, %190 : vector<16x128xf32>
    %cst_56 = arith.constant dense<0.000000e+00> : vector<16xf32>
    %192 = vector.multi_reduction <add>, %191, %cst_56 [1] : vector<16x128xf32> to vector<16xf32>
    %193 = vector.shape_cast %192 : vector<16xf32> to vector<16x1xf32>
    %cst_57 = arith.constant 1.280000e+02 : f32
    %194 = vector.broadcast %cst_57 : f32 to vector<16x1xf32>
    %195 = arith.divf %193, %194 : vector<16x1xf32>
    %196 = vector.broadcast %188 : vector<16x1xf32> to vector<16x128xf32>
    %197 = arith.subf %180, %196 : vector<16x128xf32>
    %cst_58 = arith.constant 9.99999996E-13 : f32
    %198 = vector.broadcast %cst_58 : f32 to vector<16x1xf32>
    %199 = arith.addf %195, %198 : vector<16x1xf32>
    %200 = math.rsqrt %199 : vector<16x1xf32>
    %201 = vector.broadcast %200 : vector<16x1xf32> to vector<16x128xf32>
    %202 = arith.mulf %197, %201 : vector<16x128xf32>
    %203 = vector.broadcast %182 : vector<1x128xf32> to vector<16x128xf32>
    %204 = arith.mulf %202, %203 : vector<16x128xf32>
    %205 = vector.broadcast %184 : vector<1x128xf32> to vector<16x128xf32>
    %206 = arith.addf %204, %205 : vector<16x128xf32>
    %207 = arith.truncf %206 : vector<16x128xf32> to vector<16x128xbf16>
    %c0_59 = arith.constant 0 : index
    %c0_60 = arith.constant 0 : index
    %c0_61 = arith.constant 0 : index
    %208 = vector.load %arg14[%c0_59, %c0_60, %c0_61] : memref<1x128x256xbf16, #tpu.memory_space<vmem>>, vector<1x128x256xbf16>
    %209 = vector.shape_cast %208 : vector<1x128x256xbf16> to vector<128x256xbf16>
    %cst_62 = arith.constant dense<0.000000e+00> : vector<16x256xf32>
    %210 = tpu.matmul %207, %209, %cst_62 {dimension_numbers = #tpu.dot_dimension_numbers<[1], [0], [0], [1], [0, 0, 1, 1], [], []>} : vector<16x128xbf16>, vector<128x256xbf16>, vector<16x256xf32> -> vector<16x256xf32>
    %c0_63 = arith.constant 0 : index
    %c0_64 = arith.constant 0 : index
    %c0_65 = arith.constant 0 : index
    %211 = vector.load %arg15[%c0_63, %c0_64, %c0_65] : memref<1x1x256xf32, #tpu.memory_space<vmem>>, vector<1x1x256xf32>
    %212 = vector.shape_cast %211 : vector<1x1x256xf32> to vector<1x256xf32>
    %213 = vector.broadcast %212 : vector<1x256xf32> to vector<16x256xf32>
    %214 = arith.addf %210, %213 : vector<16x256xf32>
    %215 = arith.mulf %214, %214 : vector<16x256xf32>
    %216 = arith.mulf %214, %215 : vector<16x256xf32>
    %cst_66 = arith.constant 4.471500e-02 : f32
    %217 = vector.broadcast %cst_66 : f32 to vector<16x256xf32>
    %218 = arith.mulf %217, %216 : vector<16x256xf32>
    %219 = arith.addf %214, %218 : vector<16x256xf32>
    %cst_67 = arith.constant 0.797884583 : f32
    %220 = vector.broadcast %cst_67 : f32 to vector<16x256xf32>
    %221 = arith.mulf %220, %219 : vector<16x256xf32>
    %222 = math.tanh %221 : vector<16x256xf32>
    %cst_68 = arith.constant 1.000000e+00 : f32
    %223 = vector.broadcast %cst_68 : f32 to vector<16x256xf32>
    %224 = arith.addf %223, %222 : vector<16x256xf32>
    %cst_69 = arith.constant 5.000000e-01 : f32
    %225 = vector.broadcast %cst_69 : f32 to vector<16x256xf32>
    %226 = arith.mulf %225, %224 : vector<16x256xf32>
    %227 = arith.mulf %214, %226 : vector<16x256xf32>
    %228 = arith.truncf %227 : vector<16x256xf32> to vector<16x256xbf16>
    %c0_70 = arith.constant 0 : index
    %c0_71 = arith.constant 0 : index
    %c0_72 = arith.constant 0 : index
    %229 = vector.load %arg16[%c0_70, %c0_71, %c0_72] : memref<1x256x128xbf16, #tpu.memory_space<vmem>>, vector<1x256x128xbf16>
    %230 = vector.shape_cast %229 : vector<1x256x128xbf16> to vector<256x128xbf16>
    %cst_73 = arith.constant dense<0.000000e+00> : vector<16x128xf32>
    %231 = tpu.matmul %228, %230, %cst_73 {dimension_numbers = #tpu.dot_dimension_numbers<[1], [0], [0], [1], [0, 0, 1, 1], [], []>} : vector<16x256xbf16>, vector<256x128xbf16>, vector<16x128xf32> -> vector<16x128xf32>
    %c0_74 = arith.constant 0 : index
    %c0_75 = arith.constant 0 : index
    %c0_76 = arith.constant 0 : index
    %232 = vector.load %arg17[%c0_74, %c0_75, %c0_76] : memref<1x1x128xf32, #tpu.memory_space<vmem>>, vector<1x1x128xf32>
    %233 = vector.shape_cast %232 : vector<1x1x128xf32> to vector<1x128xf32>
    %234 = vector.broadcast %233 : vector<1x128xf32> to vector<16x128xf32>
    %235 = arith.addf %231, %234 : vector<16x128xf32>
    %236 = arith.addf %206, %235 : vector<16x128xf32>
    %c0_77 = arith.constant 0 : index
    %c0_78 = arith.constant 0 : index
    %c0_79 = arith.constant 0 : index
    %237 = vector.load %arg18[%c0_77, %c0_78, %c0_79] : memref<1x1x128xf32, #tpu.memory_space<vmem>>, vector<1x1x128xf32>
    %238 = vector.shape_cast %237 : vector<1x1x128xf32> to vector<1x128xf32>
    %c0_80 = arith.constant 0 : index
    %c0_81 = arith.constant 0 : index
    %c0_82 = arith.constant 0 : index
    %239 = vector.load %arg19[%c0_80, %c0_81, %c0_82] : memref<1x1x128xf32, #tpu.memory_space<vmem>>, vector<1x1x128xf32>
    %240 = vector.shape_cast %239 : vector<1x1x128xf32> to vector<1x128xf32>
    %cst_83 = arith.constant dense<0.000000e+00> : vector<16xf32>
    %241 = vector.multi_reduction <add>, %236, %cst_83 [1] : vector<16x128xf32> to vector<16xf32>
    %242 = vector.shape_cast %241 : vector<16xf32> to vector<16x1xf32>
    %cst_84 = arith.constant 1.280000e+02 : f32
    %243 = vector.broadcast %cst_84 : f32 to vector<16x1xf32>
    %244 = arith.divf %242, %243 : vector<16x1xf32>
    %245 = vector.broadcast %244 : vector<16x1xf32> to vector<16x128xf32>
    %246 = arith.subf %236, %245 : vector<16x128xf32>
    %247 = arith.mulf %246, %246 : vector<16x128xf32>
    %cst_85 = arith.constant dense<0.000000e+00> : vector<16xf32>
    %248 = vector.multi_reduction <add>, %247, %cst_85 [1] : vector<16x128xf32> to vector<16xf32>
    %249 = vector.shape_cast %248 : vector<16xf32> to vector<16x1xf32>
    %cst_86 = arith.constant 1.280000e+02 : f32
    %250 = vector.broadcast %cst_86 : f32 to vector<16x1xf32>
    %251 = arith.divf %249, %250 : vector<16x1xf32>
    %252 = vector.broadcast %244 : vector<16x1xf32> to vector<16x128xf32>
    %253 = arith.subf %236, %252 : vector<16x128xf32>
    %cst_87 = arith.constant 9.99999996E-13 : f32
    %254 = vector.broadcast %cst_87 : f32 to vector<16x1xf32>
    %255 = arith.addf %251, %254 : vector<16x1xf32>
    %256 = math.rsqrt %255 : vector<16x1xf32>
    %257 = vector.broadcast %256 : vector<16x1xf32> to vector<16x128xf32>
    %258 = arith.mulf %253, %257 : vector<16x128xf32>
    %259 = vector.broadcast %238 : vector<1x128xf32> to vector<16x128xf32>
    %260 = arith.mulf %258, %259 : vector<16x128xf32>
    %261 = vector.broadcast %240 : vector<1x128xf32> to vector<16x128xf32>
    %262 = arith.addf %260, %261 : vector<16x128xf32>
    %c0_88 = arith.constant 0 : index
    %c0_89 = arith.constant 0 : index
    %263 = vector.load %arg22[%c0_88, %c0_89] : memref<16x128xf32, #tpu.memory_space<vmem>>, vector<16x128xf32>
    tpu.vector_store %arg22[%c0_88, %c0_89], %262 {strides = array<i32>} : memref<16x128xf32, #tpu.memory_space<vmem>>, vector<16x128xf32>,
    %c1_i32 = arith.constant 1 : i32
    %264 = arith.cmpi eq, %arg1, %c1_i32 : i32
    %265 = arith.extui %264 : i1 to i32
    %c0_i32_90 = arith.constant 0 : i32
    %266 = arith.cmpi ne, %265, %c0_i32_90 : i32
    scf.if %266 {
      %c2_i32 = arith.constant 2 : i32
      %267 = arith.muli %arg0, %c2_i32 : i32
      %c0_i32_91 = arith.constant 0 : i32
      %268 = arith.addi %267, %c0_i32_91 : i32
      %269 = arith.index_cast %268 : i32 to index
      %270 = memref.load %arg3[%269] : memref<2xi32, #tpu.memory_space<smem>>
      %c0_i32_92 = arith.constant 0 : i32
      %c3_i32 = arith.constant 3 : i32
      %271 = arith.maxsi %c0_i32_92, %270 : i32
      %272 = arith.minsi %c3_i32, %271 : i32
      %273 = arith.index_cast %272 : i32 to index
      %c0_93 = arith.constant 0 : index
      %274 = vector.load %arg20[%273, %c0_93] : memref<4x128xf32, #tpu.memory_space<vmem>>, vector<1x128xf32>
      %275 = vector.extract_strided_slice %262 {offsets = [0, 0], sizes = [1, 128], strides = [1, 1]} : vector<16x128xf32> to vector<1x128xf32>
      %276 = arith.addf %275, %274 : vector<1x128xf32>
      %c0_94 = arith.constant 0 : index
      %c0_95 = arith.constant 0 : index
      %277 = vector.load %arg21[%c0_94, %c0_95] : memref<2x128xf32, #tpu.memory_space<vmem>>, vector<1x128xf32>
      tpu.vector_store %arg21[%c0_94, %c0_95], %276 {strides = array<i32>} : memref<2x128xf32, #tpu.memory_space<vmem>>, vector<1x128xf32>,
      %c2_i32_96 = arith.constant 2 : i32
      %278 = arith.muli %arg0, %c2_i32_96 : i32
      %c1_i32_97 = arith.constant 1 : i32
      %279 = arith.addi %278, %c1_i32_97 : i32
      %280 = arith.index_cast %279 : i32 to index
      %281 = memref.load %arg3[%280] : memref<2xi32, #tpu.memory_space<smem>>
      %c0_i32_98 = arith.constant 0 : i32
      %c3_i32_99 = arith.constant 3 : i32
      %282 = arith.maxsi %c0_i32_98, %281 : i32
      %283 = arith.minsi %c3_i32_99, %282 : i32
      %284 = arith.index_cast %283 : i32 to index
      %c0_100 = arith.constant 0 : index
      %285 = vector.load %arg20[%284, %c0_100] : memref<4x128xf32, #tpu.memory_space<vmem>>, vector<1x128xf32>
      %286 = vector.extract_strided_slice %262 {offsets = [8, 0], sizes = [1, 128], strides = [1, 1]} : vector<16x128xf32> to vector<1x128xf32>
      %287 = arith.addf %286, %285 : vector<1x128xf32>
      %c1 = arith.constant 1 : index
      %c0_101 = arith.constant 0 : index
      %288 = vector.load %arg21[%c1, %c0_101] : memref<2x128xf32, #tpu.memory_space<vmem>>, vector<1x128xf32>
      tpu.vector_store %arg21[%c1, %c0_101], %287 {strides = array<i32>} : memref<2x128xf32, #tpu.memory_space<vmem>>, vector<1x128xf32>,
    } else {
    }
    return
  }
  func.func @transform_0(%arg0: i32, %arg1: i32, %arg2: memref<16xi32, #tpu.memory_space<smem>>, %arg3: memref<2xi32, #tpu.memory_space<smem>>) -> (i32, i32) {
    %c0_i32 = arith.constant 0 : i32
    %c0_i32_0 = arith.constant 0 : i32
    %c0_i32_1 = arith.constant 0 : i32
    return %c0_i32, %c0_i32_0 : i32, i32
  }
  func.func @transform_1(%arg0: i32, %arg1: i32, %arg2: memref<16xi32, #tpu.memory_space<smem>>, %arg3: memref<2xi32, #tpu.memory_space<smem>>) -> (i32, i32) {
    %c0_i32 = arith.constant 0 : i32
    %c0_i32_0 = arith.constant 0 : i32
    %c0_i32_1 = arith.constant 0 : i32
    return %c0_i32, %c0_i32_0 : i32, i32
  }
  func.func @transform_2(%arg0: i32, %arg1: i32, %arg2: memref<16xi32, #tpu.memory_space<smem>>, %arg3: memref<2xi32, #tpu.memory_space<smem>>) -> (i32, i32) {
    %c0_i32 = arith.constant 0 : i32
    %c0_i32_0 = arith.constant 0 : i32
    %c0_i32_1 = arith.constant 0 : i32
    return %c0_i32, %c0_i32_0 : i32, i32
  }
  func.func @transform_3(%arg0: i32, %arg1: i32, %arg2: memref<16xi32, #tpu.memory_space<smem>>, %arg3: memref<2xi32, #tpu.memory_space<smem>>) -> (i32, i32) {
    %c0_i32 = arith.constant 0 : i32
    %c0_i32_0 = arith.constant 0 : i32
    %c0_i32_1 = arith.constant 0 : i32
    return %c0_i32, %c0_i32_0 : i32, i32
  }
  func.func @transform_4(%arg0: i32, %arg1: i32, %arg2: memref<16xi32, #tpu.memory_space<smem>>, %arg3: memref<2xi32, #tpu.memory_space<smem>>) -> (i32, i32, i32) {
    %c0_i32 = arith.constant 0 : i32
    %c0_i32_0 = arith.constant 0 : i32
    %c0_i32_1 = arith.constant 0 : i32
    return %arg1, %c0_i32, %c0_i32_0 : i32, i32, i32
  }
  func.func @transform_5(%arg0: i32, %arg1: i32, %arg2: memref<16xi32, #tpu.memory_space<smem>>, %arg3: memref<2xi32, #tpu.memory_space<smem>>) -> (i32, i32, i32) {
    %c0_i32 = arith.constant 0 : i32
    %c0_i32_0 = arith.constant 0 : i32
    %c0_i32_1 = arith.constant 0 : i32
    return %arg1, %c0_i32, %c0_i32_0 : i32, i32, i32
  }
  func.func @transform_6(%arg0: i32, %arg1: i32, %arg2: memref<16xi32, #tpu.memory_space<smem>>, %arg3: memref<2xi32, #tpu.memory_space<smem>>) -> (i32, i32, i32) {
    %c0_i32 = arith.constant 0 : i32
    %c0_i32_0 = arith.constant 0 : i32
    %c0_i32_1 = arith.constant 0 : i32
    return %arg1, %c0_i32, %c0_i32_0 : i32, i32, i32
  }
  func.func @transform_7(%arg0: i32, %arg1: i32, %arg2: memref<16xi32, #tpu.memory_space<smem>>, %arg3: memref<2xi32, #tpu.memory_space<smem>>) -> (i32, i32, i32) {
    %c0_i32 = arith.constant 0 : i32
    %c0_i32_0 = arith.constant 0 : i32
    %c0_i32_1 = arith.constant 0 : i32
    return %arg1, %c0_i32, %c0_i32_0 : i32, i32, i32
  }
  func.func @transform_8(%arg0: i32, %arg1: i32, %arg2: memref<16xi32, #tpu.memory_space<smem>>, %arg3: memref<2xi32, #tpu.memory_space<smem>>) -> (i32, i32, i32) {
    %c0_i32 = arith.constant 0 : i32
    %c0_i32_0 = arith.constant 0 : i32
    %c0_i32_1 = arith.constant 0 : i32
    return %arg1, %c0_i32, %c0_i32_0 : i32, i32, i32
  }
  func.func @transform_9(%arg0: i32, %arg1: i32, %arg2: memref<16xi32, #tpu.memory_space<smem>>, %arg3: memref<2xi32, #tpu.memory_space<smem>>) -> (i32, i32, i32) {
    %c0_i32 = arith.constant 0 : i32
    %c0_i32_0 = arith.constant 0 : i32
    %c0_i32_1 = arith.constant 0 : i32
    return %arg1, %c0_i32, %c0_i32_0 : i32, i32, i32
  }
  func.func @transform_10(%arg0: i32, %arg1: i32, %arg2: memref<16xi32, #tpu.memory_space<smem>>, %arg3: memref<2xi32, #tpu.memory_space<smem>>) -> (i32, i32, i32) {
    %c0_i32 = arith.constant 0 : i32
    %c0_i32_0 = arith.constant 0 : i32
    %c0_i32_1 = arith.constant 0 : i32
    return %arg1, %c0_i32, %c0_i32_0 : i32, i32, i32
  }
  func.func @transform_11(%arg0: i32, %arg1: i32, %arg2: memref<16xi32, #tpu.memory_space<smem>>, %arg3: memref<2xi32, #tpu.memory_space<smem>>) -> (i32, i32, i32) {
    %c0_i32 = arith.constant 0 : i32
    %c0_i32_0 = arith.constant 0 : i32
    %c0_i32_1 = arith.constant 0 : i32
    return %arg1, %c0_i32, %c0_i32_0 : i32, i32, i32
  }
  func.func @transform_12(%arg0: i32, %arg1: i32, %arg2: memref<16xi32, #tpu.memory_space<smem>>, %arg3: memref<2xi32, #tpu.memory_space<smem>>) -> (i32, i32, i32) {
    %c0_i32 = arith.constant 0 : i32
    %c0_i32_0 = arith.constant 0 : i32
    %c0_i32_1 = arith.constant 0 : i32
    return %arg1, %c0_i32, %c0_i32_0 : i32, i32, i32
  }
  func.func @transform_13(%arg0: i32, %arg1: i32, %arg2: memref<16xi32, #tpu.memory_space<smem>>, %arg3: memref<2xi32, #tpu.memory_space<smem>>) -> (i32, i32, i32) {
    %c0_i32 = arith.constant 0 : i32
    %c0_i32_0 = arith.constant 0 : i32
    %c0_i32_1 = arith.constant 0 : i32
    return %arg1, %c0_i32, %c0_i32_0 : i32, i32, i32
  }
  func.func @transform_14(%arg0: i32, %arg1: i32, %arg2: memref<16xi32, #tpu.memory_space<smem>>, %arg3: memref<2xi32, #tpu.memory_space<smem>>) -> (i32, i32, i32) {
    %c0_i32 = arith.constant 0 : i32
    %c0_i32_0 = arith.constant 0 : i32
    %c0_i32_1 = arith.constant 0 : i32
    return %arg1, %c0_i32, %c0_i32_0 : i32, i32, i32
  }
  func.func @transform_15(%arg0: i32, %arg1: i32, %arg2: memref<16xi32, #tpu.memory_space<smem>>, %arg3: memref<2xi32, #tpu.memory_space<smem>>) -> (i32, i32, i32) {
    %c0_i32 = arith.constant 0 : i32
    %c0_i32_0 = arith.constant 0 : i32
    %c0_i32_1 = arith.constant 0 : i32
    return %arg1, %c0_i32, %c0_i32_0 : i32, i32, i32
  }
  func.func @transform_16(%arg0: i32, %arg1: i32, %arg2: memref<16xi32, #tpu.memory_space<smem>>, %arg3: memref<2xi32, #tpu.memory_space<smem>>) -> (i32, i32) {
    %c0_i32 = arith.constant 0 : i32
    %c0_i32_0 = arith.constant 0 : i32
    %c0_i32_1 = arith.constant 0 : i32
    return %c0_i32, %c0_i32_0 : i32, i32
  }
  func.func @transform_17(%arg0: i32, %arg1: i32, %arg2: memref<16xi32, #tpu.memory_space<smem>>, %arg3: memref<2xi32, #tpu.memory_space<smem>>) -> (i32, i32) {
    %c0_i32 = arith.constant 0 : i32
    %c0_i32_0 = arith.constant 0 : i32
    return %arg0, %c0_i32 : i32, i32
  }
}

</mosaic_0001>

<bundles_post_ra>
// kernel: tpu_custom_call.1
= control target key start
LH: loop header
LB: loop body
LE: loop exit
PB: predicated region body
PF: predicated region fallthrough
CT: control target
= control target key end

     0   :  { %s5136_s0 = inlined_call_operand.hbm [shape: s32[16], index: 0, kind: input, shape index: {}]   ;;  %s5137_s2 = inlined_call_operand.hbm [shape: f32[128,128], index: 2, kind: input, shape index: {}]   ;;  %s5138_s3 = inlined_call_operand.hbm [shape: f32[16,128], index: 3, kind: input, shape index: {}]   ;;  %s5139_s4 = inlined_call_operand.hbm [shape: f32[1,128], index: 4, kind: input, shape index: {}]   ;;  %s5140_s5 = inlined_call_operand.hbm [shape: f32[1,128], index: 5, kind: input, shape index: {}]   ;;  %s5141_s6 = inlined_call_operand.hbm [shape: bf16[2,128,384], index: 6, kind: input, shape index: {}]   ;;  %s5142_s7 = inlined_call_operand.vmem [shape: f32[2,1,384], index: 7, kind: input, shape index: {}]   ;;  %s5143_s8 = inlined_call_operand.hbm [shape: bf16[2,128,128], index: 8, kind: input, shape index: {}]   ;;  %s5144_s9 = inlined_call_operand.vmem [shape: f32[2,1,128], index: 9, kind: input, shape index: {}]   ;;  %s5145_s10 = inlined_call_operand.vmem [shape: f32[2,1,128], index: 10, kind: input, shape index: {}]   ;;  %s5146_s11 = inlined_call_operand.vmem [shape: f32[2,1,128], index: 11, kind: input, shape index: {}]   ;;  %s5147_s12 = inlined_call_operand.hbm [shape: bf16[2,128,256], index: 12, kind: input, shape index: {}]   ;;  %s5148_s13 = inlined_call_operand.vmem [shape: f32[2,1,256], index: 13, kind: input, shape index: {}]   ;;  %s5149_s14 = inlined_call_operand.hbm [shape: bf16[2,256,128], index: 14, kind: input, shape index: {}]   ;;  %s5150_s15 = inlined_call_operand.vmem [shape: f32[2,1,128], index: 15, kind: input, shape index: {}]   ;;  %s5151_s16 = inlined_call_operand.vmem [shape: f32[2,1,128], index: 16, kind: input, shape index: {}]   ;;  %s5152_s17 = inlined_call_operand.vmem [shape: f32[2,1,128], index: 17, kind: input, shape index: {}]   ;;  %s5153_s18 = inlined_call_operand.vmem [shape: f32[4,128], index: 18, kind: input, shape index: {}]   ;;  %s5154_s19 = inlined_call_operand.hbm [shape: f32[2,128], index: 19, kind: output, shape index: {}]   ;;  %s5155_s1 = inlined_call_operand.hbm [shape: s32[2], index: 1, kind: input, shape index: {}]  }
   0x1   :  { %5184 = sst [smem:[#allocation29_spill]] %s5136_s0 }
   0x2   :  { %5185 = sst [smem:[#allocation30_spill]] %s5137_s2  ;;  %s5202_s20 = sld [smem:[#allocation29_spill]] }
   0x3   :  { %5186 = sst [smem:[#allocation31_spill]] %s5138_s3 }
   0x4   :  { %5187 = sst [smem:[#allocation32_spill]] %s5139_s4 }
   0x5   :  { %5188 = sst [smem:[#allocation33_spill]] %s5140_s5 }
   0x6   :  { %5189 = sst [smem:[#allocation34_spill]] %s5141_s6 }
   0x7   :  { %5190 = sst [smem:[#allocation35_spill]] %s5142_s7 }
   0x8   :  { %5191 = sst [smem:[#allocation36_spill]] %s5143_s8 }
   0x9   :  { %5192 = sst [smem:[#allocation37_spill]] %s5145_s10 }
   0xa   :  { %5193 = sst [smem:[#allocation38_spill]] %s5146_s11 }
   0xb   :  { %5194 = sst [smem:[#allocation39_spill]] %s5147_s12 }
   0xc   :  { %5195 = sst [smem:[#allocation40_spill]] %s5148_s13  ;;  %s3850_s13 = scalar_lea.hbm %s5202_s20, 16 }
   0xd   :  { %5196 = sst [smem:[#allocation41_spill]] %s5149_s14  ;;  %p3851_p0 = scmp.ne.s32.totalorder %s5202_s20, %s3850_s13 }
   0xe   :  { %5197 = sst [smem:[#allocation42_spill]] %s5150_s15  ;;  %p3854_p1 = scmp.lt.u32.totalorder %s3850_s13, %s5202_s20 }
   0xf   :  { %5198 = sst [smem:[#allocation43_spill]] %s5151_s16 }
  0x10   :  { %5199 = sst [smem:[#allocation44_spill]] %s5152_s17  ;;  %p3856_p2 = pnand %p3854_p1, %p3851_p0 }
  0x11   :  { %5200 = sst [smem:[#allocation45_spill]] %s5153_s18 }
  0x12   :  { %5201 = sst [smem:[#allocation46_spill]] %s5154_s19 }
  0x13   :  { %3859 = shalt.err (!%p3856_p2)  }
  0x14   :  { %s4198_s23 = smov [#allocation4]   ;;  %s3860_s27 = scalar_lea.hbm %s5155_s1, 16 }
  0x15   :  { %25 = dma.hbm_to_smem %s5202_s20, 16, %s4198_s23, [#allocation3] }
  0x16   :  { %p3861_p3 = scmp.ne.s32.totalorder %s5155_s1, %s3860_s27  ;;  %p3864_p4 = scmp.lt.u32.totalorder %s3860_s27, %s5155_s1 }
  0x18   :  { %p3866_p5 = pnand %p3864_p4, %p3861_p3 }
  0x1a   :  { %3869 = shalt.err (!%p3866_p5)  }
  0x1b   :  { %s4199_s13 = smov [#allocation5]  }
  0x1c   :  { %27 = dma.hbm_to_smem %s5155_s1, 16, %s4199_s13, [#allocation3] }
  0x1d   :  { %4152 = dma.done.wait [#allocation3], 32 }
  0x1e   :  { %4153 = vsyncadd [#allocation3], 4294967264 }
  0x1f   :  { %29 = sfence }
  0x20   :  { %30 = vsyncpa [#allocation7], 0 }
  0x21   :  { %31 = vsyncpa [#allocation10], 0 }
  0x22   :  { %32 = vsyncpa [#allocation13], 0 }
  0x23   :  { %33 = vsyncpa [#allocation8], 0  ;;  %s4345_s20 = smov 0   ;;  %s4347_s22 = smov 0  }
  0x24   :  { %s4349_s3 = smov 0   ;;  %s4351_s23 = smov 0  }
  0x25   :  { %s4353_s24 = smov 0   ;;  %s4355_s25 = smov 0  }
  0x26 LB: > { %5203 = sst [smem:[#allocation25_spill]] %s4184_s3  ;;  %s4374_s1 = sadd.s32 4294967295, %s4196_s25   ;;  %s4196_s25 = sphi %s4355_s25, %s39_s25   ;;  %s4192_s24 = sphi %s4353_s24, %s5266_s24   ;;  %s4188_s23 = sphi %s4351_s23, %s5265_s23   ;;  %s4184_s3 = sphi %s4349_s3, %s5264_s3   ;;  %s4180_s22 = sphi %s4347_s22, %s5263_s22   ;;  %s4176_s20 = sphi %s4345_s20, %s5262_s20  }
  0x27   : > { %5204 = sst [smem:[#allocation26_spill]] %s4196_s25  ;;  %p155_p6 = scmp.ne.s32.totalorder %s4180_s22, %s4176_s20 }
  0x28   : > { %p5162_p7 = scmp.eq.s32.totalorder %s4374_s1, 0  ;;  %p3095_p8 = scmp.ge.s32.totalorder %s4196_s25, 1 }
  0x29   : > { %p499_p9 = scmp.lt.s32.totalorder %s4196_s25, 3  ;;  %s4200_s27 = smov [#allocation6]  }
  0x2a   : > { %p4382_p10 = por %p5162_p7, %p155_p6  ;;  %s511_s28 = sshll.u32 %s4200_s27, 4  ;;  %s512_s28 = int_to_ptr.vmem [resolvable:$true] %s511_s28 }
  0x2b   : > { %p4386_p11 = pnand %p3095_p8, %p499_p9  ;;  %s48_s0 = sadd.s32 1, %s4192_s24 }
  0x2c   : > { %s5205_s4 = scalar_select %p4382_p10, 1, 0 }
  0x2d   : > { %s5206_s26 = scalar_select %p4386_p11, 1, 0 }
  0x2e   : > { %p3599_p12 = pneg %p4386_p11  ;;  %s5208_s21 = sld [smem:[#allocation30_spill]] }
  0x30   : > { %p4394_p13 = pnand %p3599_p12, %p5162_p7 }
  0x32   : > { %s5207_s29 = scalar_select %p4394_p13, 1, 0 }
  0x33   : > { %p4407_p1 = pneg %p4394_p13 }
  0x34   : > { %s3870_s2 = scalar_lea.hbm %s5208_s21, 2048 }
  0x35   : > { %p3871_p0 = scmp.ne.s32.totalorder %s5208_s21, %s3870_s2  ;;  %p3877_p4 = scmp.lt.u32.totalorder %s3870_s2, %s5208_s21 }
  0x36   : > { %s5209_s27 = scalar_select %p4407_p1, 1, 0 }
  0x37   : > { %p3873_p2 = pnand %p4407_p1, %p3871_p0 }
  0x39   : > { %p3874_p3 = pneg %p3873_p2 }
  0x3b   : > { %p3879_p5 = pnand %p3877_p4, %p3874_p3 }
  0x3d   : > { %3882 = shalt.err (!%p3879_p5)
}
  0x3e   : > { %s3883_s30 = scalar_lea.vmem %s512_s28, 2048  ;;  %p3891_p12 = scmp.lt.s32.totalorder %s512_s28, %s512_s28 }
  0x3f   : > { %p3884_p6 = scmp.ne.s32.totalorder %s512_s28, %s3883_s30  ;;  %p3892_p7 = scmp.lt.s32.totalorder %s3883_s30, %s3883_s30 }
  0x41   : > { %p3886_p8 = pnand %p3884_p6, %p4407_p1  ;;  %p3893_p10 = por %p3892_p7, %p3891_p12 }
  0x43   : > { %p3887_p9 = pneg %p3886_p8 }
  0x45   : > { %p3894_p11 = pnand %p3893_p10, %p3887_p9 }
  0x47   : > { %3897 = shalt.err (!%p3894_p11)
}
  0x48   : > { %s5165_s19 = smov 128   ;;  %s5167_s17 = smov 8  }
  0x49   : > { %3602 = dma.hbm_to_vmem [thread:$0]  (!%p4394_p13), %s5208_s21, 2048, %s512_s28, [#allocation7], %s5165_s19, %s5165_s19, %s5167_s17  }
  0x4a   : > { %p49_p7 = scmp.ge.s32.totalorder %s48_s0, 2  ;;  %s142_s2 = sadd.s32 1, %s4184_s3 }
  0x4b   : > { %p149_p10 = scmp.ne.s32.totalorder %s4184_s3, %s4180_s22  ;;  %p150_p11 = scmp.eq.s32.totalorder %s4196_s25, 0 }
  0x4c   : > { %s5268_s0 = smov (%p49_p7, %s48_s0), 0  ;;  %p3629_p2 = scmp.lt.s32.totalorder %s4196_s25, 2 }
  0x4d   : > { %5210 = sst [smem:[#allocation27_spill]] %s5268_s0  ;;  %p151_p0 = por %p150_p11, %p149_p10 }
  0x4e   : > { %s139_s20 = ssub.s32 %s4192_s24, %s5268_s0  ;;  %s563_s30 = sand.u32 1, %s4196_s25  }
  0x4f   : > { %p140_p3 = scmp.eq.s32.totalorder %s139_s20, 0  ;;  %s4437_s16 = sand.u32 1, %s4184_s3  }
  0x50   : > { %s3568_s15 = smul.u32 3072, %s4192_s24  ;;  %s5212_s6 = sld [smem:[#allocation34_spill]] }
  0x51   : > { %s4441_s7 = scalar_select %p140_p3, %s4184_s3, %s142_s2  }
  0x52   : > { %s3567_s28 = smul.u32 192, %s4437_s16  ;;  %p4449_p4 = pnand %p3629_p2, %p151_p0 }
  0x53   : > { %5211 = sst [smem:[#allocation28_spill]] %s4441_s7  ;;  %s4456_s0 = scalar_lea.sflag [#allocation7], %s563_s30 }
  0x54   : > { %s5213_s17 = scalar_select %p4449_p4, 1, 0 }
  0x55   : > { %s567_s20 = scalar_lea.vmem [#allocation14], %s3567_s28  ;;  %p4462_p6 = pneg %p4449_p4 }
  0x56   : > { %s4447_s19 = scalar_lea.hbm %s5212_s6, %s3568_s15  ;;  %s574_s21 = sshll.u32 %s567_s20, 4  ;;  %s4453_s21 = int_to_ptr.vmem [resolvable:$true] %s574_s21 }
  0x57   : > { %s3898_s7 = scalar_lea.hbm %s4447_s19, 3072  ;;  %s3903_s28 = scalar_lea.hbm %s5212_s6, 6144 }
  0x58   : > { %p3899_p5 = scmp.ne.s32.totalorder %s4447_s19, %s3898_s7  ;;  %p3904_p12 = scmp.lt.u32.totalorder %s4447_s19, %s5212_s6 }
  0x59   : > { %p3905_p7 = scmp.lt.u32.totalorder %s3903_s28, %s3898_s7  ;;  %p3907_p11 = scmp.lt.u32.totalorder %s3898_s7, %s4447_s19 }
  0x5a   : > { %p3901_p8 = pnand %p4462_p6, %p3899_p5 }
  0x5b   : > { %p3906_p10 = por %p3905_p7, %p3904_p12 }
  0x5c   : > { %p3902_p9 = pneg %p3901_p8 }
  0x5d   : > { %p3908_p0 = por %p3907_p11, %p3906_p10 }
  0x5f   : > { %p3909_p2 = pnand %p3908_p0, %p3902_p9 }
  0x61   : > { %3912 = shalt.err (!%p3909_p2)
}
  0x62   : > { %s3913_s30 = scalar_lea.vmem %s4453_s21, 3072  ;;  %s4203_s18 = smov [#allocation14]  }
  0x63   : > { %p3914_p3 = scmp.ne.s32.totalorder %s4453_s21, %s3913_s30  ;;  %s3918_s13 = sshll.u32 %s4203_s18, 4  ;;  %s3919_s13 = int_to_ptr.vmem [resolvable:$false] %s3918_s13 }
  0x64   : > { %s3920_s3 = scalar_lea.vmem %s3919_s13, 6144  ;;  %p3921_p13 = scmp.lt.s32.totalorder %s4453_s21, %s3919_s13 }
  0x65   : > { %p3916_p5 = pnand %p3914_p3, %p4462_p6  ;;  %p3922_p1 = scmp.lt.s32.totalorder %s3920_s3, %s3913_s30 }
  0x67   : > { %p3917_p8 = pneg %p3916_p5  ;;  %p3923_p12 = por %p3922_p1, %p3921_p13 }
  0x69   : > { %p3924_p7 = pnand %p3923_p12, %p3917_p8 }
  0x6b   : > { %3927 = shalt.err (!%p3924_p7)
}
  0x6c   : > { %s4204_s7 = smov 192   ;;  %s4205_s28 = smov 12  }
  0x6d   : > { %3615 = dma.hbm_to_vmem [thread:$0]  (!%p4449_p4), %s4447_s19, 3072, %s4453_s21, %s4456_s0, %s4204_s7, %s4204_s7, %s4205_s28  }
  0x6e   : > { %s3320_s20 = sshll.u32 %s4192_s24, 10  ;;  %s5215_s8 = sld [smem:[#allocation36_spill]] }
  0x6f   : > { %s5216_s30 = sshll.u32 %s4437_s16, 6 }
  0x70   : > { %s595_s3 = scalar_lea.vmem [#allocation15], %s5216_s30 }
  0x71   : > { %s602_s6 = sshll.u32 %s595_s3, 4  ;;  %s4494_s6 = int_to_ptr.vmem [resolvable:$true] %s602_s6 }
  0x74   : > { %s4490_s13 = scalar_lea.hbm %s5215_s8, %s3320_s20  ;;  %s3933_s2 = scalar_lea.hbm %s5215_s8, 2048 }
  0x75   : > { %s3928_s25 = scalar_lea.hbm %s4490_s13, 1024  ;;  %p3934_p10 = scmp.lt.u32.totalorder %s4490_s13, %s5215_s8 }
  0x76   : > { %p3929_p13 = scmp.ne.s32.totalorder %s4490_s13, %s3928_s25  ;;  %p3935_p11 = scmp.lt.u32.totalorder %s3933_s2, %s3928_s25 }
  0x77   : > { %p3937_p2 = scmp.lt.u32.totalorder %s3928_s25, %s4490_s13 }
  0x78   : > { %p3931_p1 = pnand %p3929_p13, %p4462_p6  ;;  %p3936_p0 = por %p3935_p11, %p3934_p10 }
  0x7a   : > { %p3932_p9 = pneg %p3931_p1  ;;  %p3938_p3 = por %p3937_p2, %p3936_p0 }
  0x7c   : > { %p3939_p5 = pnand %p3938_p3, %p3932_p9 }
  0x7e   : > { %3942 = shalt.err (!%p3939_p5)
}
  0x7f   : > { %s3943_s20 = scalar_lea.vmem %s4494_s6, 1024  ;;  %s4206_s18 = smov [#allocation15]  }
  0x80   : > { %p3944_p8 = scmp.ne.s32.totalorder %s4494_s6, %s3943_s20  ;;  %s3948_s30 = sshll.u32 %s4206_s18, 4  ;;  %s3949_s30 = int_to_ptr.vmem [resolvable:$false] %s3948_s30 }
  0x81   : > { %s3950_s3 = scalar_lea.vmem %s3949_s30, 2048  ;;  %p3951_p13 = scmp.lt.s32.totalorder %s4494_s6, %s3949_s30 }
  0x82   : > { %p3946_p12 = pnand %p3944_p8, %p4462_p6  ;;  %p3952_p1 = scmp.lt.s32.totalorder %s3950_s3, %s3943_s20 }
  0x84   : > { %p3947_p7 = pneg %p3946_p12  ;;  %p3953_p10 = por %p3952_p1, %p3951_p13 }
  0x86   : > { %p3954_p11 = pnand %p3953_p10, %p3947_p7 }
  0x88   : > { %3957 = shalt.err (!%p3954_p11)
}
  0x89   : > { %s5179_s25 = smov 64   ;;  %s5180_s21 = smov 4  }
  0x8a   : > { %3618 = dma.hbm_to_vmem [thread:$0]  (!%p4449_p4), %s4490_s13, 1024, %s4494_s6, %s4456_s0, %s5179_s25, %s5179_s25, %s5180_s21  }
  0x8b   : > { %s4209_s19 = smov [#allocation9]   ;;  %s5181_s7 = sshll.u32 %s4437_s16, 7 }
  0x8c   : > { %s524_s2 = sshll.u32 %s4209_s19, 4  ;;  %s5217_s18 = sld [smem:[#allocation31_spill]]  ;;  %s525_s2 = int_to_ptr.vmem [resolvable:$true] %s524_s2 }
  0x8d   : > { %p5218_p0 = scmp.ne.s32.totalorder %s5209_s27, 0 }
  0x92   : > { %s3958_s30 = scalar_lea.hbm %s5217_s18, 256 }
  0x93   : > { %p3959_p9 = scmp.ne.s32.totalorder %s5217_s18, %s3958_s30  ;;  %p3965_p5 = scmp.lt.u32.totalorder %s3958_s30, %s5217_s18 }
  0x95   : > { %p3961_p2 = pnand %p3959_p9, %p5218_p0 }
  0x97   : > { %p3962_p3 = pneg %p3961_p2 }
  0x99   : > { %p3967_p8 = pnand %p3965_p5, %p3962_p3 }
  0x9b   : > { %3970 = shalt.err (!%p3967_p8)
}
  0x9c   : > { %s3971_s6 = scalar_lea.vmem %s525_s2, 256  ;;  %p3979_p1 = scmp.lt.s32.totalorder %s525_s2, %s525_s2 }
  0x9d   : > { %p3972_p12 = scmp.ne.s32.totalorder %s525_s2, %s3971_s6  ;;  %p3980_p10 = scmp.lt.s32.totalorder %s3971_s6, %s3971_s6 }
  0x9f   : > { %p3974_p7 = pnand %p3972_p12, %p5218_p0  ;;  %p3981_p11 = por %p3980_p10, %p3979_p1 }
  0xa1   : > { %p3975_p13 = pneg %p3974_p7 }
  0xa3   : > { %p3982_p4 = pnand %p3981_p11, %p3975_p13 }
  0xa5   : > { %3985 = shalt.err (!%p3982_p4)
}
  0xa6   : > { %p5219_p9 = scmp.ne.s32.totalorder %s5207_s29, 0  ;;  %s5220_s8 = smov 8  }
  0xa7   : > { %s5221_s13 = smov 128   ;;  %s5182_s19 = sshll.u32 %s4192_s24, 11 }
  0xa8   : > { %3605 = dma.hbm_to_vmem [thread:$0]  (!%p5219_p9), %s5217_s18, 256, %s525_s2, [#allocation10], %s5221_s13, %s5221_s13, %s5220_s8  }
  0xa9   : > { %s634_s28 = scalar_lea.vmem [#allocation16], %s5181_s7  ;;  %s5222_s12 = sld [smem:[#allocation39_spill]] }
  0xaa   : > { %s641_s20 = sshll.u32 %s634_s28, 4  ;;  %s4553_s20 = int_to_ptr.vmem [resolvable:$true] %s641_s20 }
  0xaf   : > { %s4551_s6 = scalar_lea.hbm %s5222_s12, %s5182_s19  ;;  %s3991_s28 = scalar_lea.hbm %s5222_s12, 4096 }
  0xb0   : > { %s3986_s10 = scalar_lea.hbm %s4551_s6, 2048  ;;  %p3992_p5 = scmp.lt.u32.totalorder %s4551_s6, %s5222_s12 }
  0xb1   : > { %p3987_p4 = scmp.ne.s32.totalorder %s4551_s6, %s3986_s10  ;;  %p3993_p8 = scmp.lt.u32.totalorder %s3991_s28, %s3986_s10 }
  0xb2   : > { %p3995_p7 = scmp.lt.u32.totalorder %s3986_s10, %s4551_s6 }
  0xb3   : > { %p3989_p2 = pnand %p3987_p4, %p4462_p6  ;;  %p3994_p12 = por %p3993_p8, %p3992_p5 }
  0xb5   : > { %p3990_p3 = pneg %p3989_p2  ;;  %p3996_p13 = por %p3995_p7, %p3994_p12 }
  0xb7   : > { %p3997_p1 = pnand %p3996_p13, %p3990_p3 }
  0xb9   : > { %4000 = shalt.err (!%p3997_p1)
}
  0xba   : > { %s4001_s30 = scalar_lea.vmem %s4553_s20, 2048  ;;  %s4210_s3 = smov [#allocation16]  }
  0xbb   : > { %p4002_p10 = scmp.ne.s32.totalorder %s4553_s20, %s4001_s30  ;;  %s4006_s2 = sshll.u32 %s4210_s3, 4  ;;  %s4007_s2 = int_to_ptr.vmem [resolvable:$false] %s4006_s2 }
  0xbc   : > { %s4008_s25 = scalar_lea.vmem %s4007_s2, 4096  ;;  %p4009_p2 = scmp.lt.s32.totalorder %s4553_s20, %s4007_s2 }
  0xbd   : > { %p4004_p11 = pnand %p4002_p10, %p4462_p6  ;;  %p4010_p9 = scmp.lt.s32.totalorder %s4008_s25, %s4001_s30 }
  0xbf   : > { %p4005_p4 = pneg %p4004_p11  ;;  %p4011_p5 = por %p4010_p9, %p4009_p2 }
  0xc1   : > { %p4012_p8 = pnand %p4011_p5, %p4005_p4 }
  0xc3   : > { %4015 = shalt.err (!%p4012_p8)
}
  0xc4   : > { %p5223_p3 = scmp.ne.s32.totalorder %s5213_s17, 0  ;;  %s4211_s21 = smov [#allocation11]  }
  0xc5   : > { %s538_s10 = sshll.u32 %s4211_s21, 4  ;;  %s4212_s11 = smov [#allocation12]   ;;  %s539_s10 = int_to_ptr.vmem [resolvable:$true] %s538_s10 }
  0xc6   : > { %3621 = dma.hbm_to_vmem [thread:$0]  (!%p5223_p3), %s4551_s6, 2048, %s4553_s20, %s4456_s0, %s5221_s13, %s5221_s13, %s5220_s8  }
  0xc7   : > { %s549_s28 = sshll.u32 %s4212_s11, 4  ;;  %s5224_s2 = sld [smem:[#allocation32_spill]]  ;;  %s4580_s28 = int_to_ptr.vmem [resolvable:$true] %s549_s28 }
  0xcd   : > { %s4016_s25 = scalar_lea.hbm %s5224_s2, 16 }
  0xce   : > { %p4017_p9 = scmp.ne.s32.totalorder %s5224_s2, %s4016_s25  ;;  %p4023_p13 = scmp.lt.u32.totalorder %s4016_s25, %s5224_s2 }
  0xd0   : > { %p4019_p12 = pnand %p4017_p9, %p5218_p0 }
  0xd2   : > { %p4020_p7 = pneg %p4019_p12 }
  0xd4   : > { %p4025_p1 = pnand %p4023_p13, %p4020_p7 }
  0xd6   : > { %4028 = shalt.err (!%p4025_p1)
}
  0xd7   : > { %s4029_s13 = scalar_lea.vmem %s539_s10, 16  ;;  %s4036_s20 = scalar_lea.vmem %s539_s10, 32 }
  0xd8   : > { %p4030_p10 = scmp.ne.s32.totalorder %s539_s10, %s4029_s13  ;;  %p4037_p2 = scmp.lt.s32.totalorder %s539_s10, %s539_s10 }
  0xd9   : > { %p4038_p5 = scmp.lt.s32.totalorder %s4036_s20, %s4029_s13 }
  0xda   : > { %p4032_p11 = pnand %p4030_p10, %p5218_p0 }
  0xdb   : > { %p4039_p8 = por %p4038_p5, %p4037_p2 }
  0xdc   : > { %p4033_p4 = pneg %p4032_p11 }
  0xde   : > { %p4040_p3 = pnand %p4039_p8, %p4033_p4 }
  0xe0   : > { %4043 = shalt.err (!%p4040_p3)
}
  0xe1   : > { %p5225_p9 = scmp.ne.s32.totalorder %s5207_s29, 0  ;;  %s5226_s5 = sld [smem:[#allocation33_spill]] }
  0xe3   : > { %3608 = dma.hbm_to_vmem [thread:$0]  (!%p5225_p9), %s5224_s2, 16, %s539_s10, [#allocation10]  }
  0xe7   : > { %s4044_s21 = scalar_lea.hbm %s5226_s5, 16 }
  0xe8   : > { %p4045_p12 = scmp.ne.s32.totalorder %s5226_s5, %s4044_s21  ;;  %p4051_p3 = scmp.lt.u32.totalorder %s4044_s21, %s5226_s5 }
  0xea   : > { %p4047_p7 = pnand %p4045_p12, %p5218_p0 }
  0xec   : > { %p4048_p13 = pneg %p4047_p7 }
  0xee   : > { %p4053_p1 = pnand %p4051_p3, %p4048_p13 }
  0xf0   : > { %4056 = shalt.err (!%p4053_p1)
}
  0xf1   : > { %s4057_s10 = scalar_lea.vmem %s4580_s28, 16  ;;  %s4064_s8 = scalar_lea.vmem %s4580_s28, 32 }
  0xf2   : > { %p4058_p10 = scmp.ne.s32.totalorder %s4580_s28, %s4057_s10  ;;  %p4065_p2 = scmp.lt.s32.totalorder %s4580_s28, %s4580_s28 }
  0xf3   : > { %p4066_p5 = scmp.lt.s32.totalorder %s4064_s8, %s4057_s10 }
  0xf4   : > { %p4060_p11 = pnand %p4058_p10, %p5218_p0 }
  0xf5   : > { %p4067_p8 = por %p4066_p5, %p4065_p2 }
  0xf6   : > { %p4061_p4 = pneg %p4060_p11 }
  0xf8   : > { %p4068_p12 = pnand %p4067_p8, %p4061_p4 }
  0xfa   : > { %4071 = shalt.err (!%p4068_p12)
}
  0xfb   : > { %3611 = dma.hbm_to_vmem [thread:$0]  (!%p5225_p9), %s5226_s5, 16, %s4580_s28, [#allocation13]  }
  0xfc   : > { %s5227_s27 = sshll.u32 %s4192_s24, 11  ;;  %s5228_s14 = sld [smem:[#allocation41_spill]] }
  0xfd   : > { %s5229_s6 = sshll.u32 %s4437_s16, 7 }
  0xfe   : > { %s662_s29 = scalar_lea.vmem [#allocation17], %s5229_s6 }
  0xff   : > { %s669_s21 = sshll.u32 %s662_s29, 4  ;;  %s4633_s21 = int_to_ptr.vmem [resolvable:$true] %s669_s21 }
 0x102   : > { %s4629_s12 = scalar_lea.hbm %s5228_s14, %s5227_s27  ;;  %s4077_s3 = scalar_lea.hbm %s5228_s14, 4096 }
 0x103   : > { %s4072_s11 = scalar_lea.hbm %s4629_s12, 2048  ;;  %p4078_p13 = scmp.lt.u32.totalorder %s4629_s12, %s5228_s14 }
 0x104   : > { %p4073_p0 = scmp.ne.s32.totalorder %s4629_s12, %s4072_s11  ;;  %p4079_p3 = scmp.lt.u32.totalorder %s4077_s3, %s4072_s11 }
 0x105   : > { %p4081_p10 = scmp.lt.u32.totalorder %s4072_s11, %s4629_s12 }
 0x106   : > { %p4075_p7 = pnand %p4073_p0, %p4462_p6  ;;  %p4080_p1 = por %p4079_p3, %p4078_p13 }
 0x108   : > { %p4076_p9 = pneg %p4075_p7  ;;  %p4082_p11 = por %p4081_p10, %p4080_p1 }
 0x10a   : > { %p4083_p4 = pnand %p4082_p11, %p4076_p9 }
 0x10c   : > { %4086 = shalt.err (!%p4083_p4)
}
 0x10d   : > { %s4087_s16 = scalar_lea.vmem %s4633_s21, 2048  ;;  %s4213_s8 = smov [#allocation17]  }
 0x10e   : > { %p4088_p2 = scmp.ne.s32.totalorder %s4633_s21, %s4087_s16  ;;  %s4092_s13 = sshll.u32 %s4213_s8, 4  ;;  %s4093_s13 = int_to_ptr.vmem [resolvable:$false] %s4092_s13 }
 0x10f   : > { %s4094_s20 = scalar_lea.vmem %s4093_s13, 4096  ;;  %p4095_p12 = scmp.lt.s32.totalorder %s4633_s21, %s4093_s13 }
 0x110   : > { %p4090_p5 = pnand %p4088_p2, %p4462_p6  ;;  %p4096_p0 = scmp.lt.s32.totalorder %s4094_s20, %s4087_s16 }
 0x112   : > { %p4091_p8 = pneg %p4090_p5  ;;  %p4097_p7 = por %p4096_p0, %p4095_p12 }
 0x114   : > { %p4098_p13 = pnand %p4097_p7, %p4091_p8 }
 0x116   : > { %4101 = shalt.err (!%p4098_p13)
}
 0x117   : > { %p5230_p9 = scmp.ne.s32.totalorder %s5213_s17, 0  ;;  %s5231_s27 = smov 4  }
 0x118   : > { %s5232_s7 = smov 64   ;;  %p5233_p6 = scmp.ne.s32.totalorder %s5206_s26, 0 }
 0x119   : > { %3624 = dma.hbm_to_vmem [thread:$0]  (!%p5230_p9), %s4629_s12, 2048, %s4633_s21, %s4456_s0, %s5232_s7, %s5232_s7, %s5231_s27  }
 0x11a   : > { %699 = sbr.rel (%p5233_p6) target bundleno = 3771 (0xebb), region = 88  ;;  %p5234_p3 = scmp.eq.s32.totalorder (!%p5233_p6), %s4374_s1, 0 }
 0x121   : > { %4155 = dma.done.wait (%p5234_p3), [#allocation7], 2048   ;;  %p5235_p1 = pmov %p5234_p3 }
 0x123   : > { %4157 = vsyncadd (%p5235_p1), [#allocation7], 4294965248  ;;  %p5236_p10 = pmov %p5235_p1 }
 0x124   : > { %p5237_p11 = pmov %p5235_p1 }
 0x125   : > { %4159 = dma.done.wait (%p5236_p10), [#allocation10], 272  }
 0x126   : > { %4161 = vsyncadd (%p5237_p11), [#allocation10], 4294967024  ;;  %p5238_p4 = pmov %p5235_p1 }
 0x127   : > { %p5239_p2 = pmov %p5235_p1 }
 0x128   : > { %4163 = dma.done.wait (%p5238_p4), [#allocation13], 16  }
 0x129   : > { %4165 = vsyncadd (%p5239_p2), [#allocation13], 4294967280  ;;  %s717_s26 = sand.u32 1, %s4374_s1   ;;  %s719_s0 = sand.u32 1, %s4180_s22  }
 0x12a   : > { %s3569_s17 = smul.u32 192, %s719_s0  ;;  %s718_s15 = scalar_lea.sflag [#allocation7], %s717_s26 }
 0x12b   : > { %p5240_p5 = scmp.ne.s32.totalorder %s5205_s4, 0 }
 0x12c   : > { %s4676_s19 = scalar_lea.vmem [#allocation14], %s3569_s17 }
 0x12d   : > { %4167 = dma.done.wait (%p5240_p5), %s718_s15, 8192  }
 0x12e   : > { %4169 = vsyncadd (%p5240_p5), %s718_s15, 4294959104  ;;  %s3116_s12 = sshll.u32 %s719_s0, 6  ;;  %s3117_s6 = sshll.u32 %s719_s0, 7 }
 0x12f   : > { %p835_p8 = scmp.lt.s32.totalorder %s4188_s23, 1  ;;  %s5243_s26 = sld [smem:[#allocation35_spill]] }
 0x130   : > { %s5244_s5 = sld [smem:[#allocation40_spill]]  ;;  %s5245_s4 = sld [smem:[#allocation42_spill]] }
 0x131   : > { %s4684_s29 = scalar_select %p835_p8, %s4188_s23, 1 }
 0x132   : > { %s5246_s10 = sld [smem:[#allocation43_spill]]  ;;  %s5247_s20 = sld [smem:[#allocation44_spill]] }
 0x133   : > { %s3570_s21 = smul.u32 3, %s4684_s29  ;;  %s3119_s17 = sshll.u32 %s4684_s29, 1 }
 0x134   : > { %s4724_s7 = scalar_lea.vmem [#allocation16], %s3117_s6  ;;  %p3120_p12 = scmp.ne.s32.totalorder %s4188_s23, 0 }
 0x135   : > { %s4702_s0 = scalar_lea.vmem %s5243_s26, %s3570_s21  ;;  %s4722_s21 = scalar_lea.vmem [#allocation15], %s3116_s12  ;;  %v1012_v9 = vld [vmem:[#allocation9] sm:$0xff] (!%p3120_p12)  ;;  %v1013_v19 = vld [vmem:[#allocation9 + $0x8] sm:$0xff] (!%p3120_p12)  ;;  %v3216_v34 = vld [vmem:[#allocation11] ss:$0 sm:$0xff] (!%p3120_p12) }
 0x136   : > { %s4708_s14 = scalar_lea.vmem %s5244_s5, %s3119_s17  ;;  %s854_s30 = scalar_lea.vmem %s5245_s4, %s4684_s29  ;;  %v3217_v36 = vld [vmem:[#allocation12] ss:$0 sm:$0xff] (!%p3120_p12) }
 0x137   : > { %s4726_s26 = scalar_lea.vmem [#allocation17], %s3117_s6  ;;  %865 = sbr.rel (%p3120_p12) target bundleno = 691 (0x2b3), region = 124 }
 0x138   : > { %s857_s16 = scalar_lea.vmem %s5246_s10, %s4684_s29  ;;  %s860_s27 = scalar_lea.vmem %s5247_s20, %s4684_s29 }
 0x139   : > { %s867_s5 = sld [smem:[#allocation4]] (!%p3120_p12)  ;;  %s3126_s2 = sld [smem:[#allocation4 + $0x1]] (!%p3120_p12) }
 0x13a   : > { %s4729_s4 = sld [smem:[#allocation4 + $0x2]] (!%p3120_p12)  ;;  %s4731_s17 = sld [smem:[#allocation4 + $0x3]] (!%p3120_p12) }
 0x13b   : > { %s4733_s10 = sld [smem:[#allocation4 + $0x4]] (!%p3120_p12)  ;;  %s4735_s15 = sld [smem:[#allocation4 + $0x5]] (!%p3120_p12) }
 0x13c   : > { %s4737_s12 = sld [smem:[#allocation4 + $0x6]] (!%p3120_p12)  ;;  %s4739_s20 = sld [smem:[#allocation4 + $0x7]] (!%p3120_p12) }
 0x13d   : > { %s4741_s6 = sld [smem:[#allocation4 + $0x8]] (!%p3120_p12)  ;;  %s4743_s11 = sld [smem:[#allocation4 + $0x9]] (!%p3120_p12) }
 0x13e   : > { %s4745_s28 = sld [smem:[#allocation4 + $0xa]]  ;;  %s4747_s3 = sld [smem:[#allocation4 + $0xb]] }
 0x13f   : > { %p868_p0 = scmp.gt.s32.totalorder %s867_s5, 0  ;;  %p3121_p7 = scmp.lt.s32.totalorder %s867_s5, 127 }
 0x140   : > { %p877_p13 = scmp.gt.s32.totalorder %s3126_s2, 0  ;;  %p3127_p9 = scmp.lt.s32.totalorder %s3126_s2, 127 }
 0x141   : > { %s5270_s5 = smov (!%p868_p0, %s867_s5), 0  ;;  %p886_p6 = scmp.gt.s32.totalorder %s4729_s4, 0 }
 0x142   : > { %s5272_s2 = smov (!%p877_p13, %s3126_s2), 0  ;;  %s5274_s5 = smov (!%p3121_p7, %s5270_s5), 127 }
 0x143   : > { %s5276_s2 = smov (!%p3127_p9, %s5272_s2), 127  ;;  %s872_s25 = scalar_lea.vmem [#allocation6], %s5274_s5 }
 0x144   : > { %v873_v0 = vld [vmem:[%s872_s25] sm:$0x1]  ;;  %p3133_p3 = scmp.lt.s32.totalorder %s4729_s4, 127  ;;  %s881_s8 = scalar_lea.vmem [#allocation6], %s5276_s2 }
 0x145   : > { %874 = vst [vmem:[#allocation2] sm:$0x1] %v873_v0  ;;  %v882_v1 = vld [vmem:[%s881_s8] sm:$0x1]  ;;  %s5278_s4 = smov (!%p886_p6, %s4729_s4), 0  ;;  %p895_p1 = scmp.gt.s32.totalorder %s4731_s17, 0 }
 0x146   : > { %883 = vst [vmem:[#allocation2 + $0x1] sm:$0x1] %v882_v1  ;;  %p3139_p10 = scmp.lt.s32.totalorder %s4731_s17, 127  ;;  %s5280_s4 = smov (!%p3133_p3, %s5278_s4), 127 }
 0x147   : > { %s5282_s17 = smov (!%p895_p1, %s4731_s17), 0  ;;  %p904_p11 = scmp.gt.s32.totalorder %s4733_s10, 0 }
 0x148   : > { %s890_s13 = scalar_lea.vmem [#allocation6], %s5280_s4  ;;  %s5284_s17 = smov (!%p3139_p10, %s5282_s17), 127 }
 0x149   : > { %v891_v2 = vld [vmem:[%s890_s13] sm:$0x1]  ;;  %s905_s5 = scalar_select %p904_p11, %s4733_s10, 0 }
 0x14a   : > { %892 = vst [vmem:[#allocation2 + $0x2] sm:$0x1] %v891_v2  ;;  %p3145_p4 = scmp.lt.s32.totalorder %s4733_s10, 127  ;;  %s899_s2 = scalar_lea.vmem [#allocation6], %s5284_s17 }
 0x14b   : > { %v900_v3 = vld [vmem:[%s899_s2] sm:$0x1]  ;;  %p913_p2 = scmp.gt.s32.totalorder %s4735_s15, 0  ;;  %p3151_p5 = scmp.lt.s32.totalorder %s4735_s15, 127 }
 0x14c   : > { %901 = vst [vmem:[#allocation2 + $0x3] sm:$0x1] %v900_v3  ;;  %s5286_s5 = smov (!%p3145_p4, %s905_s5), 127  ;;  %p922_p8 = scmp.gt.s32.totalorder %s4737_s12, 0 }
 0x14d   : > { %s5288_s15 = smov (!%p913_p2, %s4735_s15), 0  ;;  %s908_s4 = scalar_lea.vmem [#allocation6], %s5286_s5 }
 0x14e   : > { %v909_v4 = vld [vmem:[%s908_s4] sm:$0x1]  ;;  %s5290_s15 = smov (!%p3151_p5, %s5288_s15), 127  ;;  %p3157_p12 = scmp.lt.s32.totalorder %s4737_s12, 127 }
 0x14f   : > { %910 = vst [vmem:[#allocation2 + $0x4] sm:$0x1] %v909_v4  ;;  %s923_s25 = scalar_select %p922_p8, %s4737_s12, 0 }
 0x150   : > { %s917_s17 = scalar_lea.vmem [#allocation6], %s5290_s15  ;;  %p931_p0 = scmp.gt.s32.totalorder %s4739_s20, 0 }
 0x151   : > { %v918_v5 = vld [vmem:[%s917_s17] sm:$0x1]  ;;  %p3163_p7 = scmp.lt.s32.totalorder %s4739_s20, 127  ;;  %s5292_s25 = smov (!%p3157_p12, %s923_s25), 127 }
 0x152   : > { %919 = vst [vmem:[#allocation2 + $0x5] sm:$0x1] %v918_v5  ;;  %s5294_s20 = smov (!%p931_p0, %s4739_s20), 0  ;;  %p940_p13 = scmp.gt.s32.totalorder %s4741_s6, 0 }
 0x153   : > { %s926_s10 = scalar_lea.vmem [#allocation6], %s5292_s25  ;;  %s5296_s20 = smov (!%p3163_p7, %s5294_s20), 127 }
 0x154   : > { %v927_v6 = vld [vmem:[%s926_s10] sm:$0x1]  ;;  %s941_s8 = scalar_select %p940_p13, %s4741_s6, 0 }
 0x155   : > { %928 = vst [vmem:[#allocation2 + $0x6] sm:$0x1] %v927_v6  ;;  %p3169_p9 = scmp.lt.s32.totalorder %s4741_s6, 127  ;;  %s935_s15 = scalar_lea.vmem [#allocation6], %s5296_s20 }
 0x156   : > { %v936_v7 = vld [vmem:[%s935_s15] sm:$0x1]  ;;  %p949_p6 = scmp.gt.s32.totalorder %s4743_s11, 0  ;;  %p3175_p3 = scmp.lt.s32.totalorder %s4743_s11, 127 }
 0x157   : > { %937 = vst [vmem:[#allocation2 + $0x7] sm:$0x1] %v936_v7  ;;  %s5298_s8 = smov (!%p3169_p9, %s941_s8), 127  ;;  %p958_p1 = scmp.gt.s32.totalorder %s4745_s28, 0 }
 0x158   : > { %s5300_s11 = smov (!%p949_p6, %s4743_s11), 0  ;;  %s944_s12 = scalar_lea.vmem [#allocation6], %s5298_s8 }
 0x159   : > { %v945_v8 = vld [vmem:[%s944_s12] sm:$0x1]  ;;  %s5302_s11 = smov (!%p3175_p3, %s5300_s11), 127  ;;  %p3181_p10 = scmp.lt.s32.totalorder %s4745_s28, 127 }
 0x15a   : > { %946 = vst [vmem:[#allocation2 + $0x8] sm:$0x1] %v945_v8  ;;  %s959_s13 = scalar_select %p958_p1, %s4745_s28, 0 }
 0x15b   : > { %s953_s5 = scalar_lea.vmem [#allocation6], %s5302_s11  ;;  %p967_p11 = scmp.gt.s32.totalorder %s4747_s3, 0 }
 0x15c   : > { %v954_v10 = vld [vmem:[%s953_s5] sm:$0x1]  ;;  %p3187_p4 = scmp.lt.s32.totalorder %s4747_s3, 127  ;;  %s5304_s13 = smov (!%p3181_p10, %s959_s13), 127 }
 0x15d   : > { %955 = vst [vmem:[#allocation2 + $0x9] sm:$0x1] %v954_v10  ;;  %s5306_s3 = smov (!%p967_p11, %s4747_s3), 0  ;;  %s3192_s20 = sld [smem:[#allocation4 + $0xc]] }
 0x15e   : > { %v1010_v11 = vld [vmem:[#allocation2] sm:$0xff]  ;;  %s962_s6 = scalar_lea.vmem [#allocation6], %s5304_s13  ;;  %s5308_s3 = smov (!%p3187_p4, %s5306_s3), 127 }
 0x15f   : > { %v1014_v12 = vadd.f32 %v1012_v9, %v1010_v11  ;;  %v963_v13 = vld [vmem:[%s962_s6] sm:$0x1]  ;;  %s3198_s2 = sld [smem:[#allocation4 + $0xd]]  ;;  %s971_s4 = scalar_lea.vmem [#allocation6], %s5308_s3 }
 0x160   : > { %964 = vst [vmem:[#allocation2 + $0xa] sm:$0x1] %v963_v13  ;;  %v972_v14 = vld [vmem:[%s971_s4] sm:$0x1]  ;;  %s3204_s25 = sld [smem:[#allocation4 + $0xe]]  ;;  %s3210_s11 = sld [smem:[#allocation4 + $0xf]] }
 0x161   : > { %1018 = vadd.xlane.f32.xlu0 %v1014_v12  ;;  %973 = vst [vmem:[#allocation2 + $0xb] sm:$0x1] %v972_v14 }
 0x163   : > { %p976_p2 = scmp.gt.s32.totalorder %s3192_s20, 0  ;;  %p3193_p5 = scmp.lt.s32.totalorder %s3192_s20, 127 }
 0x165   : > { %s5310_s20 = smov (!%p976_p2, %s3192_s20), 0  ;;  %p985_p8 = scmp.gt.s32.totalorder %s3198_s2, 0 }
 0x166   : > { %p3199_p12 = scmp.lt.s32.totalorder %s3198_s2, 127  ;;  %s5312_s20 = smov (!%p3193_p5, %s5310_s20), 127 }
 0x167   : > { %s5314_s2 = smov (!%p985_p8, %s3198_s2), 0  ;;  %p994_p0 = scmp.gt.s32.totalorder %s3204_s25, 0 }
 0x168   : > { %s980_s28 = scalar_lea.vmem [#allocation6], %s5312_s20  ;;  %s5316_s2 = smov (!%p3199_p12, %s5314_s2), 127 }
 0x169   : > { %v981_v15 = vld [vmem:[%s980_s28] sm:$0x1]  ;;  %s995_s17 = scalar_select %p994_p0, %s3204_s25, 0 }
 0x16a   : > { %982 = vst [vmem:[#allocation2 + $0xc] sm:$0x1] %v981_v15  ;;  %p3205_p7 = scmp.lt.s32.totalorder %s3204_s25, 127  ;;  %s989_s10 = scalar_lea.vmem [#allocation6], %s5316_s2 }
 0x16b   : > { %v990_v16 = vld [vmem:[%s989_s10] sm:$0x1]  ;;  %p1003_p13 = scmp.gt.s32.totalorder %s3210_s11, 0  ;;  %p3211_p9 = scmp.lt.s32.totalorder %s3210_s11, 127 }
 0x16c   : > { %991 = vst [vmem:[#allocation2 + $0xd] sm:$0x1] %v990_v16  ;;  %s5318_s17 = smov (!%p3205_p7, %s995_s17), 127 }
 0x16d   : > { %s5320_s11 = smov (!%p1003_p13, %s3210_s11), 0  ;;  %s998_s3 = scalar_lea.vmem [#allocation6], %s5318_s17 }
 0x16e   : > { %v999_v17 = vld [vmem:[%s998_s3] sm:$0x1]  ;;  %s5322_s11 = smov (!%p3211_p9, %s5320_s11), 127 }
 0x16f   : > { %1000 = vst [vmem:[#allocation2 + $0xe] sm:$0x1] %v999_v17  ;;  %s1007_s8 = scalar_lea.vmem [#allocation6], %s5322_s11 }
 0x170   : > { %v1008_v18 = vld [vmem:[%s1007_s8] sm:$0x1] }
 0x171   : > { %1009 = vst [vmem:[#allocation2 + $0xf] sm:$0x1] %v1008_v18 }
 0x178   : > { %v1011_v20 = vld [vmem:[#allocation2 + $0x8] sm:$0xff] }
 0x179   : > { %v1015_v21 = vadd.f32 %v1013_v19, %v1011_v20 }
 0x17b   : > { %1020 = vadd.xlane.f32.xlu0 %v1015_v21 }
 0x1ee   : > { %v1019_v22 = vpop.xlane.xlu0 %1018 }
 0x1ef   : > { %v1023_v23 = vmul.f32 0.0078125, %v1019_v22 }
 0x1f1   : > { %v1025_v24 = vsub.f32 %v1014_v12, %v1023_v23 }
 0x1f3   : > { %v1027_v25 = vmul.f32 %v1025_v24, %v1025_v24 }
 0x1f5   : > { %1029 = vadd.xlane.f32.xlu1 %v1027_v25 }
 0x208   : > { %v1021_v26 = vpop.xlane.xlu0 %1020 }
 0x209   : > { %v1024_v27 = vmul.f32 0.0078125, %v1021_v26 }
 0x20b   : > { %v1026_v28 = vsub.f32 %v1015_v21, %v1024_v27 }
 0x20d   : > { %v1028_v29 = vmul.f32 %v1026_v28, %v1026_v28 }
 0x20f   : > { %1031 = vadd.xlane.f32.xlu1 %v1028_v29 }
 0x282   : > { %v1030_v30 = vpop.xlane.xlu1 %1029 }
 0x283   : > { %v1033_v31 = vmul.f32 0.0078125, %v1030_v30 }
 0x285   : > { %v1035_v32 = vadd.f32 1e-12, %v1033_v31 }
 0x287   : > { %3703 = vrsqrt.f32 %v1035_v32 }
 0x291   : > { %v3704_v33 = vpop.eup %3703 }
 0x292   : > { %v1039_v35 = vmul.f32 %v3704_v33, %v1025_v24 }
 0x294   : > { %v1047_v37 = vmul.f32 %v3216_v34, %v1039_v35 }
 0x296   : > { %v1055_v38 = vadd.f32 %v3217_v36, %v1047_v37 }
 0x298   : > { %1057 = vst [vmem:[#allocation2] sm:$0xff] %v1055_v38 }
 0x29c   : > { %v1032_v39 = vpop.xlane.xlu1 %1031 }
 0x29d   : > { %v1034_v40 = vmul.f32 0.0078125, %v1032_v39 }
 0x29f   : > { %v1036_v41 = vadd.f32 1e-12, %v1034_v40 }
 0x2a1   : > { %3705 = vrsqrt.f32 %v1036_v41 }
 0x2ab   : > { %v3706_v42 = vpop.eup %3705 }
 0x2ac   : > { %v1040_v43 = vmul.f32 %v3706_v42, %v1026_v28 }
 0x2ae   : > { %v1048_v44 = vmul.f32 %v3216_v34, %v1040_v43 }
 0x2b0   : > { %v1056_v45 = vadd.f32 %v3217_v36, %v1048_v44 }
 0x2b2   : > { %1058 = vst [vmem:[#allocation2 + $0x8] sm:$0xff] %v1056_v45 }
 0x2b3 PF: > { %v3722_v46 = vld [vmem:[%s4676_s19 + $0x4] ss:$12 sps:$4 sm:$0xff]   ;;  %v3724_v47 = vld [vmem:[%s4676_s19] ss:$12 sps:$4 sm:$0xff]   ;;  %v4214_v48 = vmov 0   ;;  %v4215_v49 = vmov 0.0   ;;  %v1096_v11 = vlaneseq  ;;  %s5248_s13 = scalar_lea.vmem %s5144_s9, %s4684_s29 }
 0x2b4   : > { %1271 = vmatprep.mubr.bf16.mxu0 %v4214_v48  ;;  %3431 = vmatprep.subr.bf16.mxu1 %v4215_v49  ;;  %v3725_v50 = vld [vmem:[%s4676_s19 + $0x1c] ss:$12 sps:$4 sm:$0xff]   ;;  %v3727_v51 = vld [vmem:[%s4676_s19 + $0x18] ss:$12 sps:$4 sm:$0xff]   ;;  %v3728_v52 = vld [vmem:[%s4676_s19 + $0x34] ss:$12 sps:$4 sm:$0xff]  }
 0x2b5   : > { %1239 = vmatprep.subr.bf16.mxu0 %v3722_v46  ;;  %v3730_v53 = vld [vmem:[%s4676_s19 + $0x30] ss:$12 sps:$4 sm:$0xff]   ;;  %v3731_v54 = vld [vmem:[%s4676_s19 + $0x4c] ss:$12 sps:$4 sm:$0xff]   ;;  %v3733_v55 = vld [vmem:[%s4676_s19 + $0x48] ss:$12 sps:$4 sm:$0xff]  }
 0x2b6   : > { %1240 = vmatpush1.bf16.msra.mxu0 %v3724_v47  ;;  %v3734_v56 = vld [vmem:[%s4676_s19 + $0x64] ss:$12 sps:$4 sm:$0xff]   ;;  %v3746_v57 = vld [vmem:[%s4676_s19 + $0x8] ss:$12 sps:$4 sm:$0xff]   ;;  %v3747_v58 = vld [vmem:[%s4676_s19 + $0x20] ss:$12 sps:$4 sm:$0xff]  }
 0x2b7   : > { %1241 = vmatprep.subr.bf16.mxu0 %v3725_v50  ;;  %3432 = vmatpush3.bf16.msra.mxu1 %v3746_v57  ;;  %v3736_v59 = vld [vmem:[%s4676_s19 + $0x60] ss:$12 sps:$4 sm:$0xff]   ;;  %v3737_v60 = vld [vmem:[%s4676_s19 + $0x7c] ss:$12 sps:$4 sm:$0xff]   ;;  %v3748_v61 = vld [vmem:[%s4676_s19 + $0x38] ss:$12 sps:$4 sm:$0xff]  }
 0x2b8   : > { %3433 = vmatprep.subr.bf16.mxu1 %v4215_v49  ;;  %v3739_v62 = vld [vmem:[%s4676_s19 + $0x78] ss:$12 sps:$4 sm:$0xff]   ;;  %v3740_v63 = vld [vmem:[%s4676_s19 + $0x94] ss:$12 sps:$4 sm:$0xff]   ;;  %v3749_v0 = vld [vmem:[%s4676_s19 + $0x50] ss:$12 sps:$4 sm:$0xff]  }
 0x2b9   : > { %v3742_v1 = vld [vmem:[%s4676_s19 + $0x90] ss:$12 sps:$4 sm:$0xff]   ;;  %v3743_v2 = vld [vmem:[%s4676_s19 + $0xac] ss:$12 sps:$4 sm:$0xff]   ;;  %v3750_v3 = vld [vmem:[%s4676_s19 + $0x68] ss:$12 sps:$4 sm:$0xff]  }
 0x2ba   : > { %1242 = vmatpush1.bf16.msra.mxu0 %v3727_v51  ;;  %v3745_v4 = vld [vmem:[%s4676_s19 + $0xa8] ss:$12 sps:$4 sm:$0xff]   ;;  %v4805_v5 = vld [vmem:[#allocation2] sm:$0xff]  ;;  %v3752_v9 = vld [vmem:[%s4676_s19 + $0x98] ss:$12 sps:$4 sm:$0xff]   ;;  %vm4216_vm0 = vmmov 0  }
 0x2bb   : > { %1243 = vmatprep.subr.bf16.mxu0 %v3728_v52  ;;  %3434 = vmatpush3.bf16.msra.mxu1 %v3747_v58  ;;  %v4807_v6 = vld [vmem:[#allocation2 + $0x8] sm:$0xff]  ;;  %v3751_v7 = vld [vmem:[%s4676_s19 + $0x80] ss:$12 sps:$4 sm:$0xff]   ;;  %v3753_v10 = vld [vmem:[%s4676_s19 + $0xb0] ss:$12 sps:$4 sm:$0xff]   ;;  %v4826_v12 = vshrl.u32 %v1096_v11, 7 }
 0x2bc   : > { %3435 = vmatprep.subr.bf16.mxu1 %v4215_v49  ;;  %v1061_v8 = vpack.c.bf16 %v4807_v6, %v4805_v5  ;;  %3447 = vmatprep.mubr.msk.bf16.mxu1 %vm4216_vm0, %v4215_v49  ;;  %v1094_v14 = vld [vmem:[%s4702_s0] sm:$0x7]  ;;  %vm1328_vm1 = vcmask 261120   ;;  %s4217_s19 = smov 96   ;;  %s4218_s0 = smov 64   ;;  %vm1391_vm2 = vcmask 1043456  }
 0x2bd   : > { %v1098_v13 = vsub.s32 0, %v4826_v12  ;;  %v1102_v15 = vsub.s32 1, %v4826_v12  ;;  %s4219_s15 = smov 32   ;;  %v1106_v33 = vsub.s32 2, %v4826_v12  ;;  %vm1375_vm3 = vcmask 64512   ;;  %s5249_s6 = sld [smem:[#allocation37_spill]] }
 0x2be   : > { %1244 = vmatpush1.bf16.msra.mxu0 %v3730_v53  ;;  %vm1781_vm4 = vcmask 523264   ;;  %vm1783_vm5 = vcmask 785408   ;;  %s5251_s25 = sld [smem:[#allocation38_spill]]  ;;  %p3304_p6 = scmp.ne.s32.totalorder %s4188_s23, 1 }
 0x2bf   : > { %1245 = vmatprep.subr.bf16.mxu0 %v3731_v54  ;;  %3436 = vmatpush3.bf16.msra.mxu1 %v3748_v61  ;;  %v1099_v16 = vrot.slane %v1094_v14, %v1098_v13  ;;  %v1103_v17 = vrot.slane %v1094_v14, %v1102_v15  ;;  %v1107_v34 = vrot.slane %v1094_v14, %v1106_v33 }
 0x2c0   : > { %3437 = vmatprep.subr.bf16.mxu1 %v4215_v49 }
 0x2c2   : > { %1246 = vmatpush1.bf16.msra.mxu0 %v3733_v55 }
 0x2c3   : > { %1247 = vmatprep.subr.bf16.mxu0 %v3734_v56  ;;  %3438 = vmatpush3.bf16.msra.mxu1 %v3749_v0 }
 0x2c4   : > { %3439 = vmatprep.subr.bf16.mxu1 %v4215_v49  ;;  %s5252_s11 = scalar_lea.vmem %s5251_s25, %s4684_s29 }
 0x2c6   : > { %1248 = vmatpush1.bf16.msra.mxu0 %v3736_v59 }
 0x2c7   : > { %1249 = vmatprep.subr.bf16.mxu0 %v3737_v60  ;;  %3440 = vmatpush3.bf16.msra.mxu1 %v3750_v3 }
 0x2c8   : > { %3441 = vmatprep.subr.bf16.mxu1 %v4215_v49 }
 0x2ca   : > { %1250 = vmatpush1.bf16.msra.mxu0 %v3739_v62 }
 0x2cb   : > { %1251 = vmatprep.subr.bf16.mxu0 %v3740_v63  ;;  %3442 = vmatpush3.bf16.msra.mxu1 %v3751_v7 }
 0x2cc   : > { %3443 = vmatprep.subr.bf16.mxu1 %v4215_v49 }
 0x2ce   : > { %1252 = vmatpush1.bf16.msra.mxu0 %v3742_v1 }
 0x2cf   : > { %1253 = vmatprep.subr.bf16.mxu0 %v3743_v2  ;;  %3444 = vmatpush3.bf16.msra.mxu1 %v3752_v9 }
 0x2d0   : > { %3445 = vmatprep.subr.bf16.mxu1 %v4215_v49 }
 0x2d2   : > { %1254 = vmatpush1.bf16.msra.mxu0 %v3745_v4 }
 0x2d3   : > { %3475 = vmatprep.subr.bf16.mxu0 %v4215_v49  ;;  %3446 = vmatpush3.bf16.msra.mxu1 %v3753_v10 }
 0x2d4   : > { %3451 = vmatprep.subr.bf16.mxu1 %v4215_v49 }
 0x2d5   : > { %1272 = vmatmul.mubr.bf16.vlgmr.msra.gmra.mrb[0].mxu0 %v1061_v8 }
 0x2d6   : > { %3477 = vmatprep.mubr.msk.bf16.mxu0 %vm4216_vm0, %v4215_v49  ;;  %3448 = vmatmul.mubr.bf16.vlgmr.msra.gmra.mrb[0].mxu1 %v1061_v8 }
 0x2d7   : > { %3453 = vmatprep.mubr.msk.bf16.mxu1 %vm4216_vm0, %v4215_v49 }
 0x3a8   : > { %v1273_v18 = vpop.f32.mrb[0].mxu0 }
 0x3a9   : > { %v1274_v19 = vadd.f32 %v1273_v18, %v1099_v16  ;;  %v1275_v20 = vpop.f32.mrb[1].mxu0  ;;  %v1316_v35 = vpop.f32.mrb[0].mxu1 }
 0x3aa   : > { %v1276_v21 = vadd.f32 %v1275_v20, %v1103_v17  ;;  %v1277_v22 = vpop.f32.mrb[2].mxu0  ;;  %v1317_v36 = vadd.f32 %v1316_v35, %v1107_v34  ;;  %v3449_v37 = vpop.f32.mrb[1].mxu1 }
 0x3ab   : > { %v1279_v23 = vpop.f32.mrb[3].mxu0  ;;  %v1323_v24 = vmul.f32 0.17677669, %v1274_v19  ;;  %v1278_v28 = vadd.f32 %v1277_v22, %v1099_v16  ;;  %v1319_v38 = vpop.f32.mrb[2].mxu1 }
 0x3ac   : > { %v1326_v25 = vpack.c.bf16 %v1276_v21, %v1276_v21  ;;  %v1280_v29 = vadd.f32 %v1279_v23, %v1103_v17  ;;  %v4853_v39 = vpack.c.bf16 %v1317_v36, %v1317_v36  ;;  %v4855_v40 = vadd.f32 %v1319_v38, %v1107_v34  ;;  %v3450_v41 = vpop.f32.mrb[3].mxu1 }
 0x3ad   : > { %v1325_v27 = vpack.c.bf16 %v1323_v24, %v1323_v24  ;;  %v1324_v30 = vmul.f32 0.17677669, %v1278_v28 }
 0x3ae   : > { %1439 = vrot.lane.b32.xlu1 %v1326_v25, %s4217_s19  ;;  %v1333_v26 = vsel %vm1328_vm1, %v1326_v25, 0  ;;  %v1786_v31 = vpack.c.bf16 %v1280_v29, %v1280_v29  ;;  %v1393_v42 = vsel %vm1391_vm2, %v4853_v39, 0 }
 0x3af   : > { %3452 = vmatpush3.bf16.xpose.msra.mxu1 %v1333_v26  ;;  %v4846_v32 = vpack.c.bf16 %v1324_v30, %v1324_v30 }
 0x3b0   : > { %3457 = vmatprep.subr.bf16.mxu1 %v4215_v49  ;;  %v1792_v4 = vsel %vm1328_vm1, %v1786_v31, 0 }
 0x3b2   : > { %1436 = vrot.lane.b32.xlu1 %v1325_v27, %s4217_s19 }
 0x3b6   : > { %1548 = vrot.lane.b32.xlu1 %v1325_v27, %s4218_s0  ;;  %3454 = vmatmul.mubr.msk.bf16.vlgmr.msra.gmra.mrb[4].mxu1 %vm1328_vm1, %v1325_v27 }
 0x3b7   : > { %3459 = vmatprep.mubr.msk.bf16.mxu1 %vm4216_vm0, %v4215_v49  ;;  %3458 = vmatpush3.bf16.msra.mxu1 %v1393_v42 }
 0x3b8   : > { %3463 = vmatprep.subr.bf16.mxu1 %v4215_v49 }
 0x3ba   : > { %1660 = vrot.lane.b32.xlu1 %v1326_v25, %s4219_s15 }
 0x3be   : > { %1658 = vrot.lane.b32.xlu1 %v1325_v27, %s4219_s15 }
 0x3c2   : > { %1896 = vrot.lane.b32.xlu1 %v1786_v31, %s4217_s19 }
 0x3c6   : > { %1893 = vrot.lane.b32.xlu1 %v4846_v32, %s4217_s19 }
 0x3ca   : > { %2007 = vrot.lane.b32.xlu1 %v1786_v31, %s4218_s0 }
 0x3ce   : > { %2117 = vrot.lane.b32.xlu1 %v1786_v31, %s4219_s15 }
 0x420   : > { %v1440_v55 = vpop.permute.xlu1 %1439 }
 0x421   : > { %v1445_v2 = vsel %vm1328_vm1, %v1440_v55, 0 }
 0x424   : > { %v1437_v56 = vpop.permute.xlu1 %1436 }
 0x428   : > { %v1549_v58 = vpop.permute.xlu1 %1548 }
 0x42c   : > { %v1661_v61 = vpop.permute.xlu1 %1660 }
 0x42d   : > { %v1666_v0 = vsel %vm1328_vm1, %v1661_v61, 0 }
 0x430   : > { %v1659_v3 = vpop.permute.xlu1 %1658 }
 0x434   : > { %v1897_v7 = vpop.permute.xlu1 %1896 }
 0x435   : > { %v1902_v9 = vsel %vm1328_vm1, %v1897_v7, 0 }
 0x438   : > { %v1894_v8 = vpop.permute.xlu1 %1893 }
 0x43c   : > { %v2008_v10 = vpop.permute.xlu1 %2007 }
 0x43d   : > { %v2013_v11 = vsel %vm1328_vm1, %v2008_v10, 0 }
 0x440   : > { %v2118_v14 = vpop.permute.xlu1 %2117 }
 0x441   : > { %v2123_v17 = vsel %vm1328_vm1, %v2118_v14, 0 }
 0x489   : > { %v1369_v43 = vpop.f32.mrb[4].mxu1 }
 0x48a   : > { %v3455_v44 = vpop.f32.mrb[5].mxu1  ;;  %v1376_v45 = vsel %vm1375_vm3, %v1369_v43, -inf }
 0x48b   : > { %1377 = vmax.xlane.f32.xlu0 %v1376_v45  ;;  %v1372_v46 = vpop.f32.mrb[6].mxu1 }
 0x48c   : > { %v3456_v47 = vpop.f32.mrb[7].mxu1 }
 0x518   : > { %v1378_v50 = vpop.xlane.xlu0 %1377 }
 0x519   : > { %v1379_v51 = vsub.f32 %v1369_v43, %v1378_v50 }
 0x51b   : > { %v1380_v52 = vmul.f32 1.442695, %v1379_v51 }
 0x51d   : > { %3802 = vpow2.f32 %v1380_v52 }
 0x527   : > { %v3803_v53 = vpop.eup %3802 }
 0x528   : > { %v1382_v54 = vsel %vm1375_vm3, %v3803_v53, 0.0 }
 0x529   : > { %1383 = vadd.xlane.f32.xlu0 %v1382_v54 }
 0x53f   : > { %1550 = vrot.lane.b32.xlu0 %v1326_v25, %s4218_s0 }
 0x543   : > { %2005 = vrot.lane.b32.xlu0 %v4846_v32, %s4218_s0 }
 0x547   : > { %2115 = vrot.lane.b32.xlu0 %v4846_v32, %s4219_s15 }
 0x5b6   : > { %v1384_v57 = vpop.xlane.xlu0 %1383 }
 0x5b7   : > { %3804 = vrcp.f32 %v1384_v57 }
 0x5ba   : > { %v1551_v59 = vpop.permute.xlu0 %1550 }
 0x5bb   : > { %v1556_v60 = vsel %vm1328_vm1, %v1551_v59, 0 }
 0x5bc   : > { %3476 = vmatpush3.bf16.xpose.msra.mxu0 %v1556_v60 }
 0x5bd   : > { %3487 = vmatprep.subr.bf16.mxu0 %v4215_v49 }
 0x5be   : > { %v2006_v16 = vpop.permute.xlu0 %2005 }
 0x5c1   : > { %v3805_v62 = vpop.eup %3804 }
 0x5c2   : > { %v1386_v63 = vmul.f32 %v3805_v62, %v3803_v53  ;;  %v2116_v18 = vpop.permute.xlu0 %2115 }
 0x5c3   : > { %3478 = vmatmul.mubr.msk.bf16.vlgmr.msra.gmra.mrb[4].mxu0 %vm1328_vm1, %v1549_v58 }
 0x5c4   : > { %3488 = vmatpush3.bf16.xpose.msra.mxu0 %v1666_v0  ;;  %v1387_v1 = vpack.c.bf16 %v1386_v63, %v1386_v63  ;;  %3489 = vmatprep.mubr.msk.bf16.mxu0 %vm4216_vm0, %v4215_v49 }
 0x5c5   : > { %3499 = vmatprep.subr.bf16.mxu0 %v4215_v49 }
 0x5c6   : > { %3460 = vmatmul.mubr.msk.bf16.vlgmr.msra.gmra.mrb[8].mxu1 %vm1375_vm3, %v1387_v1 }
 0x5c7   : > { %3464 = vmatpush3.bf16.xpose.msra.mxu1 %v1445_v2  ;;  %3465 = vmatprep.mubr.msk.bf16.mxu1 %vm4216_vm0, %v4215_v49 }
 0x5c8   : > { %3469 = vmatprep.subr.bf16.mxu1 %v4215_v49 }
 0x5cb   : > { %3490 = vmatmul.mubr.msk.bf16.vlgmr.msra.gmra.mrb[8].mxu0 %vm1328_vm1, %v1659_v3 }
 0x5cc   : > { %3500 = vmatpush3.bf16.xpose.msra.mxu0 %v1792_v4  ;;  %3501 = vmatprep.mubr.msk.bf16.mxu0 %vm4216_vm0, %v4215_v49 }
 0x5cd   : > { %3511 = vmatprep.subr.bf16.mxu0 %v4215_v49 }
 0x5ce   : > { %3466 = vmatmul.mubr.msk.bf16.vlgmr.msra.gmra.mrb[12].mxu1 %vm1328_vm1, %v1437_v56 }
 0x5cf   : > { %3471 = vmatprep.mubr.msk.bf16.mxu1 %vm4216_vm0, %v4215_v49 }
 0x5d3   : > { %3502 = vmatmul.mubr.msk.bf16.vlgmr.msra.gmra.mrb[12].mxu0 %vm1328_vm1, %v4846_v32 }
 0x5d4   : > { %3512 = vmatpush3.bf16.xpose.msra.mxu0 %v1902_v9  ;;  %3513 = vmatprep.mubr.msk.bf16.mxu0 %vm4216_vm0, %v4215_v49 }
 0x5d5   : > { %3523 = vmatprep.subr.bf16.mxu0 %v4215_v49 }
 0x5db   : > { %3514 = vmatmul.mubr.msk.bf16.vlgmr.msra.gmra.mrb[16].mxu0 %vm1328_vm1, %v1894_v8 }
 0x5dc   : > { %3524 = vmatpush3.bf16.xpose.msra.mxu0 %v2013_v11  ;;  %3525 = vmatprep.mubr.msk.bf16.mxu0 %vm4216_vm0, %v4215_v49 }
 0x5dd   : > { %3535 = vmatprep.subr.bf16.mxu0 %v4215_v49 }
 0x5e3   : > { %3526 = vmatmul.mubr.msk.bf16.vlgmr.msra.gmra.mrb[20].mxu0 %vm1328_vm1, %v2006_v16 }
 0x5e4   : > { %3536 = vmatpush3.bf16.xpose.msra.mxu0 %v2123_v17  ;;  %3537 = vmatprep.mubr.msk.bf16.mxu0 %vm4216_vm0, %v4215_v49 }
 0x5e5   : > { %3547 = vmatprep.subr.bf16.mxu0 %v4215_v49 }
 0x5eb   : > { %3538 = vmatmul.mubr.msk.bf16.vlgmr.msra.gmra.mrb[24].mxu0 %vm1328_vm1, %v2116_v18 }
 0x5ec   : > { %3563 = vmatprep.mubr.msk.bf16.mxu0 %vm4216_vm0, %v4215_v49 }
 0x696   : > { %v1592_v19 = vpop.f32.mrb[4].mxu0 }
 0x697   : > { %v3479_v20 = vpop.f32.mrb[5].mxu0  ;;  %v1598_v21 = vsel %vm1375_vm3, %v1592_v19, -inf }
 0x698   : > { %1599 = vmax.xlane.f32.xlu0 %v1598_v21  ;;  %v1595_v22 = vpop.f32.mrb[6].mxu0 }
 0x699   : > { %v4907_v23 = vpop.f32.mrb[8].mxu1  ;;  %v3480_v24 = vpop.f32.mrb[7].mxu0 }
 0x69a   : > { %v3461_v25 = vpop.f32.mrb[9].mxu1 }
 0x69b   : > { %v1432_v26 = vpop.f32.mrb[10].mxu1 }
 0x69c   : > { %v3462_v27 = vpop.f32.mrb[11].mxu1 }
 0x69e   : > { %v1702_v28 = vpop.f32.mrb[8].mxu0 }
 0x69f   : > { %v3491_v29 = vpop.f32.mrb[9].mxu0  ;;  %v1708_v30 = vsel %vm1375_vm3, %v1702_v28, -inf }
 0x6a0   : > { %1709 = vmax.xlane.f32.xlu0 %v1708_v30  ;;  %v1705_v31 = vpop.f32.mrb[10].mxu0 }
 0x6a1   : > { %v1481_v32 = vpop.f32.mrb[12].mxu1  ;;  %v3492_v33 = vpop.f32.mrb[11].mxu0 }
 0x6a2   : > { %v3467_v34 = vpop.f32.mrb[13].mxu1  ;;  %v1487_v35 = vsel %vm1375_vm3, %v1481_v32, -inf }
 0x6a3   : > { %1488 = vmax.xlane.f32.xlu1 %v1487_v35  ;;  %v1484_v36 = vpop.f32.mrb[14].mxu1 }
 0x6a4   : > { %v3468_v37 = vpop.f32.mrb[15].mxu1 }
 0x6a6   : > { %v1828_v38 = vpop.f32.mrb[12].mxu0 }
 0x6a7   : > { %v3503_v41 = vpop.f32.mrb[13].mxu0  ;;  %v1834_v42 = vsel %vm1375_vm3, %v1828_v38, -inf }
 0x6a8   : > { %v1831_v43 = vpop.f32.mrb[14].mxu0  ;;  %1835 = vmax.xlane.f32.xlu1 %v1834_v42 }
 0x6a9   : > { %v3504_v44 = vpop.f32.mrb[15].mxu0 }
 0x6ae   : > { %v1938_v45 = vpop.f32.mrb[16].mxu0 }
 0x6af   : > { %v3515_v46 = vpop.f32.mrb[17].mxu0  ;;  %v1944_v47 = vsel %vm1375_vm3, %v1938_v45, -inf }
 0x6b0   : > { %1945 = vmax.xlane.f32.xlu0 %v1944_v47  ;;  %v1941_v50 = vpop.f32.mrb[18].mxu0 }
 0x6b1   : > { %v3516_v51 = vpop.f32.mrb[19].mxu0 }
 0x6b6   : > { %v2049_v52 = vpop.f32.mrb[20].mxu0 }
 0x6b7   : > { %v3527_v53 = vpop.f32.mrb[21].mxu0  ;;  %v2055_v54 = vsel %vm1375_vm3, %v2049_v52, -inf }
 0x6b8   : > { %v2052_v55 = vpop.f32.mrb[22].mxu0  ;;  %2056 = vmax.xlane.f32.xlu1 %v2055_v54 }
 0x6b9   : > { %v3528_v56 = vpop.f32.mrb[23].mxu0 }
 0x6be   : > { %v2159_v57 = vpop.f32.mrb[24].mxu0 }
 0x6bf   : > { %v3539_v58 = vpop.f32.mrb[25].mxu0  ;;  %v2165_v59 = vsel %vm1375_vm3, %v2159_v57, -inf }
 0x6c0   : > { %2166 = vmax.xlane.f32.xlu0 %v2165_v59  ;;  %v2162_v60 = vpop.f32.mrb[26].mxu0 }
 0x6c1   : > { %v3540_v61 = vpop.f32.mrb[27].mxu0 }
 0x725   : > { %v1600_v62 = vpop.xlane.xlu0 %1599 }
 0x726   : > { %v1601_v63 = vsub.f32 %v1592_v19, %v1600_v62 }
 0x728   : > { %v1602_v0 = vmul.f32 1.442695, %v1601_v63 }
 0x72a   : > { %3806 = vpow2.f32 %v1602_v0 }
 0x72d   : > { %v1710_v1 = vpop.xlane.xlu0 %1709 }
 0x72e   : > { %v1711_v2 = vsub.f32 %v1702_v28, %v1710_v1 }
 0x730   : > { %v1712_v3 = vmul.f32 1.442695, %v1711_v2  ;;  %v1489_v4 = vpop.xlane.xlu1 %1488 }
 0x731   : > { %v1490_v7 = vsub.f32 %v1481_v32, %v1489_v4 }
 0x732   : > { %3808 = vpow2.f32 %v1712_v3 }
 0x733   : > { %v1491_v8 = vmul.f32 1.442695, %v1490_v7 }
 0x734   : > { %v4915_v9 = vpop.eup %3806 }
 0x735   : > { %3810 = vpow2.f32 %v1491_v8  ;;  %v1836_v10 = vpop.xlane.xlu1 %1835  ;;  %v1604_v11 = vsel %vm1375_vm3, %v4915_v9, 0.0 }
 0x736   : > { %v1837_v14 = vsub.f32 %v1828_v38, %v1836_v10  ;;  %1605 = vadd.xlane.f32.xlu0 %v1604_v11  ;;  %v1787_v38 = vpack.c.bf16 %v4855_v40, %v4855_v40 }
 0x738   : > { %v1838_v16 = vmul.f32 1.442695, %v1837_v14  ;;  %v1850_v63 = vsel %vm1391_vm2, %v1787_v38, 0 }
 0x73a   : > { %3812 = vpow2.f32 %v1838_v16 }
 0x73c   : > { %v4919_v17 = vpop.eup %3808 }
 0x73d   : > { %v1946_v18 = vpop.xlane.xlu0 %1945  ;;  %v1714_v19 = vsel %vm1375_vm3, %v4919_v17, 0.0 }
 0x73e   : > { %v1947_v20 = vsub.f32 %v1938_v45, %v1946_v18  ;;  %1715 = vadd.xlane.f32.xlu1 %v1714_v19 }
 0x73f   : > { %v3811_v21 = vpop.eup %3810 }
 0x740   : > { %v1948_v22 = vmul.f32 1.442695, %v1947_v20  ;;  %v1493_v24 = vsel %vm1375_vm3, %v3811_v21, 0.0 }
 0x742   : > { %3814 = vpow2.f32 %v1948_v22  ;;  %1494 = vadd.xlane.f32.xlu1 %v1493_v24 }
 0x744   : > { %v4924_v25 = vpop.eup %3812 }
 0x745   : > { %v1840_v26 = vsel %vm1375_vm3, %v4924_v25, 0.0  ;;  %v2057_v29 = vpop.xlane.xlu1 %2056 }
 0x746   : > { %1841 = vadd.xlane.f32.xlu0 %v1840_v26  ;;  %v2058_v30 = vsub.f32 %v2049_v52, %v2057_v29 }
 0x748   : > { %v2059_v31 = vmul.f32 1.442695, %v2058_v30 }
 0x74a   : > { %3816 = vpow2.f32 %v2059_v31 }
 0x74c   : > { %v4928_v27 = vpop.eup %3814 }
 0x74d   : > { %v1950_v28 = vsel %vm1375_vm3, %v4928_v27, 0.0  ;;  %v2167_v32 = vpop.xlane.xlu0 %2166 }
 0x74e   : > { %1951 = vadd.xlane.f32.xlu0 %v1950_v28  ;;  %v2168_v33 = vsub.f32 %v2159_v57, %v2167_v32 }
 0x750   : > { %v2169_v35 = vmul.f32 1.442695, %v2168_v33 }
 0x752   : > { %3818 = vpow2.f32 %v2169_v35 }
 0x753   : > { %1500 = vrot.lane.b32.xlu1 %v4853_v39, %s4217_s19 }
 0x754   : > { %v4938_v34 = vpop.eup %3816 }
 0x755   : > { %v2061_v36 = vsel %vm1375_vm3, %v4938_v34, 0.0 }
 0x75c   : > { %v4942_v37 = vpop.eup %3818 }
 0x75d   : > { %v2171_v41 = vsel %vm1375_vm3, %v4942_v37, 0.0 }
 0x764   : > { %1610 = vrot.lane.b32.xlu0 %v4853_v39, %s4218_s0 }
 0x768   : > { %1720 = vrot.lane.b32.xlu0 %v4853_v39, %s4219_s15 }
 0x777   : > { %2062 = vadd.xlane.f32.xlu1 %v2061_v36 }
 0x787   : > { %2172 = vadd.xlane.f32.xlu0 %v2171_v41 }
 0x788   : > { %1957 = vrot.lane.b32.xlu1 %v1787_v38, %s4217_s19 }
 0x78c   : > { %2177 = vrot.lane.b32.xlu1 %v1787_v38, %s4219_s15 }
 0x79d   : > { %2067 = vrot.lane.b32.xlu0 %v1787_v38, %s4218_s0 }
 0x7c3   : > { %v1606_v43 = vpop.xlane.xlu0 %1605 }
 0x7cb   : > { %v1716_v39 = vpop.xlane.xlu1 %1715 }
 0x7cf   : > { %v1495_v42 = vpop.xlane.xlu1 %1494 }
 0x7d0   : > { %3820 = vrcp.f32 %v1495_v42  ;;  %v3755_v42 = vld [vmem:[%s4722_s21 + $0x8] sm:$0xff]  }
 0x7d1   : > { %3822 = vrcp.f32 %v1606_v43  ;;  %v3756_v43 = vld [vmem:[%s4722_s21 + $0x10] sm:$0xff]  }
 0x7d2   : > { %3824 = vrcp.f32 %v1716_v39 }
 0x7d3   : > { %v1501_v44 = vpop.permute.xlu1 %1500  ;;  %v1842_v40 = vpop.xlane.xlu0 %1841 }
 0x7d4   : > { %v1506_v45 = vsel %vm1391_vm2, %v1501_v44, 0  ;;  %3826 = vrcp.f32 %v1842_v40  ;;  %v3757_v44 = vld [vmem:[%s4722_s21 + $0x18] sm:$0xff]  }
 0x7d5   : > { %3470 = vmatpush3.bf16.msra.mxu1 %v1506_v45 }
 0x7d6   : > { %3481 = vmatprep.subr.bf16.mxu1 %v4215_v49 }
 0x7da   : > { %v3821_v46 = vpop.eup %3820 }
 0x7db   : > { %v1497_v47 = vmul.f32 %v3821_v46, %v3811_v21  ;;  %v1952_v50 = vpop.xlane.xlu0 %1951  ;;  %v3823_v52 = vpop.eup %3822 }
 0x7dc   : > { %v1608_v55 = vmul.f32 %v3823_v52, %v4915_v9  ;;  %v3825_v58 = vpop.eup %3824  ;;  %3828 = vrcp.f32 %v1952_v50  ;;  %v3759_v52 = vld [vmem:[%s4722_s21 + $0x28] sm:$0xff]  }
 0x7dd   : > { %v1498_v51 = vpack.c.bf16 %v1497_v47, %v1497_v47  ;;  %v1718_v60 = vmul.f32 %v3825_v58, %v4919_v17  ;;  %v3758_v47 = vld [vmem:[%s4722_s21 + $0x20] sm:$0xff]  }
 0x7de   : > { %v1609_v57 = vpack.c.bf16 %v1608_v55, %v1608_v55  ;;  %v3827_v62 = vpop.eup %3826 }
 0x7df   : > { %v1611_v53 = vpop.permute.xlu0 %1610  ;;  %3472 = vmatmul.mubr.msk.bf16.vlgmr.msra.gmra.mrb[16].mxu1 %vm1375_vm3, %v1498_v51  ;;  %v1719_v61 = vpack.c.bf16 %v1718_v60, %v1718_v60  ;;  %v1844_v0 = vmul.f32 %v3827_v62, %v4924_v25  ;;  %v3754_v25 = vld [vmem:[%s4722_s21] sm:$0xff]  }
 0x7e0   : > { %v1616_v54 = vsel %vm1391_vm2, %v1611_v53, 0  ;;  %3483 = vmatprep.mubr.msk.bf16.mxu1 %vm4216_vm0, %v4215_v49  ;;  %3548 = vmatpush3.bf16.msra.mxu0 %v3754_v25  ;;  %v3760_v53 = vld [vmem:[%s4722_s21 + $0x30] sm:$0xff]  }
 0x7e1   : > { %3482 = vmatpush3.bf16.msra.mxu1 %v1616_v54  ;;  %v1845_v1 = vpack.c.bf16 %v1844_v0, %v1844_v0  ;;  %3549 = vmatprep.subr.bf16.mxu0 %v4215_v49  ;;  %v3761_v54 = vld [vmem:[%s4722_s21 + $0x38] sm:$0xff]  }
 0x7e2   : > { %3493 = vmatprep.subr.bf16.mxu1 %v4215_v49 }
 0x7e3   : > { %v1721_v56 = vpop.permute.xlu0 %1720 }
 0x7e4   : > { %v1726_v59 = vsel %vm1391_vm2, %v1721_v56, 0  ;;  %3550 = vmatpush3.bf16.msra.mxu0 %v3755_v42  ;;  %v3773_v42 = vld [vmem:[%s4724_s7 + $0x34] ss:$8 sps:$4 sm:$0xff]  }
 0x7e5   : > { %3551 = vmatprep.subr.bf16.mxu0 %v4215_v49 }
 0x7e6   : > { %v3829_v2 = vpop.eup %3828 }
 0x7e7   : > { %3484 = vmatmul.mubr.msk.bf16.vlgmr.msra.gmra.mrb[20].mxu1 %vm1375_vm3, %v1609_v57  ;;  %v1954_v4 = vmul.f32 %v3829_v2, %v4928_v27 }
 0x7e8   : > { %3494 = vmatpush3.bf16.msra.mxu1 %v1726_v59  ;;  %3495 = vmatprep.mubr.msk.bf16.mxu1 %vm4216_vm0, %v4215_v49 }
 0x7e9   : > { %3505 = vmatprep.subr.bf16.mxu1 %v4215_v49  ;;  %v1955_v9 = vpack.c.bf16 %v1954_v4, %v1954_v4  ;;  %3552 = vmatpush3.bf16.msra.mxu0 %v3756_v43  ;;  %v3771_v43 = vld [vmem:[%s4724_s7 + $0x30] ss:$8 sps:$4 sm:$0xff]  }
 0x7ea   : > { %3553 = vmatprep.subr.bf16.mxu0 %v4215_v49 }
 0x7ed   : > { %3554 = vmatpush3.bf16.msra.mxu0 %v3757_v44  ;;  %v3776_v44 = vld [vmem:[%s4724_s7 + $0x44] ss:$8 sps:$4 sm:$0xff]  }
 0x7ee   : > { %3555 = vmatprep.subr.bf16.mxu0 %v4215_v49 }
 0x7ef   : > { %3496 = vmatmul.mubr.msk.bf16.vlgmr.msra.gmra.mrb[24].mxu1 %vm1375_vm3, %v1719_v61 }
 0x7f0   : > { %3506 = vmatpush3.bf16.msra.mxu1 %v1850_v63  ;;  %3507 = vmatprep.mubr.msk.bf16.mxu1 %vm4216_vm0, %v4215_v49 }
 0x7f1   : > { %3517 = vmatprep.subr.bf16.mxu1 %v4215_v49  ;;  %3556 = vmatpush3.bf16.msra.mxu0 %v3758_v47  ;;  %v3782_v47 = vld [vmem:[%s4724_s7 + $0x64] ss:$8 sps:$4 sm:$0xff]  }
 0x7f2   : > { %3557 = vmatprep.subr.bf16.mxu0 %v4215_v49 }
 0x7f5   : > { %3558 = vmatpush3.bf16.msra.mxu0 %v3759_v52  ;;  %v3783_v52 = vld [vmem:[%s4724_s7 + $0x70] ss:$8 sps:$4 sm:$0xff]  }
 0x7f6   : > { %3559 = vmatprep.subr.bf16.mxu0 %v4215_v49 }
 0x7f7   : > { %3508 = vmatmul.mubr.msk.bf16.vlgmr.msra.gmra.mrb[28].mxu1 %vm1375_vm3, %v1845_v1 }
 0x7f8   : > { %3519 = vmatprep.mubr.msk.bf16.mxu1 %vm4216_vm0, %v4215_v49 }
 0x7f9   : > { %3560 = vmatpush3.bf16.msra.mxu0 %v3760_v53 }
 0x7fa   : > { %3561 = vmatprep.subr.bf16.mxu0 %v4215_v49 }
 0x7fd   : > { %3562 = vmatpush3.bf16.msra.mxu0 %v3761_v54 }
 0x804   : > { %v2063_v3 = vpop.xlane.xlu1 %2062 }
 0x805   : > { %3830 = vrcp.f32 %v2063_v3 }
 0x808   : > { %v1958_v7 = vpop.permute.xlu1 %1957 }
 0x809   : > { %v1963_v8 = vsel %vm1391_vm2, %v1958_v7, 0 }
 0x80a   : > { %3518 = vmatpush3.bf16.msra.mxu1 %v1963_v8 }
 0x80b   : > { %3529 = vmatprep.subr.bf16.mxu1 %v4215_v49 }
 0x80c   : > { %v2178_v18 = vpop.permute.xlu1 %2177 }
 0x80d   : > { %3520 = vmatmul.mubr.msk.bf16.vlgmr.msra.gmra.mrb[32].mxu1 %vm1375_vm3, %v1955_v9  ;;  %v2183_v20 = vsel %vm1391_vm2, %v2178_v18, 0 }
 0x80e   : > { %3531 = vmatprep.mubr.msk.bf16.mxu1 %vm4216_vm0, %v4215_v49 }
 0x80f   : > { %v3831_v10 = vpop.eup %3830 }
 0x810   : > { %v2065_v14 = vmul.f32 %v3831_v10, %v4938_v34 }
 0x812   : > { %v2066_v19 = vpack.c.bf16 %v2065_v14, %v2065_v14 }
 0x814   : > { %v2173_v11 = vpop.xlane.xlu0 %2172 }
 0x815   : > { %3832 = vrcp.f32 %v2173_v11 }
 0x818   : > { %v2068_v16 = vpop.permute.xlu0 %2067 }
 0x819   : > { %v2073_v17 = vsel %vm1391_vm2, %v2068_v16, 0 }
 0x81a   : > { %3530 = vmatpush3.bf16.msra.mxu1 %v2073_v17 }
 0x81b   : > { %3541 = vmatprep.subr.bf16.mxu1 %v4215_v49 }
 0x81d   : > { %3532 = vmatmul.mubr.msk.bf16.vlgmr.msra.gmra.mrb[36].mxu1 %vm1375_vm3, %v2066_v19 }
 0x81e   : > { %3542 = vmatpush3.bf16.msra.mxu1 %v2183_v20  ;;  %3543 = vmatprep.mubr.msk.bf16.mxu1 %vm4216_vm0, %v4215_v49 }
 0x81f   : > { %v3833_v21 = vpop.eup %3832 }
 0x820   : > { %v2175_v22 = vmul.f32 %v3833_v21, %v4942_v37  ;;  %v3258_v21 = vld [vmem:[%s5248_s13] ss:$0 sm:$0xff] }
 0x822   : > { %v2176_v24 = vpack.c.bf16 %v2175_v22, %v2175_v22 }
 0x825   : > { %3544 = vmatmul.mubr.msk.bf16.vlgmr.msra.gmra.mrb[40].mxu1 %vm1375_vm3, %v2176_v24 }
 0x826   : > { %2537 = vmatprep.mubr.bf16.mxu1 %v4214_v48 }
 0x8b2   : > { %v1542_v26 = vpop.f32.mrb[16].mxu1 }
 0x8b3   : > { %v3473_v27 = vpop.f32.mrb[17].mxu1 }
 0x8b4   : > { %v1545_v28 = vpop.f32.mrb[18].mxu1 }
 0x8b5   : > { %v3474_v29 = vpop.f32.mrb[19].mxu1 }
 0x8ba   : > { %v1652_v30 = vpop.f32.mrb[20].mxu1 }
 0x8bb   : > { %v3485_v31 = vpop.f32.mrb[21].mxu1 }
 0x8bc   : > { %v1655_v32 = vpop.f32.mrb[22].mxu1  ;;  %v3764_v31 = vld [vmem:[%s4724_s7 + $0x4] ss:$8 sps:$4 sm:$0xff]  }
 0x8bd   : > { %v3486_v33 = vpop.f32.mrb[23].mxu1  ;;  %v3767_v32 = vld [vmem:[%s4724_s7 + $0x14] ss:$8 sps:$4 sm:$0xff]   ;;  %2505 = vmatprep.subr.bf16.mxu1 %v3764_v31 }
 0x8be   : > { %v3765_v33 = vld [vmem:[%s4724_s7 + $0x10] ss:$8 sps:$4 sm:$0xff]  }
 0x8c2   : > { %v1762_v34 = vpop.f32.mrb[24].mxu1 }
 0x8c3   : > { %v3497_v35 = vpop.f32.mrb[25].mxu1 }
 0x8c4   : > { %v1765_v36 = vpop.f32.mrb[26].mxu1 }
 0x8c5   : > { %v3498_v37 = vpop.f32.mrb[27].mxu1 }
 0x8ca   : > { %v1886_v48 = vpop.f32.mrb[28].mxu1 }
 0x8cb   : > { %v3509_v38 = vpop.f32.mrb[29].mxu1 }
 0x8cc   : > { %v1889_v41 = vpop.f32.mrb[30].mxu1 }
 0x8cd   : > { %v3510_v39 = vpop.f32.mrb[31].mxu1  ;;  %v3770_v41 = vld [vmem:[%s4724_s7 + $0x24] ss:$8 sps:$4 sm:$0xff]  }
 0x8ce   : > { %v3768_v39 = vld [vmem:[%s4724_s7 + $0x20] ss:$8 sps:$4 sm:$0xff]  }
 0x8e0   : > { %v1999_v45 = vpop.f32.mrb[32].mxu1 }
 0x8e1   : > { %v3707_v40 = vpack.i.bf16 %v1999_v45, %v1542_v26  ;;  %v3521_v46 = vpop.f32.mrb[33].mxu1  ;;  %v3774_v45 = vld [vmem:[%s4724_s7 + $0x40] ss:$8 sps:$4 sm:$0xff]  }
 0x8e2   : > { %v2002_v50 = vpop.f32.mrb[34].mxu1  ;;  %v3777_v46 = vld [vmem:[%s4724_s7 + $0x50] ss:$8 sps:$4 sm:$0xff]  }
 0x8e3   : > { %3708 = vrot.lane.b32.xlu1 %v3707_v40, %s4219_s15  ;;  %v3522_v51 = vpop.f32.mrb[35].mxu1  ;;  %v3779_v40 = vld [vmem:[%s4724_s7 + $0x54] ss:$8 sps:$4 sm:$0xff]   ;;  %v3780_v50 = vld [vmem:[%s4724_s7 + $0x60] ss:$8 sps:$4 sm:$0xff]   ;;  %s3310_s15 = sld [smem:[#allocation5 + $0x1]] (!%p3304_p6) }
 0x8e4   : > { %v3785_v51 = vld [vmem:[%s4724_s7 + $0x74] ss:$8 sps:$4 sm:$0xff]  }
 0x8e9   : > { %p2822_p10 = scmp.gt.s32.totalorder (!%p3304_p6), %s3310_s15, 0  ;;  %p3311_p11 = scmp.lt.s32.totalorder (!%p3304_p6), %s3310_s15, 3 }
 0x8f0   : > { %v2109_v55 = vpop.f32.mrb[36].mxu1 }
 0x8f1   : > { %v3712_v56 = vpack.i.bf16 %v2109_v55, %v1652_v30  ;;  %v3533_v57 = vpop.f32.mrb[37].mxu1  ;;  %v3762_v30 = vld [vmem:[%s4724_s7] ss:$8 sps:$4 sm:$0xff]   ;;  %s5250_s7 = scalar_lea.vmem %s5249_s6, %s4684_s29 }
 0x8f2   : > { %v2112_v58 = vpop.f32.mrb[38].mxu1  ;;  %2506 = vmatpush1.bf16.msra.mxu1 %v3762_v30 }
 0x8f3   : > { %3713 = vrot.lane.b32.xlu1 %v3712_v56, %s4218_s0  ;;  %v3534_v59 = vpop.f32.mrb[39].mxu1  ;;  %2507 = vmatprep.subr.bf16.mxu1 %v3767_v32  ;;  %s2811_s0 = sld [smem:[#allocation5]] (!%p3304_p6) }
 0x8f6   : > { %2508 = vmatpush1.bf16.msra.mxu1 %v3765_v33 }
 0x8f7   : > { %2509 = vmatprep.subr.bf16.mxu1 %v3770_v41 }
 0x8f8   : > { %v2219_v60 = vpop.f32.mrb[40].mxu1 }
 0x8f9   : > { %v3717_v61 = vpack.i.bf16 %v2219_v60, %v1762_v34  ;;  %v3545_v62 = vpop.f32.mrb[41].mxu1  ;;  %p2812_p3 = scmp.gt.s32.totalorder (!%p3304_p6), %s2811_s0, 0  ;;  %p3305_p1 = scmp.lt.s32.totalorder (!%p3304_p6), %s2811_s0, 3 }
 0x8fa   : > { %v2222_v63 = vpop.f32.mrb[42].mxu1  ;;  %2510 = vmatpush1.bf16.msra.mxu1 %v3768_v39 }
 0x8fb   : > { %3718 = vrot.lane.b32.xlu1 %v3717_v61, %s4217_s19  ;;  %v3546_v0 = vpop.f32.mrb[43].mxu1  ;;  %2511 = vmatprep.subr.bf16.mxu1 %v3773_v42  ;;  %v3267_v61 = vld [vmem:[%s5250_s7] ss:$0 sm:$0xff] }
 0x8fe   : > { %2512 = vmatpush1.bf16.msra.mxu1 %v3771_v43 }
 0x8ff   : > { %2513 = vmatprep.subr.bf16.mxu1 %v3776_v44 }
 0x902   : > { %2514 = vmatpush1.bf16.msra.mxu1 %v3774_v45 }
 0x903   : > { %2515 = vmatprep.subr.bf16.mxu1 %v3779_v40 }
 0x906   : > { %2516 = vmatpush1.bf16.msra.mxu1 %v3777_v46 }
 0x907   : > { %2517 = vmatprep.subr.bf16.mxu1 %v3782_v47 }
 0x90a   : > { %2518 = vmatpush1.bf16.msra.mxu1 %v3780_v50 }
 0x90b   : > { %2519 = vmatprep.subr.bf16.mxu1 %v3785_v51 }
 0x90e   : > { %2520 = vmatpush1.bf16.msra.mxu1 %v3783_v52 }
 0x955   : > { %v3709_v1 = vpop.permute.xlu1 %3708 }
 0x956   : > { %v3711_v3 = vunpack.i.h.bf16 %v3709_v1  ;;  %v3710_v49 = vunpack.i.l.bf16 %v3709_v1  ;;  %v3268_v1 = vld [vmem:[%s5252_s11] ss:$0 sm:$0xff] }
 0x958   : > { %v2237_v9 = vsel %vm1328_vm1, %v1886_v48, %v3711_v3  ;;  %v1780_v10 = vsel %vm1328_vm1, %v4907_v23, %v3710_v49 }
 0x965   : > { %v3714_v2 = vpop.permute.xlu1 %3713 }
 0x966   : > { %v3716_v4 = vunpack.i.h.bf16 %v3714_v2  ;;  %v3715_v7 = vunpack.i.l.bf16 %v3714_v2 }
 0x968   : > { %v2238_v16 = vsel %vm1781_vm4, %v2237_v9, %v3716_v4  ;;  %v1782_v17 = vsel %vm1781_vm4, %v1780_v10, %v3715_v7  ;;  %v3786_v7 = vld [vmem:[%s4726_s26 + $0x40] sm:$0xff]   ;;  %v3788_v9 = vld [vmem:[%s4726_s26 + $0x48] sm:$0xff]  }
 0x969   : > { %3409 = vmatprep.subr.bf16.mxu0 %v3786_v7  ;;  %v3789_v10 = vld [vmem:[%s4726_s26 + $0x8] sm:$0xff]  }
 0x96d   : > { %v3719_v8 = vpop.permute.xlu1 %3718 }
 0x96e   : > { %v3721_v11 = vunpack.i.h.bf16 %v3719_v8  ;;  %v3720_v14 = vunpack.i.l.bf16 %v3719_v8  ;;  %v3787_v8 = vld [vmem:[%s4726_s26] sm:$0xff]  }
 0x970   : > { %v2239_v18 = vsel %vm1783_vm5, %v2238_v16, %v3721_v11  ;;  %v1784_v19 = vsel %vm1783_vm5, %v1782_v17, %v3720_v14  ;;  %v3790_v11 = vld [vmem:[%s4726_s26 + $0x50] sm:$0xff]   ;;  %v3792_v16 = vld [vmem:[%s4726_s26 + $0x58] sm:$0xff]  }
 0x971   : > { %v2240_v20 = vpack.c.bf16 %v2239_v18, %v1784_v19  ;;  %v3791_v14 = vld [vmem:[%s4726_s26 + $0x10] sm:$0xff]   ;;  %v3793_v17 = vld [vmem:[%s4726_s26 + $0x18] sm:$0xff]   ;;  %v3794_v18 = vld [vmem:[%s4726_s26 + $0x60] sm:$0xff]  }
 0x972   : > { %v3795_v19 = vld [vmem:[%s4726_s26 + $0x20] sm:$0xff]  }
 0x973   : > { %3564 = vmatmul.mubr.bf16.vlgmr.msra.gmra.mrb[28].mxu0 %v2240_v20  ;;  %v3796_v20 = vld [vmem:[%s4726_s26 + $0x68] sm:$0xff]  }
 0x974   : > { %3410 = vmatpush3.bf16.msra.mxu0 %v3787_v8 }
 0x975   : > { %3411 = vmatprep.subr.bf16.mxu0 %v3788_v9 }
 0x978   : > { %3412 = vmatpush3.bf16.msra.mxu0 %v3789_v10 }
 0x979   : > { %3413 = vmatprep.subr.bf16.mxu0 %v3790_v11  ;;  %v3285_v11 = vld [vmem:[%s854_s30] ss:$0 sm:$0xff] }
 0x97c   : > { %3414 = vmatpush3.bf16.msra.mxu0 %v3791_v14 }
 0x97d   : > { %3415 = vmatprep.subr.bf16.mxu0 %v3792_v16 }
 0x980   : > { %3416 = vmatpush3.bf16.msra.mxu0 %v3793_v17 }
 0x981   : > { %3417 = vmatprep.subr.bf16.mxu0 %v3794_v18 }
 0x984   : > { %3418 = vmatpush3.bf16.msra.mxu0 %v3795_v19 }
 0x985   : > { %3419 = vmatprep.subr.bf16.mxu0 %v3796_v20 }
 0xa46   : > { %v2346_v22 = vpop.f32.mrb[28].mxu0 }
 0xa47   : > { %v2347_v24 = vadd.f32 %v3258_v21, %v2346_v22  ;;  %v3565_v23 = vpop.f32.mrb[29].mxu0  ;;  %v3798_v22 = vld [vmem:[%s4726_s26 + $0x70] sm:$0xff]  }
 0xa48   : > { %v2349_v25 = vpop.f32.mrb[30].mxu0  ;;  %v3800_v23 = vld [vmem:[%s4726_s26 + $0x78] sm:$0xff]  }
 0xa49   : > { %v2350_v26 = vadd.f32 %v3258_v21, %v2349_v25  ;;  %v3566_v27 = vpop.f32.mrb[31].mxu0  ;;  %v2353_v28 = vadd.f32 %v2347_v24, %v4805_v5  ;;  %v3797_v21 = vld [vmem:[%s4726_s26 + $0x28] sm:$0xff]   ;;  %v3799_v24 = vld [vmem:[%s4726_s26 + $0x30] sm:$0xff]   ;;  %v3801_v25 = vld [vmem:[%s4726_s26 + $0x38] sm:$0xff]  }
 0xa4a   : > { %3420 = vmatpush3.bf16.msra.mxu0 %v3797_v21 }
 0xa4b   : > { %2357 = vadd.xlane.f32.xlu0 %v2353_v28  ;;  %v2354_v29 = vadd.f32 %v2350_v26, %v4807_v6  ;;  %3421 = vmatprep.subr.bf16.mxu0 %v3798_v22  ;;  %v2413_v26 = vld [vmem:[%s4708_s14] sm:$0x3] }
 0xa4c   : > { %v2418_v27 = vrot.slane %v2413_v26, %v1098_v13 }
 0xa4d   : > { %2359 = vadd.xlane.f32.xlu1 %v2354_v29 }
 0xa4e   : > { %3422 = vmatpush3.bf16.msra.mxu0 %v3799_v24 }
 0xa4f   : > { %3423 = vmatprep.subr.bf16.mxu0 %v3800_v23 }
 0xa52   : > { %3424 = vmatpush3.bf16.msra.mxu0 %v3801_v25 }
 0xad8   : > { %v2358_v34 = vpop.xlane.xlu0 %2357 }
 0xad9   : > { %v2362_v35 = vmul.f32 0.0078125, %v2358_v34 }
 0xada   : > { %v2360_v36 = vpop.xlane.xlu1 %2359 }
 0xadb   : > { %v2364_v5 = vsub.f32 %v2353_v28, %v2362_v35  ;;  %v2363_v6 = vmul.f32 0.0078125, %v2360_v36  ;;  %v2422_v28 = vrot.slane %v2413_v26, %v1102_v15 }
 0xadd   : > { %v2365_v37 = vsub.f32 %v2354_v29, %v2363_v6  ;;  %v2366_v48 = vmul.f32 %v2364_v5, %v2364_v5 }
 0xadf   : > { %2368 = vadd.xlane.f32.xlu0 %v2366_v48  ;;  %v2367_v38 = vmul.f32 %v2365_v37, %v2365_v37 }
 0xae3   : > { %2370 = vadd.xlane.f32.xlu0 %v2367_v38 }
 0xb6c   : > { %v2369_v53 = vpop.xlane.xlu0 %2368 }
 0xb6d   : > { %v2372_v54 = vmul.f32 0.0078125, %v2369_v53 }
 0xb6f   : > { %v2374_v55 = vadd.f32 1e-12, %v2372_v54 }
 0xb70   : > { %v2371_v56 = vpop.xlane.xlu0 %2370 }
 0xb71   : > { %3834 = vrsqrt.f32 %v2374_v55  ;;  %v2373_v57 = vmul.f32 0.0078125, %v2371_v56 }
 0xb73   : > { %v2375_v58 = vadd.f32 1e-12, %v2373_v57 }
 0xb75   : > { %3836 = vrsqrt.f32 %v2375_v58 }
 0xb7b   : > { %v3835_v59 = vpop.eup %3834 }
 0xb7c   : > { %v2378_v60 = vmul.f32 %v3835_v59, %v2364_v5 }
 0xb7e   : > { %v2386_v0 = vmul.f32 %v3267_v61, %v2378_v60 }
 0xb7f   : > { %v3837_v62 = vpop.eup %3836 }
 0xb80   : > { %v2379_v63 = vmul.f32 %v3837_v62, %v2365_v37  ;;  %v5044_v3 = vadd.f32 %v3268_v1, %v2386_v0 }
 0xb82   : > { %v2387_v2 = vmul.f32 %v3267_v61, %v2379_v63 }
 0xb84   : > { %v5046_v49 = vadd.f32 %v3268_v1, %v2387_v2 }
 0xb86   : > { %v2396_v4 = vpack.c.bf16 %v5046_v49, %v5044_v3 }
 0xb88   : > { %2538 = vmatmul.mubr.bf16.vlgmr.msra.gmra.mrb[44].mxu1 %v2396_v4 }
 0xc5b   : > { %v2539_v29 = vpop.f32.mrb[44].mxu1 }
 0xc5c   : > { %v2540_v30 = vadd.f32 %v2539_v29, %v2418_v27  ;;  %v2541_v31 = vpop.f32.mrb[45].mxu1 }
 0xc5d   : > { %v2542_v32 = vadd.f32 %v2541_v31, %v2422_v28  ;;  %v2543_v33 = vpop.f32.mrb[46].mxu1 }
 0xc5e   : > { %v2548_v34 = vmul.f32 %v2540_v30, %v2540_v30  ;;  %v2544_v35 = vadd.f32 %v2543_v33, %v2418_v27  ;;  %v2545_v36 = vpop.f32.mrb[47].mxu1 }
 0xc5f   : > { %v2549_v5 = vmul.f32 %v2542_v32, %v2542_v32  ;;  %v2546_v6 = vadd.f32 %v2545_v36, %v2422_v28 }
 0xc60   : > { %v2552_v37 = vmul.f32 %v2548_v34, %v2540_v30  ;;  %v2550_v48 = vmul.f32 %v2544_v35, %v2544_v35 }
 0xc61   : > { %v2553_v38 = vmul.f32 %v2549_v5, %v2542_v32  ;;  %v2551_v41 = vmul.f32 %v2546_v6, %v2546_v6  ;;  %v3302_v5 = vld [vmem:[%s857_s16] ss:$0 sm:$0xff] }
 0xc62   : > { %v2556_v39 = vmul.f32 0.044715, %v2552_v37  ;;  %v2554_v42 = vmul.f32 %v2550_v48, %v2544_v35  ;;  %v3303_v48 = vld [vmem:[%s860_s27] ss:$0 sm:$0xff]  ;;  %s5256_s27 = sld [smem:[#allocation45_spill]] (!%p3304_p6) }
 0xc63   : > { %v2557_v13 = vmul.f32 0.044715, %v2553_v38  ;;  %v2555_v43 = vmul.f32 %v2551_v41, %v2546_v6 }
 0xc64   : > { %v2560_v12 = vadd.f32 %v2556_v39, %v2540_v30  ;;  %v2558_v15 = vmul.f32 0.044715, %v2554_v42 }
 0xc65   : > { %v2561_v44 = vadd.f32 %v2557_v13, %v2542_v32  ;;  %v2559_v45 = vmul.f32 0.044715, %v2555_v43 }
 0xc66   : > { %v2564_v40 = vmul.f32 0.7978846, %v2560_v12  ;;  %v2562_v46 = vadd.f32 %v2558_v15, %v2544_v35 }
 0xc67   : > { %v2565_v47 = vmul.f32 0.7978846, %v2561_v44  ;;  %v2563_v50 = vadd.f32 %v2559_v45, %v2546_v6 }
 0xc68   : > { %3838 = vtanh.f32 %v2564_v40  ;;  %v2566_v51 = vmul.f32 0.7978846, %v2562_v46 }
 0xc69   : > { %3840 = vtanh.f32 %v2565_v47  ;;  %v2567_v52 = vmul.f32 0.7978846, %v2563_v50 }
 0xc6a   : > { %3842 = vtanh.f32 %v2566_v51 }
 0xc6b   : > { %3844 = vtanh.f32 %v2567_v52 }
 0xc72   : > { %v3839_v53 = vpop.eup %3838 }
 0xc73   : > { %v3841_v54 = vpop.eup %3840  ;;  %v2572_v55 = vadd.f32 1.0, %v3839_v53 }
 0xc74   : > { %v3843_v56 = vpop.eup %3842  ;;  %v2573_v57 = vadd.f32 1.0, %v3841_v54 }
 0xc75   : > { %v3845_v58 = vpop.eup %3844  ;;  %v2576_v59 = vmul.f32 0.5, %v2572_v55  ;;  %v2574_v60 = vadd.f32 1.0, %v3843_v56 }
 0xc76   : > { %v2575_v61 = vadd.f32 1.0, %v3845_v58  ;;  %v2577_v62 = vmul.f32 0.5, %v2573_v57 }
 0xc77   : > { %v2578_v63 = vmul.f32 0.5, %v2574_v60  ;;  %v2580_v1 = vmul.f32 %v2576_v59, %v2540_v30 }
 0xc78   : > { %v2579_v0 = vmul.f32 0.5, %v2575_v61  ;;  %v2581_v4 = vmul.f32 %v2577_v62, %v2542_v32 }
 0xc79   : > { %v2582_v2 = vmul.f32 %v2578_v63, %v2544_v35 }
 0xc7a   : > { %v2583_v7 = vmul.f32 %v2579_v0, %v2546_v6 }
 0xc7b   : > { %v2584_v8 = vpack.c.bf16 %v2582_v2, %v2580_v1 }
 0xc7c   : > { %v2585_v9 = vpack.c.bf16 %v2583_v7, %v2581_v4 }
 0xc7e   : > { %2753 = vmatprep.mubr.bf16.mxu0 %v2585_v9 }
 0xc7f   : > { %2754 = vmatmul.mubr.bf16.vlgmr.msra.gmra.mrb[32].mxu0 %v2584_v8 }
 0xd52   : > { %v3425_v10 = vpop.f32.mrb[32].mxu0 }
 0xd53   : > { %v3426_v14 = vpop.f32.mrb[33].mxu0 }
 0xd54   : > { %v3427_v16 = vadd.f32 %v3426_v14, %v3425_v10  ;;  %v3428_v17 = vpop.f32.mrb[34].mxu0 }
 0xd55   : > { %v3429_v18 = vpop.f32.mrb[35].mxu0 }
 0xd56   : > { %v2756_v19 = vadd.f32 %v3427_v16, %v3285_v11  ;;  %v3430_v20 = vadd.f32 %v3429_v18, %v3428_v17 }
 0xd58   : > { %v2759_v21 = vadd.f32 %v3430_v20, %v3285_v11  ;;  %v2762_v22 = vadd.f32 %v2756_v19, %v5044_v3 }
 0xd5a   : > { %2766 = vadd.xlane.f32.xlu1 %v2762_v22  ;;  %v2763_v24 = vadd.f32 %v2759_v21, %v5046_v49 }
 0xd5c   : > { %2768 = vadd.xlane.f32.xlu0 %v2763_v24 }
 0xde7   : > { %v2767_v23 = vpop.xlane.xlu1 %2766 }
 0xde8   : > { %v2770_v25 = vmul.f32 0.0078125, %v2767_v23 }
 0xde9   : > { %v2769_v26 = vpop.xlane.xlu0 %2768 }
 0xdea   : > { %v2772_v27 = vsub.f32 %v2762_v22, %v2770_v25  ;;  %v2771_v28 = vmul.f32 0.0078125, %v2769_v26 }
 0xdec   : > { %v2773_v29 = vsub.f32 %v2763_v24, %v2771_v28  ;;  %v2774_v30 = vmul.f32 %v2772_v27, %v2772_v27 }
 0xdee   : > { %2776 = vadd.xlane.f32.xlu1 %v2774_v30  ;;  %v2775_v31 = vmul.f32 %v2773_v29, %v2773_v29 }
 0xdf0   : > { %2778 = vadd.xlane.f32.xlu0 %v2775_v31 }
 0xe7b   : > { %v2777_v32 = vpop.xlane.xlu1 %2776 }
 0xe7c   : > { %v2780_v33 = vmul.f32 0.0078125, %v2777_v32 }
 0xe7d   : > { %v2779_v34 = vpop.xlane.xlu0 %2778 }
 0xe7e   : > { %v2782_v3 = vadd.f32 1e-12, %v2780_v33  ;;  %v2781_v35 = vmul.f32 0.0078125, %v2779_v34 }
 0xe80   : > { %3846 = vrsqrt.f32 %v2782_v3  ;;  %v2783_v49 = vadd.f32 1e-12, %v2781_v35 }
 0xe82   : > { %3848 = vrsqrt.f32 %v2783_v49 }
 0xe8a   : > { %v3847_v36 = vpop.eup %3846 }
 0xe8b   : > { %v2786_v6 = vmul.f32 %v3847_v36, %v2772_v27 }
 0xe8c   : > { %v3849_v37 = vpop.eup %3848 }
 0xe8d   : > { %v2794_v38 = vmul.f32 %v3302_v5, %v2786_v6  ;;  %v2787_v41 = vmul.f32 %v3849_v37, %v2773_v29  ;;  %2809 = sbr.rel (%p3304_p6) target bundleno = 3740 (0xe9c), region = 128 }
 0xe8f   : > { %v2802_v39 = vadd.f32 %v3303_v48, %v2794_v38  ;;  %v2795_v42 = vmul.f32 %v3302_v5, %v2787_v41 }
 0xe91   : > { %2804 = vst [vmem:[#allocation2] sm:$0xff] %v2802_v39  ;;  %v2803_v13 = vadd.f32 %v3303_v48, %v2795_v42 }
 0xe93   : > { %2805 = vst [vmem:[#allocation2 + $0x8] sm:$0xff] %v2803_v13 }
 0xe94   : > { %s5324_s0 = smov (!%p2812_p3, %s2811_s0), 0  ;;  %s5326_s15 = smov (!%p2822_p10, %s3310_s15), 0 }
 0xe95   : > { %s5328_s0 = smov (!%p3305_p1, %s5324_s0), 3  ;;  %s5330_s15 = smov (!%p3311_p11, %s5326_s15), 3 }
 0xe96   : > { %s2816_s21 = scalar_lea.vmem %s5256_s27, %s5328_s0  ;;  %s2826_s23 = scalar_lea.vmem %s5256_s27, %s5330_s15 }
 0xe97   : > { %v2817_v43 = vld [vmem:[%s2816_s21] sm:$0x1] }
 0xe98   : > { %v2818_v12 = vadd.f32 %v2817_v43, %v2802_v39  ;;  %v2827_v15 = vld [vmem:[%s2826_s23] sm:$0x1] }
 0xe99   : > { %v2828_v44 = vadd.f32 %v2827_v15, %v2803_v13 }
 0xe9a   : > { %2819 = vst [vmem:[#allocation18] sm:$0x1] %v2818_v12 }
 0xe9b   : > { %2829 = vst [vmem:[#allocation18 + $0x1] sm:$0x1] %v2828_v44 }
 0xe9c PF: > { %p3634_p4 = scmp.eq.s32.totalorder %s4374_s1, 1  ;;  %s4220_s5 = smov [#allocation18]  }
 0xe9d   : > { %s2839_s20 = sshll.u32 %s4220_s5, 4  ;;  %s2840_s20 = int_to_ptr.vmem [resolvable:$true] %s2839_s20 }
 0xe9e   : > { %s4102_s6 = scalar_lea.vmem %s2840_s20, 32  ;;  %p4109_p12 = scmp.lt.s32.totalorder %s2840_s20, %s2840_s20 }
 0xe9f   : > { %p4103_p2 = scmp.ne.s32.totalorder %s2840_s20, %s4102_s6  ;;  %p4110_p0 = scmp.lt.s32.totalorder %s4102_s6, %s4102_s6 }
 0xea1   : > { %p4104_p5 = pnand %p4103_p2, %p3634_p4  ;;  %p4111_p7 = por %p4110_p0, %p4109_p12 }
 0xea3   : > { %p4105_p8 = pneg %p4104_p5 }
 0xea5   : > { %p4112_p13 = pnand %p4111_p7, %p4105_p8 }
 0xea7   : > { %4115 = shalt.err (!%p4112_p13)
}
 0xea8   : > { %s5257_s4 = sld [smem:[#allocation46_spill]] }
 0xeae   : > { %s4116_s25 = scalar_lea.hbm %s5257_s4, 32 }
 0xeaf   : > { %p4117_p9 = scmp.ne.s32.totalorder %s5257_s4, %s4116_s25  ;;  %p4122_p1 = scmp.lt.u32.totalorder %s4116_s25, %s5257_s4 }
 0xeb1   : > { %p4118_p6 = pnand %p4117_p9, %p3634_p4 }
 0xeb3   : > { %p4119_p3 = pneg %p4118_p6 }
 0xeb5   : > { %p4124_p10 = pnand %p4122_p1, %p4119_p3 }
 0xeb7   : > { %4127 = shalt.err (!%p4124_p10)
}
 0xeb8   : > { %3596 = dma.vmem_to_hbm [thread:$0]  (%p3634_p4), %s2840_s20, 32, %s5257_s4, [#allocation8]  }
 0xeb9   : > { %4171 = dma.done.wait (%p3634_p4), [#allocation8], 32  }
 0xeba   : > { %4173 = vsyncadd (%p3634_p4), [#allocation8], 4294967264 }
 0xebb PF: > { %s5258_s10 = sld [smem:[#allocation26_spill]]  ;;  %s5259_s3 = sld [smem:[#allocation25_spill]] }
 0xebc   : > { %s5260_s8 = sld [smem:[#allocation28_spill]]  ;;  %s5261_s19 = sld [smem:[#allocation27_spill]] }
 0xebd   : > { %s5262_s20 = smov %s4180_s22  ;;  %s5265_s23 = smov %s4192_s24 }
 0xec1   : > { %s39_s25 = sadd.s32 1, %s5258_s10   ;;  %s5263_s22 = smov %s5259_s3 }
 0xec2   : > { %p36_p11 = scmp.ge.s32.totalorder %s39_s25, 4   ;;  %s5264_s3 = smov %s5260_s8 }
 0xec3   : > { %s5266_s24 = smov %s5261_s19 }
 0xec4   :  { %38 = sbr.rel (!%p36_p11) target bundleno = 38 (0x26), region = 224 }
 0xecb   :  { %2852 = vsyncpa [#allocation7], 1 }
 0xecc   :  { %2854 = vsyncpa [#allocation7 + $0x1], 1 }
 0xecd   :  { %2855 = vsyncpa [#allocation10], 1 }
 0xece   :  { %2856 = vsyncpa [#allocation13], 1 }
 0xecf   :  { %2857 = vsyncpa [#allocation8], 1 }
 0xed0   :  { %2859 = vsyncpa [#allocation8 + $0x1], 1 }

</bundles_post_ra>
